<compile_context>
chip_gen: v7x
topology: tpu7x:2x2x1
jax: 0.10.0
libtpu: 0.0.40
codegen_flags: <defaults>
</compile_context>

<pallas_src>
import functools

import jax
import jax.numpy as jnp
from jax.experimental import pallas as pl
from jax.experimental.pallas import tpu as pltpu

EPS = 1e-5
_LANE = 128                      # channel padding granularity (lane width)
_TM_CAP = 512                    # max rows per M tile (HBM-bound passes like >=512)
_VMEM_LIMIT = 32 * 1024 * 1024   # explicit scoped-VMEM cap, safe on v5e/v6e/v7x


def _round_up(x, m):
    return (x + m - 1) // m * m


def _choose_tm(mpad, cap=_TM_CAP):
    """Largest row tile <= cap that divides mpad (mpad is a multiple of 8)."""
    for t in (cap, 256, 128, 64, 32, 16, 8):
        if t <= cap and mpad % t == 0:
            return t
    return 8


# ----------------------------- Pallas kernels --------------------------------

def _mm_stats_kernel(x_ref, w_ref, sc_ref, sh_ref, y_ref, s_ref, q_ref, *, pre_act):
    """(TM, K) x (K, Cp) MXU matmul with the producer's BN+ReLU optionally fused
    into the load, plus per-tile per-channel sum / sum-of-squares for train-BN."""
    x = x_ref[...]
    if pre_act:                                  # train-mode BN of producer + ReLU
        x = jnp.maximum(x * sc_ref[...] + sh_ref[...], 0.0)
    y = jnp.dot(x.astype(jnp.bfloat16), w_ref[...], preferred_element_type=jnp.float32)
    y_ref[...] = y
    s_ref[...] = jnp.sum(y, axis=0, keepdims=True)[None]
    q_ref[...] = jnp.sum(y * y, axis=0, keepdims=True)[None]


def _conv3x3_stats_kernel(a_ref, w_ref, y_ref, s_ref, q_ref, *, stride, ho, wo):
    """3x3 conv for one image as 9 accumulated MXU matmuls over statically shifted
    views of the pre-padded, space-to-depth activation.  No HBM im2col."""
    cout = w_ref.shape[-1]
    acc = jnp.zeros((ho * wo, cout), jnp.float32)
    phases = {}
    for dy in range(3):
        for dx in range(3):
            p = (dy % stride) * stride + (dx % stride)
            if p not in phases:
                phases[p] = a_ref[p]                         # (Hq, Wq, Cin) bf16
            tap = phases[p][dy // stride:dy // stride + ho,
                            dx // stride:dx // stride + wo, :]
            acc = acc + jnp.dot(tap.reshape(ho * wo, -1), w_ref[dy * 3 + dx],
                                preferred_element_type=jnp.float32)
    y_ref[...] = acc[None]
    s_ref[...] = jnp.sum(acc, axis=0, keepdims=True)[None]
    q_ref[...] = jnp.sum(acc * acc, axis=0, keepdims=True)[None]


def _final_kernel(yr_ref, ys_ref, scr_ref, shr_ref, scs_ref, shs_ref, o_ref):
    """Fused: BN(residual) + BN(shortcut) + add + ReLU."""
    r = yr_ref[...] * scr_ref[...] + shr_ref[...]
    s = ys_ref[...] * scs_ref[...] + shs_ref[...]
    o_ref[...] = jnp.maximum(r + s, 0.0)


# ----------------------------- Pallas wrappers --------------------------------

def conv_matmul(x, w_mat, scale=None, shift=None):
    """x: (M, K) bf16 (raw) or f32 (when the producer's BN+ReLU is fused via
    scale/shift).  w_mat: (K, Cp) bf16, VMEM-resident for the whole call.
    Returns (y f32 (Mpad, Cp), channel sum (Cp,), channel sumsq (Cp,))."""
    M, K = x.shape
    Cp = w_mat.shape[1]
    pre_act = scale is not None
    Mpad = _round_up(M, 8)
    if Mpad != M:
        # Zero-padded rows stay exactly zero through the matmul only without a
        # fused pre-activation (the shift would leak into the BN statistics).
        assert not pre_act, "fused BN+ReLU input requires M % 8 == 0"
        x = jnp.pad(x, ((0, Mpad - M), (0, 0)))
    tm = _choose_tm(Mpad)
    nm = Mpad // tm

    if pre_act:
        scale = scale.reshape(1, K).astype(jnp.float32)
        shift = shift.reshape(1, K).astype(jnp.float32)
    else:  # unused inside the kernel, but keeps one signature / spec list
        scale = jnp.zeros((1, K), jnp.float32)
        shift = jnp.zeros((1, K), jnp.float32)

    in_bytes = 4 if pre_act else 2
    cost = pl.CostEstimate(
        flops=2 * Mpad * K * Cp, transcendentals=0,
        bytes_accessed=Mpad * K * in_bytes + K * Cp * 2 + Mpad * Cp * 4 + 2 * nm * Cp * 4)

    y, s, q = pl.pallas_call(
        functools.partial(_mm_stats_kernel, pre_act=pre_act),
        grid_spec=pltpu.PrefetchScalarGridSpec(
            num_scalar_prefetch=0,
            grid=(nm,),
            in_specs=[
                pl.BlockSpec((tm, K), lambda i: (i, 0)),    # activation row tile
                pl.BlockSpec((K, Cp), lambda i: (0, 0)),    # weights: VMEM-resident
                pl.BlockSpec((1, K), lambda i: (0, 0)),     # producer BN scale
                pl.BlockSpec((1, K), lambda i: (0, 0)),     # producer BN shift
            ],
            out_specs=[
                pl.BlockSpec((tm, Cp), lambda i: (i, 0)),   # Cp-wide lane-dense store
                pl.BlockSpec((1, 1, Cp), lambda i: (i, 0, 0)),
                pl.BlockSpec((1, 1, Cp), lambda i: (i, 0, 0)),
            ],
        ),
        out_shape=(
            jax.ShapeDtypeStruct((Mpad, Cp), jnp.float32),
            jax.ShapeDtypeStruct((nm, 1, Cp), jnp.float32),
            jax.ShapeDtypeStruct((nm, 1, Cp), jnp.float32),
        ),
        compiler_params=pltpu.CompilerParams(
            dimension_semantics=("parallel",), vmem_limit_bytes=_VMEM_LIMIT),
        cost_estimate=cost,
    )(x, w_mat, scale, shift)
    return y, jnp.sum(s, axis=(0, 1)), jnp.sum(q, axis=(0, 1))


def conv3x3(a_dec, w_tap, stride, ho, wo):
    """a_dec: (N*stride*stride, Hq, Wq, Cin) bf16 — padded + space-to-depth
    activation.  w_tap: (9, Cin, Cout) bf16, VMEM-resident.  One grid step per
    image ("parallel" -> shards across v7x's two TensorCores)."""
    ss = stride * stride
    n_img = a_dec.shape[0] // ss
    _, hq, wq, cin = a_dec.shape
    cout = w_tap.shape[-1]
    m_img = ho * wo

    cost = pl.CostEstimate(
        flops=2 * n_img * m_img * 9 * cin * cout, transcendentals=0,
        bytes_accessed=a_dec.size * 2 + w_tap.size * 2 + n_img * m_img * cout * 4)

    y, s, q = pl.pallas_call(
        functools.partial(_conv3x3_stats_kernel, stride=stride, ho=ho, wo=wo),
        grid_spec=pltpu.PrefetchScalarGridSpec(
            num_scalar_prefetch=0,
            grid=(n_img,),
            in_specs=[
                pl.BlockSpec((ss, hq, wq, cin), lambda n: (n, 0, 0, 0)),
                pl.BlockSpec((9, cin, cout), lambda n: (0, 0, 0)),   # weights resident
            ],
            out_specs=[
                pl.BlockSpec((1, m_img, cout), lambda n: (n, 0, 0)),
                pl.BlockSpec((1, 1, cout), lambda n: (n, 0, 0)),
                pl.BlockSpec((1, 1, cout), lambda n: (n, 0, 0)),
            ],
        ),
        out_shape=(
            jax.ShapeDtypeStruct((n_img, m_img, cout), jnp.float32),
            jax.ShapeDtypeStruct((n_img, 1, cout), jnp.float32),
            jax.ShapeDtypeStruct((n_img, 1, cout), jnp.float32),
        ),
        compiler_params=pltpu.CompilerParams(
            dimension_semantics=("parallel",), vmem_limit_bytes=_VMEM_LIMIT),
        cost_estimate=cost,
    )(a_dec, w_tap)
    return y.reshape(n_img * m_img, cout), jnp.sum(s, axis=(0, 1)), jnp.sum(q, axis=(0, 1))


def final_add_relu(y_res, y_sc, sc_r, sh_r, sc_s, sh_s):
    """Fused BN(residual) + BN(shortcut) + add + ReLU (aliased onto y_res's buffer)."""
    Mpad, Cp = y_res.shape
    if y_sc.shape[0] != Mpad:
        y_sc = jnp.pad(y_sc, ((0, Mpad - y_sc.shape[0]), (0, 0)))
    y_sc = y_sc.astype(jnp.float32)
    tm = _choose_tm(Mpad)
    return pl.pallas_call(
        _final_kernel,
        grid=(Mpad // tm,),
        in_specs=[pl.BlockSpec((tm, Cp), lambda i: (i, 0)),
                  pl.BlockSpec((tm, Cp), lambda i: (i, 0)),
                  pl.BlockSpec((1, Cp), lambda i: (0, 0)),
                  pl.BlockSpec((1, Cp), lambda i: (0, 0)),
                  pl.BlockSpec((1, Cp), lambda i: (0, 0)),
                  pl.BlockSpec((1, Cp), lambda i: (0, 0))],
        out_specs=pl.BlockSpec((tm, Cp), lambda i: (i, 0)),
        out_shape=jax.ShapeDtypeStruct((Mpad, Cp), jnp.float32),
        compiler_params=pltpu.CompilerParams(
            dimension_semantics=("parallel",), vmem_limit_bytes=_VMEM_LIMIT),
        input_output_aliases={0: 0},
    )(y_res, y_sc, sc_r.reshape(1, Cp), sh_r.reshape(1, Cp),
      sc_s.reshape(1, Cp), sh_s.reshape(1, Cp))


# ------------------------------- glue (JAX) ----------------------------------

def bn_scale_shift(s, q, count, gamma, beta):
    """Per-channel train-mode BN folded to y*scale + shift (biased variance).
    TODO(synk): switch to per-tile Welford / shifted sums for production-size M —
    E[x^2]-mean^2 in f32 loses precision at very large row counts."""
    mean = s / count
    var = jnp.maximum(q / count - mean * mean, 0.0)
    scale = gamma * jax.lax.rsqrt(var + EPS)
    shift = beta - mean * scale
    return scale, shift


def _preact_pad_s2d(y, scale, shift, n, h, w, c, stride):
    """relu(BN(y)) + spatial zero-pad (pad=1) + space-to-depth for the 3x3 taps.
    One fused XLA pass over the narrow mid-channel activation; the 9x HBM im2col
    is gone — the 3x3 conv kernel reads this array exactly once."""
    a = jnp.maximum(y[:n * h * w] * scale[None] + shift[None], 0.0).astype(jnp.bfloat16)
    a = a.reshape(n, h, w, c)
    hq = -(-(h + 2) // stride)
    wq = -(-(w + 2) // stride)
    a = jnp.pad(a, ((0, 0), (1, hq * stride - h - 1), (1, wq * stride - w - 1), (0, 0)))
    a = a.reshape(n, hq, stride, wq, stride, c)
    a = jnp.transpose(a, (0, 2, 4, 1, 3, 5))            # (n, py, px, hq, wq, c)
    return a.reshape(n * stride * stride, hq, wq, c), hq, wq


def _pad_cols(a, cp):
    return jnp.pad(a, ((0, 0), (0, cp - a.shape[1])))


def _pad_vec(v, cp):
    return jnp.pad(v.astype(jnp.float32), (0, cp - v.shape[0]))


def _w1x1_to_mat(w, cin_p, cout_p):
    cout, cin = w.shape[0], w.shape[1]
    m = jnp.transpose(w[:, :, 0, 0], (1, 0))                         # (Cin, Cout)
    return jnp.pad(m, ((0, cin_p - cin), (0, cout_p - cout))).astype(jnp.bfloat16)


def _w3x3_to_taps(w, cin_p, cout_p):
    cout, cin, kh, kw = w.shape
    m = jnp.transpose(w, (2, 3, 1, 0))                               # (3, 3, Cin, Cout)
    m = jnp.pad(m, ((0, 0), (0, 0), (0, cin_p - cin), (0, cout_p - cout)))
    return m.reshape(kh * kw, cin_p, cout_p).astype(jnp.bfloat16)


def bottleneck_forward(x_nchw, params, stride):
    x = jnp.transpose(x_nchw, (0, 2, 3, 1)).astype(jnp.float32)      # NCHW -> NHWC
    N, H, W, Cin = x.shape
    mid = params["w1"].shape[0]                                      # out_ch
    Cexp = params["w3"].shape[0]                                     # out_ch * 4
    Ho = (H + 2 - 3) // stride + 1
    Wo = (W + 2 - 3) // stride + 1

    cin_p = _round_up(Cin, _LANE)
    cmid_p = _round_up(mid, _LANE)
    cout_p = _round_up(Cexp, _LANE)

    M1 = N * H * W
    M2 = N * Ho * Wo

    # ---- conv1: 1x1, stride 1 (stats only; BN1+ReLU folded into conv2's prep) -----
    x_mat = _pad_cols(x.reshape(M1, Cin), cin_p).astype(jnp.bfloat16)
    y1, s1, q1 = conv_matmul(x_mat, _w1x1_to_mat(params["w1"], cin_p, cmid_p))
    sc1, sh1 = bn_scale_shift(s1, q1, M1, _pad_vec(params["g1"], cmid_p),
                              _pad_vec(params["b1"], cmid_p))

    # ---- conv2: 3x3, stride s, pad 1 — 9-tap in-kernel conv, no im2col -------------
    a_dec, _, _ = _preact_pad_s2d(y1, sc1, sh1, N, H, W, cmid_p, stride)
    y2, s2, q2 = conv3x3(a_dec, _w3x3_to_taps(params["w2"], cmid_p, cmid_p),
                         stride, Ho, Wo)
    sc2, sh2 = bn_scale_shift(s2, q2, M2, _pad_vec(params["g2"], cmid_p),
                              _pad_vec(params["b2"], cmid_p))

    # ---- conv3: 1x1 with BN2+ReLU fused into its load (BN3 fused into the finale) ---
    y3, s3, q3 = conv_matmul(y2, _w1x1_to_mat(params["w3"], cmid_p, cout_p),
                             scale=sc2, shift=sh2)
    sc3, sh3 = bn_scale_shift(s3, q3, M2, _pad_vec(params["g3"], cout_p),
                              _pad_vec(params["b3"], cout_p))

    # ---- shortcut -------------------------------------------------------------------
    if "ws" in params:
        # TODO(synk): fold this strided spatial subsample into the shortcut matmul's DMA.
        xs = x[:, ::stride, ::stride, :]                             # (N, Ho, Wo, Cin)
        xs_mat = _pad_cols(xs.reshape(M2, Cin), cin_p).astype(jnp.bfloat16)
        ysc, ss_, qs_ = conv_matmul(xs_mat, _w1x1_to_mat(params["ws"], cin_p, cout_p))
        scs, shs = bn_scale_shift(ss_, qs_, M2, _pad_vec(params["gs"], cout_p),
                                  _pad_vec(params["bs"], cout_p))
    else:
        ysc = _pad_cols(x.reshape(M1, Cin), cout_p)   # identity (stride 1, Cin == Cexp)
        scs = jnp.ones((cout_p,), jnp.float32)
        shs = jnp.zeros((cout_p,), jnp.float32)

    # ---- fused BN3 + BN(shortcut) + add + ReLU ---------------------------------------
    out = final_add_relu(y3, ysc, sc3, sh3, scs, shs)
    out = out[:M2].reshape(N, Ho, Wo, cout_p)[:, :, :, :Cexp]
    return jnp.transpose(out, (0, 3, 1, 2))                          # NHWC -> NCHW


# --------------------------- pure-JAX reference -------------------------------

def _ref_conv(x_nhwc, w_oihw, stride, pad):
    return jax.lax.conv_general_dilated(
        x_nhwc, jnp.transpose(w_oihw, (2, 3, 1, 0)),
        window_strides=(stride, stride), padding=[(pad, pad), (pad, pad)],
        dimension_numbers=("NHWC", "HWIO", "NHWC"),
        precision=jax.lax.Precision.HIGHEST)


def _ref_bn(y, g, b):
    mean = jnp.mean(y, axis=(0, 1, 2), keepdims=True)
    var = jnp.mean((y - mean) ** 2, axis=(0, 1, 2), keepdims=True)
    return (y - mean) * jax.lax.rsqrt(var + EPS) * g + b


def bottleneck_reference(x_nchw, params, stride):
    x = jnp.transpose(x_nchw, (0, 2, 3, 1)).astype(jnp.float32)
    y = jnp.maximum(_ref_bn(_ref_conv(x, params["w1"], 1, 0), params["g1"], params["b1"]), 0.0)
    y = jnp.maximum(_ref_bn(_ref_conv(y, params["w2"], stride, 1), params["g2"], params["b2"]), 0.0)
    y = _ref_bn(_ref_conv(y, params["w3"], 1, 0), params["g3"], params["b3"])
    if "ws" in params:
        s = _ref_bn(_ref_conv(x, params["ws"], stride, 0), params["gs"], params["bs"])
    else:
        s = x
    return jnp.transpose(jnp.maximum(y + s, 0.0), (0, 3, 1, 2))


# ----------------------------------- main -------------------------------------

if __name__ == "__main__":
    N, in_ch, out_ch, H, W, stride = 2, 4, 4, 16, 16, 2
    exp = 4
    Cexp = out_ch * exp

    key = jax.random.PRNGKey(0)
    k = jax.random.split(key, 12)
    params = {
        "w1": 0.1 * jax.random.normal(k[0], (out_ch, in_ch, 1, 1), jnp.float32),
        "g1": 1.0 + 0.1 * jax.random.normal(k[1], (out_ch,), jnp.float32),
        "b1": 0.1 * jax.random.normal(k[2], (out_ch,), jnp.float32),
        "w2": 0.1 * jax.random.normal(k[3], (out_ch, out_ch, 3, 3), jnp.float32),
        "g2": 1.0 + 0.1 * jax.random.normal(k[4], (out_ch,), jnp.float32),
        "b2": 0.1 * jax.random.normal(k[5], (out_ch,), jnp.float32),
        "w3": 0.1 * jax.random.normal(k[6], (Cexp, out_ch, 1, 1), jnp.float32),
        "g3": 1.0 + 0.1 * jax.random.normal(k[7], (Cexp,), jnp.float32),
        "b3": 0.1 * jax.random.normal(k[8], (Cexp,), jnp.float32),
    }
    if stride != 1 or in_ch != Cexp:
        params["ws"] = 0.1 * jax.random.normal(k[9], (Cexp, in_ch, 1, 1), jnp.float32)
        params["gs"] = 1.0 + 0.1 * jax.random.normal(k[10], (Cexp,), jnp.float32)
        params["bs"] = 0.1 * jax.random.normal(k[11], (Cexp,), jnp.float32)

    x = jax.random.normal(jax.random.PRNGKey(42), (N, in_ch, H, W), jnp.float32)

    fwd = jax.jit(bottleneck_forward, static_argnames="stride")
    out = jax.block_until_ready(fwd(x, params, stride=stride))
    ref = jax.block_until_ready(bottleneck_reference(x, params, stride))

    Ho = (H - 1) // stride + 1
    assert out.shape == (N, Cexp, Ho, Ho), out.shape
    assert bool(jnp.all(jnp.isfinite(out)))
    assert bool(jnp.allclose(out, ref, rtol=2e-2, atol=2e-2)), \
        float(jnp.max(jnp.abs(out - ref)))

    print("KERNEL_OK")
</pallas_src>

<mosaic_0001>
module attributes {stable_mosaic.version = 11 : i64} {
  func.func @_mm_stats_kernel(%arg0: i32, %arg1: memref<512x128xbf16, #tpu.memory_space<vmem>>, %arg2: memref<128x128xbf16, #tpu.memory_space<vmem>>, %arg3: memref<1x128xf32, #tpu.memory_space<vmem>>, %arg4: memref<1x128xf32, #tpu.memory_space<vmem>>, %arg5: memref<512x128xf32, #tpu.memory_space<vmem>>, %arg6: memref<1x1x128xf32, #tpu.memory_space<vmem>>, %arg7: memref<1x1x128xf32, #tpu.memory_space<vmem>>) attributes {dimension_semantics = [#tpu.dimension_semantics<parallel>], iteration_bounds = array<i64: 1>, scalar_prefetch = 0 : i64, scratch_operands = 0 : i64, tpu.core_type = #tpu.core_type<tc>, window_params = [{transform_indices = @transform_0, window_bounds = array<i64: 512, 128>}, {pipeline_mode = #tpu.pipeline_mode<synchronous>, transform_indices = @transform_1, window_bounds = array<i64: 128, 128>}, {pipeline_mode = #tpu.pipeline_mode<synchronous>, transform_indices = @transform_2, window_bounds = array<i64: 1, 128>}, {pipeline_mode = #tpu.pipeline_mode<synchronous>, transform_indices = @transform_3, window_bounds = array<i64: 1, 128>}, {transform_indices = @transform_4, window_bounds = array<i64: 512, 128>}, {transform_indices = @transform_5, window_bounds = array<i64: 1, 1, 128>}, {transform_indices = @transform_6, window_bounds = array<i64: 1, 1, 128>}]} {
    %c0 = arith.constant 0 : index
    %c0_0 = arith.constant 0 : index
    %0 = vector.load %arg1[%c0, %c0_0] : memref<512x128xbf16, #tpu.memory_space<vmem>>, vector<512x128xbf16>
    %c0_1 = arith.constant 0 : index
    %c0_2 = arith.constant 0 : index
    %1 = vector.load %arg2[%c0_1, %c0_2] : memref<128x128xbf16, #tpu.memory_space<vmem>>, vector<128x128xbf16>
    %cst = arith.constant dense<0.000000e+00> : vector<512x128xf32>
    %2 = tpu.matmul %0, %1, %cst {dimension_numbers = #tpu.dot_dimension_numbers<[1], [0], [0], [1], [0, 0, 1, 1], [], []>} : vector<512x128xbf16>, vector<128x128xbf16>, vector<512x128xf32> -> vector<512x128xf32>
    %c0_3 = arith.constant 0 : index
    %c0_4 = arith.constant 0 : index
    %3 = vector.load %arg5[%c0_3, %c0_4] : memref<512x128xf32, #tpu.memory_space<vmem>>, vector<512x128xf32>
    tpu.vector_store %arg5[%c0_3, %c0_4], %2 {strides = array<i32>} : memref<512x128xf32, #tpu.memory_space<vmem>>, vector<512x128xf32>,
    %cst_5 = arith.constant dense<0.000000e+00> : vector<128xf32>
    %4 = vector.multi_reduction <add>, %2, %cst_5 [0] : vector<512x128xf32> to vector<128xf32>
    %5 = vector.shape_cast %4 : vector<128xf32> to vector<1x128xf32>
    %6 = vector.shape_cast %5 : vector<1x128xf32> to vector<1x1x128xf32>
    %c0_6 = arith.constant 0 : index
    %c0_7 = arith.constant 0 : index
    %c0_8 = arith.constant 0 : index
    %7 = vector.load %arg6[%c0_6, %c0_7, %c0_8] : memref<1x1x128xf32, #tpu.memory_space<vmem>>, vector<1x1x128xf32>
    tpu.vector_store %arg6[%c0_6, %c0_7, %c0_8], %6 {strides = array<i32>} : memref<1x1x128xf32, #tpu.memory_space<vmem>>, vector<1x1x128xf32>,
    %8 = arith.mulf %2, %2 : vector<512x128xf32>
    %cst_9 = arith.constant dense<0.000000e+00> : vector<128xf32>
    %9 = vector.multi_reduction <add>, %8, %cst_9 [0] : vector<512x128xf32> to vector<128xf32>
    %10 = vector.shape_cast %9 : vector<128xf32> to vector<1x128xf32>
    %11 = vector.shape_cast %10 : vector<1x128xf32> to vector<1x1x128xf32>
    %c0_10 = arith.constant 0 : index
    %c0_11 = arith.constant 0 : index
    %c0_12 = arith.constant 0 : index
    %12 = vector.load %arg7[%c0_10, %c0_11, %c0_12] : memref<1x1x128xf32, #tpu.memory_space<vmem>>, vector<1x1x128xf32>
    tpu.vector_store %arg7[%c0_10, %c0_11, %c0_12], %11 {strides = array<i32>} : memref<1x1x128xf32, #tpu.memory_space<vmem>>, vector<1x1x128xf32>,
    return
  }
  func.func @transform_0(%arg0: i32) -> (i32, i32) {
    %c0_i32 = arith.constant 0 : i32
    %c0_i32_0 = arith.constant 0 : i32
    return %arg0, %c0_i32 : i32, i32
  }
  func.func @transform_1(%arg0: i32) -> (i32, i32) {
    %c0_i32 = arith.constant 0 : i32
    %c0_i32_0 = arith.constant 0 : i32
    %c0_i32_1 = arith.constant 0 : i32
    return %c0_i32, %c0_i32_0 : i32, i32
  }
  func.func @transform_2(%arg0: i32) -> (i32, i32) {
    %c0_i32 = arith.constant 0 : i32
    %c0_i32_0 = arith.constant 0 : i32
    %c0_i32_1 = arith.constant 0 : i32
    return %c0_i32, %c0_i32_0 : i32, i32
  }
  func.func @transform_3(%arg0: i32) -> (i32, i32) {
    %c0_i32 = arith.constant 0 : i32
    %c0_i32_0 = arith.constant 0 : i32
    %c0_i32_1 = arith.constant 0 : i32
    return %c0_i32, %c0_i32_0 : i32, i32
  }
  func.func @transform_4(%arg0: i32) -> (i32, i32) {
    %c0_i32 = arith.constant 0 : i32
    %c0_i32_0 = arith.constant 0 : i32
    return %arg0, %c0_i32 : i32, i32
  }
  func.func @transform_5(%arg0: i32) -> (i32, i32, i32) {
    %c0_i32 = arith.constant 0 : i32
    %c0_i32_0 = arith.constant 0 : i32
    %c0_i32_1 = arith.constant 0 : i32
    return %arg0, %c0_i32, %c0_i32_0 : i32, i32, i32
  }
  func.func @transform_6(%arg0: i32) -> (i32, i32, i32) {
    %c0_i32 = arith.constant 0 : i32
    %c0_i32_0 = arith.constant 0 : i32
    %c0_i32_1 = arith.constant 0 : i32
    return %arg0, %c0_i32, %c0_i32_0 : i32, i32, i32
  }
}

module attributes {stable_mosaic.version = 11 : i64} {
  func.func @_conv3x3_stats_kernel(%arg0: i32, %arg1: memref<4x9x9x128xbf16, #tpu.memory_space<vmem>>, %arg2: memref<9x128x128xbf16, #tpu.memory_space<vmem>>, %arg3: memref<1x64x128xf32, #tpu.memory_space<vmem>>, %arg4: memref<1x1x128xf32, #tpu.memory_space<vmem>>, %arg5: memref<1x1x128xf32, #tpu.memory_space<vmem>>) attributes {dimension_semantics = [#tpu.dimension_semantics<parallel>], iteration_bounds = array<i64: 2>, scalar_prefetch = 0 : i64, scratch_operands = 0 : i64, tpu.core_type = #tpu.core_type<tc>, window_params = [{transform_indices = @transform_0, window_bounds = array<i64: 4, 9, 9, 128>}, {pipeline_mode = #tpu.pipeline_mode<synchronous>, transform_indices = @transform_1, window_bounds = array<i64: 9, 128, 128>}, {transform_indices = @transform_2, window_bounds = array<i64: 1, 64, 128>}, {transform_indices = @transform_3, window_bounds = array<i64: 1, 1, 128>}, {transform_indices = @transform_4, window_bounds = array<i64: 1, 1, 128>}]} {
    %cst = arith.constant 0.000000e+00 : f32
    %0 = vector.broadcast %cst : f32 to vector<64x128xf32>
    %c0 = arith.constant 0 : index
    %c0_0 = arith.constant 0 : index
    %c0_1 = arith.constant 0 : index
    %c0_2 = arith.constant 0 : index
    %1 = vector.load %arg1[%c0, %c0_0, %c0_1, %c0_2] : memref<4x9x9x128xbf16, #tpu.memory_space<vmem>>, vector<1x9x9x128xbf16>
    %2 = vector.shape_cast %1 : vector<1x9x9x128xbf16> to vector<9x9x128xbf16>
    %3 = vector.extract_strided_slice %2 {offsets = [0, 0, 0], sizes = [8, 8, 128], strides = [1, 1, 1]} : vector<9x9x128xbf16> to vector<8x8x128xbf16>
    %4 = vector.shape_cast %3 : vector<8x8x128xbf16> to vector<64x128xbf16>
    %c0_3 = arith.constant 0 : index
    %c0_4 = arith.constant 0 : index
    %c0_5 = arith.constant 0 : index
    %5 = vector.load %arg2[%c0_3, %c0_4, %c0_5] : memref<9x128x128xbf16, #tpu.memory_space<vmem>>, vector<1x128x128xbf16>
    %6 = vector.shape_cast %5 : vector<1x128x128xbf16> to vector<128x128xbf16>
    %cst_6 = arith.constant dense<0.000000e+00> : vector<64x128xf32>
    %7 = tpu.matmul %4, %6, %cst_6 {dimension_numbers = #tpu.dot_dimension_numbers<[1], [0], [0], [1], [0, 0, 1, 1], [], []>} : vector<64x128xbf16>, vector<128x128xbf16>, vector<64x128xf32> -> vector<64x128xf32>
    %8 = arith.addf %0, %7 : vector<64x128xf32>
    %c1 = arith.constant 1 : index
    %c0_7 = arith.constant 0 : index
    %c0_8 = arith.constant 0 : index
    %c0_9 = arith.constant 0 : index
    %9 = vector.load %arg1[%c1, %c0_7, %c0_8, %c0_9] : memref<4x9x9x128xbf16, #tpu.memory_space<vmem>>, vector<1x9x9x128xbf16>
    %10 = vector.shape_cast %9 : vector<1x9x9x128xbf16> to vector<9x9x128xbf16>
    %11 = vector.extract_strided_slice %10 {offsets = [0, 0, 0], sizes = [8, 8, 128], strides = [1, 1, 1]} : vector<9x9x128xbf16> to vector<8x8x128xbf16>
    %12 = vector.shape_cast %11 : vector<8x8x128xbf16> to vector<64x128xbf16>
    %c1_10 = arith.constant 1 : index
    %c0_11 = arith.constant 0 : index
    %c0_12 = arith.constant 0 : index
    %13 = vector.load %arg2[%c1_10, %c0_11, %c0_12] : memref<9x128x128xbf16, #tpu.memory_space<vmem>>, vector<1x128x128xbf16>
    %14 = vector.shape_cast %13 : vector<1x128x128xbf16> to vector<128x128xbf16>
    %cst_13 = arith.constant dense<0.000000e+00> : vector<64x128xf32>
    %15 = tpu.matmul %12, %14, %cst_13 {dimension_numbers = #tpu.dot_dimension_numbers<[1], [0], [0], [1], [0, 0, 1, 1], [], []>} : vector<64x128xbf16>, vector<128x128xbf16>, vector<64x128xf32> -> vector<64x128xf32>
    %16 = arith.addf %8, %15 : vector<64x128xf32>
    %17 = vector.extract_strided_slice %2 {offsets = [0, 1, 0], sizes = [8, 8, 128], strides = [1, 1, 1]} : vector<9x9x128xbf16> to vector<8x8x128xbf16>
    %18 = vector.shape_cast %17 : vector<8x8x128xbf16> to vector<64x128xbf16>
    %c2 = arith.constant 2 : index
    %c0_14 = arith.constant 0 : index
    %c0_15 = arith.constant 0 : index
    %19 = vector.load %arg2[%c2, %c0_14, %c0_15] : memref<9x128x128xbf16, #tpu.memory_space<vmem>>, vector<1x128x128xbf16>
    %20 = vector.shape_cast %19 : vector<1x128x128xbf16> to vector<128x128xbf16>
    %cst_16 = arith.constant dense<0.000000e+00> : vector<64x128xf32>
    %21 = tpu.matmul %18, %20, %cst_16 {dimension_numbers = #tpu.dot_dimension_numbers<[1], [0], [0], [1], [0, 0, 1, 1], [], []>} : vector<64x128xbf16>, vector<128x128xbf16>, vector<64x128xf32> -> vector<64x128xf32>
    %22 = arith.addf %16, %21 : vector<64x128xf32>
    %c2_17 = arith.constant 2 : index
    %c0_18 = arith.constant 0 : index
    %c0_19 = arith.constant 0 : index
    %c0_20 = arith.constant 0 : index
    %23 = vector.load %arg1[%c2_17, %c0_18, %c0_19, %c0_20] : memref<4x9x9x128xbf16, #tpu.memory_space<vmem>>, vector<1x9x9x128xbf16>
    %24 = vector.shape_cast %23 : vector<1x9x9x128xbf16> to vector<9x9x128xbf16>
    %25 = vector.extract_strided_slice %24 {offsets = [0, 0, 0], sizes = [8, 8, 128], strides = [1, 1, 1]} : vector<9x9x128xbf16> to vector<8x8x128xbf16>
    %26 = vector.shape_cast %25 : vector<8x8x128xbf16> to vector<64x128xbf16>
    %c3 = arith.constant 3 : index
    %c0_21 = arith.constant 0 : index
    %c0_22 = arith.constant 0 : index
    %27 = vector.load %arg2[%c3, %c0_21, %c0_22] : memref<9x128x128xbf16, #tpu.memory_space<vmem>>, vector<1x128x128xbf16>
    %28 = vector.shape_cast %27 : vector<1x128x128xbf16> to vector<128x128xbf16>
    %cst_23 = arith.constant dense<0.000000e+00> : vector<64x128xf32>
    %29 = tpu.matmul %26, %28, %cst_23 {dimension_numbers = #tpu.dot_dimension_numbers<[1], [0], [0], [1], [0, 0, 1, 1], [], []>} : vector<64x128xbf16>, vector<128x128xbf16>, vector<64x128xf32> -> vector<64x128xf32>
    %30 = arith.addf %22, %29 : vector<64x128xf32>
    %c3_24 = arith.constant 3 : index
    %c0_25 = arith.constant 0 : index
    %c0_26 = arith.constant 0 : index
    %c0_27 = arith.constant 0 : index
    %31 = vector.load %arg1[%c3_24, %c0_25, %c0_26, %c0_27] : memref<4x9x9x128xbf16, #tpu.memory_space<vmem>>, vector<1x9x9x128xbf16>
    %32 = vector.shape_cast %31 : vector<1x9x9x128xbf16> to vector<9x9x128xbf16>
    %33 = vector.extract_strided_slice %32 {offsets = [0, 0, 0], sizes = [8, 8, 128], strides = [1, 1, 1]} : vector<9x9x128xbf16> to vector<8x8x128xbf16>
    %34 = vector.shape_cast %33 : vector<8x8x128xbf16> to vector<64x128xbf16>
    %c4 = arith.constant 4 : index
    %c0_28 = arith.constant 0 : index
    %c0_29 = arith.constant 0 : index
    %35 = vector.load %arg2[%c4, %c0_28, %c0_29] : memref<9x128x128xbf16, #tpu.memory_space<vmem>>, vector<1x128x128xbf16>
    %36 = vector.shape_cast %35 : vector<1x128x128xbf16> to vector<128x128xbf16>
    %cst_30 = arith.constant dense<0.000000e+00> : vector<64x128xf32>
    %37 = tpu.matmul %34, %36, %cst_30 {dimension_numbers = #tpu.dot_dimension_numbers<[1], [0], [0], [1], [0, 0, 1, 1], [], []>} : vector<64x128xbf16>, vector<128x128xbf16>, vector<64x128xf32> -> vector<64x128xf32>
    %38 = arith.addf %30, %37 : vector<64x128xf32>
    %39 = vector.extract_strided_slice %24 {offsets = [0, 1, 0], sizes = [8, 8, 128], strides = [1, 1, 1]} : vector<9x9x128xbf16> to vector<8x8x128xbf16>
    %40 = vector.shape_cast %39 : vector<8x8x128xbf16> to vector<64x128xbf16>
    %c5 = arith.constant 5 : index
    %c0_31 = arith.constant 0 : index
    %c0_32 = arith.constant 0 : index
    %41 = vector.load %arg2[%c5, %c0_31, %c0_32] : memref<9x128x128xbf16, #tpu.memory_space<vmem>>, vector<1x128x128xbf16>
    %42 = vector.shape_cast %41 : vector<1x128x128xbf16> to vector<128x128xbf16>
    %cst_33 = arith.constant dense<0.000000e+00> : vector<64x128xf32>
    %43 = tpu.matmul %40, %42, %cst_33 {dimension_numbers = #tpu.dot_dimension_numbers<[1], [0], [0], [1], [0, 0, 1, 1], [], []>} : vector<64x128xbf16>, vector<128x128xbf16>, vector<64x128xf32> -> vector<64x128xf32>
    %44 = arith.addf %38, %43 : vector<64x128xf32>
    %45 = vector.extract_strided_slice %2 {offsets = [1, 0, 0], sizes = [8, 8, 128], strides = [1, 1, 1]} : vector<9x9x128xbf16> to vector<8x8x128xbf16>
    %46 = vector.shape_cast %45 : vector<8x8x128xbf16> to vector<64x128xbf16>
    %c6 = arith.constant 6 : index
    %c0_34 = arith.constant 0 : index
    %c0_35 = arith.constant 0 : index
    %47 = vector.load %arg2[%c6, %c0_34, %c0_35] : memref<9x128x128xbf16, #tpu.memory_space<vmem>>, vector<1x128x128xbf16>
    %48 = vector.shape_cast %47 : vector<1x128x128xbf16> to vector<128x128xbf16>
    %cst_36 = arith.constant dense<0.000000e+00> : vector<64x128xf32>
    %49 = tpu.matmul %46, %48, %cst_36 {dimension_numbers = #tpu.dot_dimension_numbers<[1], [0], [0], [1], [0, 0, 1, 1], [], []>} : vector<64x128xbf16>, vector<128x128xbf16>, vector<64x128xf32> -> vector<64x128xf32>
    %50 = arith.addf %44, %49 : vector<64x128xf32>
    %51 = vector.extract_strided_slice %10 {offsets = [1, 0, 0], sizes = [8, 8, 128], strides = [1, 1, 1]} : vector<9x9x128xbf16> to vector<8x8x128xbf16>
    %52 = vector.shape_cast %51 : vector<8x8x128xbf16> to vector<64x128xbf16>
    %c7 = arith.constant 7 : index
    %c0_37 = arith.constant 0 : index
    %c0_38 = arith.constant 0 : index
    %53 = vector.load %arg2[%c7, %c0_37, %c0_38] : memref<9x128x128xbf16, #tpu.memory_space<vmem>>, vector<1x128x128xbf16>
    %54 = vector.shape_cast %53 : vector<1x128x128xbf16> to vector<128x128xbf16>
    %cst_39 = arith.constant dense<0.000000e+00> : vector<64x128xf32>
    %55 = tpu.matmul %52, %54, %cst_39 {dimension_numbers = #tpu.dot_dimension_numbers<[1], [0], [0], [1], [0, 0, 1, 1], [], []>} : vector<64x128xbf16>, vector<128x128xbf16>, vector<64x128xf32> -> vector<64x128xf32>
    %56 = arith.addf %50, %55 : vector<64x128xf32>
    %57 = vector.extract_strided_slice %2 {offsets = [1, 1, 0], sizes = [8, 8, 128], strides = [1, 1, 1]} : vector<9x9x128xbf16> to vector<8x8x128xbf16>
    %58 = vector.shape_cast %57 : vector<8x8x128xbf16> to vector<64x128xbf16>
    %c8 = arith.constant 8 : index
    %c0_40 = arith.constant 0 : index
    %c0_41 = arith.constant 0 : index
    %59 = vector.load %arg2[%c8, %c0_40, %c0_41] : memref<9x128x128xbf16, #tpu.memory_space<vmem>>, vector<1x128x128xbf16>
    %60 = vector.shape_cast %59 : vector<1x128x128xbf16> to vector<128x128xbf16>
    %cst_42 = arith.constant dense<0.000000e+00> : vector<64x128xf32>
    %61 = tpu.matmul %58, %60, %cst_42 {dimension_numbers = #tpu.dot_dimension_numbers<[1], [0], [0], [1], [0, 0, 1, 1], [], []>} : vector<64x128xbf16>, vector<128x128xbf16>, vector<64x128xf32> -> vector<64x128xf32>
    %62 = arith.addf %56, %61 : vector<64x128xf32>
    %63 = vector.shape_cast %62 : vector<64x128xf32> to vector<1x64x128xf32>
    %c0_43 = arith.constant 0 : index
    %c0_44 = arith.constant 0 : index
    %c0_45 = arith.constant 0 : index
    %64 = vector.load %arg3[%c0_43, %c0_44, %c0_45] : memref<1x64x128xf32, #tpu.memory_space<vmem>>, vector<1x64x128xf32>
    tpu.vector_store %arg3[%c0_43, %c0_44, %c0_45], %63 {strides = array<i32>} : memref<1x64x128xf32, #tpu.memory_space<vmem>>, vector<1x64x128xf32>,
    %cst_46 = arith.constant dense<0.000000e+00> : vector<128xf32>
    %65 = vector.multi_reduction <add>, %62, %cst_46 [0] : vector<64x128xf32> to vector<128xf32>
    %66 = vector.shape_cast %65 : vector<128xf32> to vector<1x128xf32>
    %67 = vector.shape_cast %66 : vector<1x128xf32> to vector<1x1x128xf32>
    %c0_47 = arith.constant 0 : index
    %c0_48 = arith.constant 0 : index
    %c0_49 = arith.constant 0 : index
    %68 = vector.load %arg4[%c0_47, %c0_48, %c0_49] : memref<1x1x128xf32, #tpu.memory_space<vmem>>, vector<1x1x128xf32>
    tpu.vector_store %arg4[%c0_47, %c0_48, %c0_49], %67 {strides = array<i32>} : memref<1x1x128xf32, #tpu.memory_space<vmem>>, vector<1x1x128xf32>,
    %69 = arith.mulf %62, %62 : vector<64x128xf32>
    %cst_50 = arith.constant dense<0.000000e+00> : vector<128xf32>
    %70 = vector.multi_reduction <add>, %69, %cst_50 [0] : vector<64x128xf32> to vector<128xf32>
    %71 = vector.shape_cast %70 : vector<128xf32> to vector<1x128xf32>
    %72 = vector.shape_cast %71 : vector<1x128xf32> to vector<1x1x128xf32>
    %c0_51 = arith.constant 0 : index
    %c0_52 = arith.constant 0 : index
    %c0_53 = arith.constant 0 : index
    %73 = vector.load %arg5[%c0_51, %c0_52, %c0_53] : memref<1x1x128xf32, #tpu.memory_space<vmem>>, vector<1x1x128xf32>
    tpu.vector_store %arg5[%c0_51, %c0_52, %c0_53], %72 {strides = array<i32>} : memref<1x1x128xf32, #tpu.memory_space<vmem>>, vector<1x1x128xf32>,
    return
  }
  func.func @transform_0(%arg0: i32) -> (i32, i32, i32, i32) {
    %c0_i32 = arith.constant 0 : i32
    %c0_i32_0 = arith.constant 0 : i32
    %c0_i32_1 = arith.constant 0 : i32
    %c0_i32_2 = arith.constant 0 : i32
    return %arg0, %c0_i32, %c0_i32_0, %c0_i32_1 : i32, i32, i32, i32
  }
  func.func @transform_1(%arg0: i32) -> (i32, i32, i32) {
    %c0_i32 = arith.constant 0 : i32
    %c0_i32_0 = arith.constant 0 : i32
    %c0_i32_1 = arith.constant 0 : i32
    %c0_i32_2 = arith.constant 0 : i32
    return %c0_i32, %c0_i32_0, %c0_i32_1 : i32, i32, i32
  }
  func.func @transform_2(%arg0: i32) -> (i32, i32, i32) {
    %c0_i32 = arith.constant 0 : i32
    %c0_i32_0 = arith.constant 0 : i32
    %c0_i32_1 = arith.constant 0 : i32
    return %arg0, %c0_i32, %c0_i32_0 : i32, i32, i32
  }
  func.func @transform_3(%arg0: i32) -> (i32, i32, i32) {
    %c0_i32 = arith.constant 0 : i32
    %c0_i32_0 = arith.constant 0 : i32
    %c0_i32_1 = arith.constant 0 : i32
    return %arg0, %c0_i32, %c0_i32_0 : i32, i32, i32
  }
  func.func @transform_4(%arg0: i32) -> (i32, i32, i32) {
    %c0_i32 = arith.constant 0 : i32
    %c0_i32_0 = arith.constant 0 : i32
    %c0_i32_1 = arith.constant 0 : i32
    return %arg0, %c0_i32, %c0_i32_0 : i32, i32, i32
  }
}

module attributes {stable_mosaic.version = 11 : i64} {
  func.func @_mm_stats_kernel(%arg0: i32, %arg1: memref<128x128xf32, #tpu.memory_space<vmem>>, %arg2: memref<128x128xbf16, #tpu.memory_space<vmem>>, %arg3: memref<1x128xf32, #tpu.memory_space<vmem>>, %arg4: memref<1x128xf32, #tpu.memory_space<vmem>>, %arg5: memref<128x128xf32, #tpu.memory_space<vmem>>, %arg6: memref<1x1x128xf32, #tpu.memory_space<vmem>>, %arg7: memref<1x1x128xf32, #tpu.memory_space<vmem>>) attributes {dimension_semantics = [#tpu.dimension_semantics<parallel>], iteration_bounds = array<i64: 1>, scalar_prefetch = 0 : i64, scratch_operands = 0 : i64, tpu.core_type = #tpu.core_type<tc>, window_params = [{transform_indices = @transform_0, window_bounds = array<i64: 128, 128>}, {pipeline_mode = #tpu.pipeline_mode<synchronous>, transform_indices = @transform_1, window_bounds = array<i64: 128, 128>}, {pipeline_mode = #tpu.pipeline_mode<synchronous>, transform_indices = @transform_2, window_bounds = array<i64: 1, 128>}, {pipeline_mode = #tpu.pipeline_mode<synchronous>, transform_indices = @transform_3, window_bounds = array<i64: 1, 128>}, {transform_indices = @transform_4, window_bounds = array<i64: 128, 128>}, {transform_indices = @transform_5, window_bounds = array<i64: 1, 1, 128>}, {transform_indices = @transform_6, window_bounds = array<i64: 1, 1, 128>}]} {
    %c0 = arith.constant 0 : index
    %c0_0 = arith.constant 0 : index
    %0 = vector.load %arg1[%c0, %c0_0] : memref<128x128xf32, #tpu.memory_space<vmem>>, vector<128x128xf32>
    %c0_1 = arith.constant 0 : index
    %c0_2 = arith.constant 0 : index
    %1 = vector.load %arg3[%c0_1, %c0_2] : memref<1x128xf32, #tpu.memory_space<vmem>>, vector<1x128xf32>
    %2 = vector.broadcast %1 : vector<1x128xf32> to vector<128x128xf32>
    %3 = arith.mulf %0, %2 : vector<128x128xf32>
    %c0_3 = arith.constant 0 : index
    %c0_4 = arith.constant 0 : index
    %4 = vector.load %arg4[%c0_3, %c0_4] : memref<1x128xf32, #tpu.memory_space<vmem>>, vector<1x128xf32>
    %5 = vector.broadcast %4 : vector<1x128xf32> to vector<128x128xf32>
    %6 = arith.addf %3, %5 : vector<128x128xf32>
    %cst = arith.constant 0.000000e+00 : f32
    %7 = vector.broadcast %cst : f32 to vector<128x128xf32>
    %8 = arith.maximumf %6, %7 : vector<128x128xf32>
    %9 = arith.truncf %8 : vector<128x128xf32> to vector<128x128xbf16>
    %c0_5 = arith.constant 0 : index
    %c0_6 = arith.constant 0 : index
    %10 = vector.load %arg2[%c0_5, %c0_6] : memref<128x128xbf16, #tpu.memory_space<vmem>>, vector<128x128xbf16>
    %cst_7 = arith.constant dense<0.000000e+00> : vector<128x128xf32>
    %11 = tpu.matmul %9, %10, %cst_7 {dimension_numbers = #tpu.dot_dimension_numbers<[1], [0], [0], [1], [0, 0, 1, 1], [], []>} : vector<128x128xbf16>, vector<128x128xbf16>, vector<128x128xf32> -> vector<128x128xf32>
    %c0_8 = arith.constant 0 : index
    %c0_9 = arith.constant 0 : index
    %12 = vector.load %arg5[%c0_8, %c0_9] : memref<128x128xf32, #tpu.memory_space<vmem>>, vector<128x128xf32>
    tpu.vector_store %arg5[%c0_8, %c0_9], %11 {strides = array<i32>} : memref<128x128xf32, #tpu.memory_space<vmem>>, vector<128x128xf32>,
    %cst_10 = arith.constant dense<0.000000e+00> : vector<128xf32>
    %13 = vector.multi_reduction <add>, %11, %cst_10 [0] : vector<128x128xf32> to vector<128xf32>
    %14 = vector.shape_cast %13 : vector<128xf32> to vector<1x128xf32>
    %15 = vector.shape_cast %14 : vector<1x128xf32> to vector<1x1x128xf32>
    %c0_11 = arith.constant 0 : index
    %c0_12 = arith.constant 0 : index
    %c0_13 = arith.constant 0 : index
    %16 = vector.load %arg6[%c0_11, %c0_12, %c0_13] : memref<1x1x128xf32, #tpu.memory_space<vmem>>, vector<1x1x128xf32>
    tpu.vector_store %arg6[%c0_11, %c0_12, %c0_13], %15 {strides = array<i32>} : memref<1x1x128xf32, #tpu.memory_space<vmem>>, vector<1x1x128xf32>,
    %17 = arith.mulf %11, %11 : vector<128x128xf32>
    %cst_14 = arith.constant dense<0.000000e+00> : vector<128xf32>
    %18 = vector.multi_reduction <add>, %17, %cst_14 [0] : vector<128x128xf32> to vector<128xf32>
    %19 = vector.shape_cast %18 : vector<128xf32> to vector<1x128xf32>
    %20 = vector.shape_cast %19 : vector<1x128xf32> to vector<1x1x128xf32>
    %c0_15 = arith.constant 0 : index
    %c0_16 = arith.constant 0 : index
    %c0_17 = arith.constant 0 : index
    %21 = vector.load %arg7[%c0_15, %c0_16, %c0_17] : memref<1x1x128xf32, #tpu.memory_space<vmem>>, vector<1x1x128xf32>
    tpu.vector_store %arg7[%c0_15, %c0_16, %c0_17], %20 {strides = array<i32>} : memref<1x1x128xf32, #tpu.memory_space<vmem>>, vector<1x1x128xf32>,
    return
  }
  func.func @transform_0(%arg0: i32) -> (i32, i32) {
    %c0_i32 = arith.constant 0 : i32
    %c0_i32_0 = arith.constant 0 : i32
    return %arg0, %c0_i32 : i32, i32
  }
  func.func @transform_1(%arg0: i32) -> (i32, i32) {
    %c0_i32 = arith.constant 0 : i32
    %c0_i32_0 = arith.constant 0 : i32
    %c0_i32_1 = arith.constant 0 : i32
    return %c0_i32, %c0_i32_0 : i32, i32
  }
  func.func @transform_2(%arg0: i32) -> (i32, i32) {
    %c0_i32 = arith.constant 0 : i32
    %c0_i32_0 = arith.constant 0 : i32
    %c0_i32_1 = arith.constant 0 : i32
    return %c0_i32, %c0_i32_0 : i32, i32
  }
  func.func @transform_3(%arg0: i32) -> (i32, i32) {
    %c0_i32 = arith.constant 0 : i32
    %c0_i32_0 = arith.constant 0 : i32
    %c0_i32_1 = arith.constant 0 : i32
    return %c0_i32, %c0_i32_0 : i32, i32
  }
  func.func @transform_4(%arg0: i32) -> (i32, i32) {
    %c0_i32 = arith.constant 0 : i32
    %c0_i32_0 = arith.constant 0 : i32
    return %arg0, %c0_i32 : i32, i32
  }
  func.func @transform_5(%arg0: i32) -> (i32, i32, i32) {
    %c0_i32 = arith.constant 0 : i32
    %c0_i32_0 = arith.constant 0 : i32
    %c0_i32_1 = arith.constant 0 : i32
    return %arg0, %c0_i32, %c0_i32_0 : i32, i32, i32
  }
  func.func @transform_6(%arg0: i32) -> (i32, i32, i32) {
    %c0_i32 = arith.constant 0 : i32
    %c0_i32_0 = arith.constant 0 : i32
    %c0_i32_1 = arith.constant 0 : i32
    return %arg0, %c0_i32, %c0_i32_0 : i32, i32, i32
  }
}

module attributes {stable_mosaic.version = 11 : i64} {
  func.func @_mm_stats_kernel(%arg0: i32, %arg1: memref<128x128xbf16, #tpu.memory_space<vmem>>, %arg2: memref<128x128xbf16, #tpu.memory_space<vmem>>, %arg3: memref<1x128xf32, #tpu.memory_space<vmem>>, %arg4: memref<1x128xf32, #tpu.memory_space<vmem>>, %arg5: memref<128x128xf32, #tpu.memory_space<vmem>>, %arg6: memref<1x1x128xf32, #tpu.memory_space<vmem>>, %arg7: memref<1x1x128xf32, #tpu.memory_space<vmem>>) attributes {dimension_semantics = [#tpu.dimension_semantics<parallel>], iteration_bounds = array<i64: 1>, scalar_prefetch = 0 : i64, scratch_operands = 0 : i64, tpu.core_type = #tpu.core_type<tc>, window_params = [{transform_indices = @transform_0, window_bounds = array<i64: 128, 128>}, {pipeline_mode = #tpu.pipeline_mode<synchronous>, transform_indices = @transform_1, window_bounds = array<i64: 128, 128>}, {pipeline_mode = #tpu.pipeline_mode<synchronous>, transform_indices = @transform_2, window_bounds = array<i64: 1, 128>}, {pipeline_mode = #tpu.pipeline_mode<synchronous>, transform_indices = @transform_3, window_bounds = array<i64: 1, 128>}, {transform_indices = @transform_4, window_bounds = array<i64: 128, 128>}, {transform_indices = @transform_5, window_bounds = array<i64: 1, 1, 128>}, {transform_indices = @transform_6, window_bounds = array<i64: 1, 1, 128>}]} {
    %c0 = arith.constant 0 : index
    %c0_0 = arith.constant 0 : index
    %0 = vector.load %arg1[%c0, %c0_0] : memref<128x128xbf16, #tpu.memory_space<vmem>>, vector<128x128xbf16>
    %c0_1 = arith.constant 0 : index
    %c0_2 = arith.constant 0 : index
    %1 = vector.load %arg2[%c0_1, %c0_2] : memref<128x128xbf16, #tpu.memory_space<vmem>>, vector<128x128xbf16>
    %cst = arith.constant dense<0.000000e+00> : vector<128x128xf32>
    %2 = tpu.matmul %0, %1, %cst {dimension_numbers = #tpu.dot_dimension_numbers<[1], [0], [0], [1], [0, 0, 1, 1], [], []>} : vector<128x128xbf16>, vector<128x128xbf16>, vector<128x128xf32> -> vector<128x128xf32>
    %c0_3 = arith.constant 0 : index
    %c0_4 = arith.constant 0 : index
    %3 = vector.load %arg5[%c0_3, %c0_4] : memref<128x128xf32, #tpu.memory_space<vmem>>, vector<128x128xf32>
    tpu.vector_store %arg5[%c0_3, %c0_4], %2 {strides = array<i32>} : memref<128x128xf32, #tpu.memory_space<vmem>>, vector<128x128xf32>,
    %cst_5 = arith.constant dense<0.000000e+00> : vector<128xf32>
    %4 = vector.multi_reduction <add>, %2, %cst_5 [0] : vector<128x128xf32> to vector<128xf32>
    %5 = vector.shape_cast %4 : vector<128xf32> to vector<1x128xf32>
    %6 = vector.shape_cast %5 : vector<1x128xf32> to vector<1x1x128xf32>
    %c0_6 = arith.constant 0 : index
    %c0_7 = arith.constant 0 : index
    %c0_8 = arith.constant 0 : index
    %7 = vector.load %arg6[%c0_6, %c0_7, %c0_8] : memref<1x1x128xf32, #tpu.memory_space<vmem>>, vector<1x1x128xf32>
    tpu.vector_store %arg6[%c0_6, %c0_7, %c0_8], %6 {strides = array<i32>} : memref<1x1x128xf32, #tpu.memory_space<vmem>>, vector<1x1x128xf32>,
    %8 = arith.mulf %2, %2 : vector<128x128xf32>
    %cst_9 = arith.constant dense<0.000000e+00> : vector<128xf32>
    %9 = vector.multi_reduction <add>, %8, %cst_9 [0] : vector<128x128xf32> to vector<128xf32>
    %10 = vector.shape_cast %9 : vector<128xf32> to vector<1x128xf32>
    %11 = vector.shape_cast %10 : vector<1x128xf32> to vector<1x1x128xf32>
    %c0_10 = arith.constant 0 : index
    %c0_11 = arith.constant 0 : index
    %c0_12 = arith.constant 0 : index
    %12 = vector.load %arg7[%c0_10, %c0_11, %c0_12] : memref<1x1x128xf32, #tpu.memory_space<vmem>>, vector<1x1x128xf32>
    tpu.vector_store %arg7[%c0_10, %c0_11, %c0_12], %11 {strides = array<i32>} : memref<1x1x128xf32, #tpu.memory_space<vmem>>, vector<1x1x128xf32>,
    return
  }
  func.func @transform_0(%arg0: i32) -> (i32, i32) {
    %c0_i32 = arith.constant 0 : i32
    %c0_i32_0 = arith.constant 0 : i32
    return %arg0, %c0_i32 : i32, i32
  }
  func.func @transform_1(%arg0: i32) -> (i32, i32) {
    %c0_i32 = arith.constant 0 : i32
    %c0_i32_0 = arith.constant 0 : i32
    %c0_i32_1 = arith.constant 0 : i32
    return %c0_i32, %c0_i32_0 : i32, i32
  }
  func.func @transform_2(%arg0: i32) -> (i32, i32) {
    %c0_i32 = arith.constant 0 : i32
    %c0_i32_0 = arith.constant 0 : i32
    %c0_i32_1 = arith.constant 0 : i32
    return %c0_i32, %c0_i32_0 : i32, i32
  }
  func.func @transform_3(%arg0: i32) -> (i32, i32) {
    %c0_i32 = arith.constant 0 : i32
    %c0_i32_0 = arith.constant 0 : i32
    %c0_i32_1 = arith.constant 0 : i32
    return %c0_i32, %c0_i32_0 : i32, i32
  }
  func.func @transform_4(%arg0: i32) -> (i32, i32) {
    %c0_i32 = arith.constant 0 : i32
    %c0_i32_0 = arith.constant 0 : i32
    return %arg0, %c0_i32 : i32, i32
  }
  func.func @transform_5(%arg0: i32) -> (i32, i32, i32) {
    %c0_i32 = arith.constant 0 : i32
    %c0_i32_0 = arith.constant 0 : i32
    %c0_i32_1 = arith.constant 0 : i32
    return %arg0, %c0_i32, %c0_i32_0 : i32, i32, i32
  }
  func.func @transform_6(%arg0: i32) -> (i32, i32, i32) {
    %c0_i32 = arith.constant 0 : i32
    %c0_i32_0 = arith.constant 0 : i32
    %c0_i32_1 = arith.constant 0 : i32
    return %arg0, %c0_i32, %c0_i32_0 : i32, i32, i32
  }
}

module attributes {stable_mosaic.version = 11 : i64} {
  func.func @_final_kernel(%arg0: i32, %arg1: memref<128x128xf32, #tpu.memory_space<vmem>>, %arg2: memref<128x128xf32, #tpu.memory_space<vmem>>, %arg3: memref<1x128xf32, #tpu.memory_space<vmem>>, %arg4: memref<1x128xf32, #tpu.memory_space<vmem>>, %arg5: memref<1x128xf32, #tpu.memory_space<vmem>>, %arg6: memref<1x128xf32, #tpu.memory_space<vmem>>, %arg7: memref<128x128xf32, #tpu.memory_space<vmem>>) attributes {dimension_semantics = [#tpu.dimension_semantics<parallel>], iteration_bounds = array<i64: 1>, scalar_prefetch = 0 : i64, scratch_operands = 0 : i64, tpu.core_type = #tpu.core_type<tc>, window_params = [{transform_indices = @transform_0, window_bounds = array<i64: 128, 128>}, {transform_indices = @transform_1, window_bounds = array<i64: 128, 128>}, {pipeline_mode = #tpu.pipeline_mode<synchronous>, transform_indices = @transform_2, window_bounds = array<i64: 1, 128>}, {pipeline_mode = #tpu.pipeline_mode<synchronous>, transform_indices = @transform_3, window_bounds = array<i64: 1, 128>}, {pipeline_mode = #tpu.pipeline_mode<synchronous>, transform_indices = @transform_4, window_bounds = array<i64: 1, 128>}, {pipeline_mode = #tpu.pipeline_mode<synchronous>, transform_indices = @transform_5, window_bounds = array<i64: 1, 128>}, {transform_indices = @transform_6, window_bounds = array<i64: 128, 128>}]} {
    %c0 = arith.constant 0 : index
    %c0_0 = arith.constant 0 : index
    %0 = vector.load %arg1[%c0, %c0_0] : memref<128x128xf32, #tpu.memory_space<vmem>>, vector<128x128xf32>
    %c0_1 = arith.constant 0 : index
    %c0_2 = arith.constant 0 : index
    %1 = vector.load %arg3[%c0_1, %c0_2] : memref<1x128xf32, #tpu.memory_space<vmem>>, vector<1x128xf32>
    %2 = vector.broadcast %1 : vector<1x128xf32> to vector<128x128xf32>
    %3 = arith.mulf %0, %2 : vector<128x128xf32>
    %c0_3 = arith.constant 0 : index
    %c0_4 = arith.constant 0 : index
    %4 = vector.load %arg4[%c0_3, %c0_4] : memref<1x128xf32, #tpu.memory_space<vmem>>, vector<1x128xf32>
    %5 = vector.broadcast %4 : vector<1x128xf32> to vector<128x128xf32>
    %6 = arith.addf %3, %5 : vector<128x128xf32>
    %c0_5 = arith.constant 0 : index
    %c0_6 = arith.constant 0 : index
    %7 = vector.load %arg2[%c0_5, %c0_6] : memref<128x128xf32, #tpu.memory_space<vmem>>, vector<128x128xf32>
    %c0_7 = arith.constant 0 : index
    %c0_8 = arith.constant 0 : index
    %8 = vector.load %arg5[%c0_7, %c0_8] : memref<1x128xf32, #tpu.memory_space<vmem>>, vector<1x128xf32>
    %9 = vector.broadcast %8 : vector<1x128xf32> to vector<128x128xf32>
    %10 = arith.mulf %7, %9 : vector<128x128xf32>
    %c0_9 = arith.constant 0 : index
    %c0_10 = arith.constant 0 : index
    %11 = vector.load %arg6[%c0_9, %c0_10] : memref<1x128xf32, #tpu.memory_space<vmem>>, vector<1x128xf32>
    %12 = vector.broadcast %11 : vector<1x128xf32> to vector<128x128xf32>
    %13 = arith.addf %10, %12 : vector<128x128xf32>
    %14 = arith.addf %6, %13 : vector<128x128xf32>
    %cst = arith.constant 0.000000e+00 : f32
    %15 = vector.broadcast %cst : f32 to vector<128x128xf32>
    %16 = arith.maximumf %14, %15 : vector<128x128xf32>
    %c0_11 = arith.constant 0 : index
    %c0_12 = arith.constant 0 : index
    %17 = vector.load %arg7[%c0_11, %c0_12] : memref<128x128xf32, #tpu.memory_space<vmem>>, vector<128x128xf32>
    tpu.vector_store %arg7[%c0_11, %c0_12], %16 {strides = array<i32>} : memref<128x128xf32, #tpu.memory_space<vmem>>, vector<128x128xf32>,
    return
  }
  func.func @transform_0(%arg0: i32) -> (i32, i32) {
    %c0_i32 = arith.constant 0 : i32
    %c0_i32_0 = arith.constant 0 : i32
    return %arg0, %c0_i32 : i32, i32
  }
  func.func @transform_1(%arg0: i32) -> (i32, i32) {
    %c0_i32 = arith.constant 0 : i32
    %c0_i32_0 = arith.constant 0 : i32
    return %arg0, %c0_i32 : i32, i32
  }
  func.func @transform_2(%arg0: i32) -> (i32, i32) {
    %c0_i32 = arith.constant 0 : i32
    %c0_i32_0 = arith.constant 0 : i32
    %c0_i32_1 = arith.constant 0 : i32
    return %c0_i32, %c0_i32_0 : i32, i32
  }
  func.func @transform_3(%arg0: i32) -> (i32, i32) {
    %c0_i32 = arith.constant 0 : i32
    %c0_i32_0 = arith.constant 0 : i32
    %c0_i32_1 = arith.constant 0 : i32
    return %c0_i32, %c0_i32_0 : i32, i32
  }
  func.func @transform_4(%arg0: i32) -> (i32, i32) {
    %c0_i32 = arith.constant 0 : i32
    %c0_i32_0 = arith.constant 0 : i32
    %c0_i32_1 = arith.constant 0 : i32
    return %c0_i32, %c0_i32_0 : i32, i32
  }
  func.func @transform_5(%arg0: i32) -> (i32, i32) {
    %c0_i32 = arith.constant 0 : i32
    %c0_i32_0 = arith.constant 0 : i32
    %c0_i32_1 = arith.constant 0 : i32
    return %c0_i32, %c0_i32_0 : i32, i32
  }
  func.func @transform_6(%arg0: i32) -> (i32, i32) {
    %c0_i32 = arith.constant 0 : i32
    %c0_i32_0 = arith.constant 0 : i32
    return %arg0, %c0_i32 : i32, i32
  }
}

</mosaic_0001>

<bundles_post_ra>
// kernel: bottleneck_forward.5
= control target key start
LH: loop header
LB: loop body
LE: loop exit
PB: predicated region body
PF: predicated region fallthrough
CT: control target
= control target key end

     0   :  { %s1671_s1 = inlined_call_operand.vmem [shape: bf16[128,128], index: 1, kind: input, shape index: {}]   ;;  %s1672_s2 = inlined_call_operand.vmem [shape: f32[1,128], index: 2, kind: input, shape index: {}, may-alias: {2,3}]   ;;  %s1673_s3 = inlined_call_operand.vmem [shape: f32[1,128], index: 3, kind: input, shape index: {}, may-alias: {2,3}]   ;;  %s1674_s0 = inlined_call_operand.vmem [shape: bf16[512,128], index: 0, kind: input, shape index: {}]   ;;  %s1675_s4 = inlined_call_operand.vmem [shape: f32[512,128], index: 4, kind: output, shape index: {0}]   ;;  %s1676_s5 = inlined_call_operand.vmem [shape: f32[1,1,128], index: 5, kind: output, shape index: {1}]   ;;  %s1677_s6 = inlined_call_operand.vmem [shape: f32[1,1,128], index: 6, kind: output, shape index: {2}]  }
   0x1   :  { %v1086_v0 = vld [vmem:[%s1671_s1] sm:$0xff]   ;;  %v1087_v1 = vld [vmem:[%s1671_s1 + $0x8] sm:$0xff]   ;;  %v1088_v2 = vld [vmem:[%s1671_s1 + $0x10] sm:$0xff]  }
   0x2   :  { %990 = vmatprep.subr.bf16.mxu0 %v1086_v0  ;;  %1070 = vmatprep.subr.bf16.mxu1 %v1086_v0  ;;  %v1089_v3 = vld [vmem:[%s1671_s1 + $0x18] sm:$0xff]   ;;  %v1094_v4 = vld [vmem:[%s1674_s0] sm:$0xff]   ;;  %v1091_v6 = vld [vmem:[%s1671_s1 + $0x28] sm:$0xff]  }
   0x3   :  { %991 = vmatpush3.bf16.msra.mxu0 %v1086_v0  ;;  %1078 = vmatpush3.bf16.msra.mxu1 %v1086_v0  ;;  %v1090_v5 = vld [vmem:[%s1671_s1 + $0x20] sm:$0xff]   ;;  %v1092_v7 = vld [vmem:[%s1671_s1 + $0x30] sm:$0xff]   ;;  %v1093_v8 = vld [vmem:[%s1671_s1 + $0x38] sm:$0xff]  }
   0x4   :  { %992 = vmatprep.subr.bf16.mxu0 %v1087_v1  ;;  %1071 = vmatprep.subr.bf16.mxu1 %v1087_v1  ;;  %v1110_v9 = vld [vmem:[%s1674_s0 + $0x80] sm:$0xff]   ;;  %v1095_v10 = vld [vmem:[%s1674_s0 + $0x8] sm:$0xff]   ;;  %v1096_v11 = vld [vmem:[%s1674_s0 + $0x10] sm:$0xff]  }
   0x5   :  { %1006 = vmatprep.mubr.bf16.mxu0 %v1094_v4  ;;  %1038 = vmatprep.mubr.bf16.mxu1 %v1110_v9  ;;  %v1111_v12 = vld [vmem:[%s1674_s0 + $0x88] sm:$0xff]   ;;  %v1112_v13 = vld [vmem:[%s1674_s0 + $0x90] sm:$0xff]   ;;  %v1097_v14 = vld [vmem:[%s1674_s0 + $0x18] sm:$0xff]  }
   0x6   :  { %v1098_v15 = vld [vmem:[%s1674_s0 + $0x20] sm:$0xff]   ;;  %v1113_v16 = vld [vmem:[%s1674_s0 + $0x98] sm:$0xff]   ;;  %v1099_v18 = vld [vmem:[%s1674_s0 + $0x28] sm:$0xff]  }
   0x7   :  { %993 = vmatpush3.bf16.msra.mxu0 %v1087_v1  ;;  %1079 = vmatpush3.bf16.msra.mxu1 %v1087_v1  ;;  %v1114_v17 = vld [vmem:[%s1674_s0 + $0xa0] sm:$0xff]   ;;  %v1115_v19 = vld [vmem:[%s1674_s0 + $0xa8] sm:$0xff]   ;;  %v1100_v20 = vld [vmem:[%s1674_s0 + $0x30] sm:$0xff]  }
   0x8   :  { %994 = vmatprep.subr.bf16.mxu0 %v1088_v2  ;;  %1072 = vmatprep.subr.bf16.mxu1 %v1088_v2  ;;  %v1116_v21 = vld [vmem:[%s1674_s0 + $0xb0] sm:$0xff]   ;;  %v1101_v22 = vld [vmem:[%s1674_s0 + $0x38] sm:$0xff]   ;;  %v1102_v24 = vld [vmem:[%s1674_s0 + $0x40] sm:$0xff]  }
   0x9   :  { %v1117_v23 = vld [vmem:[%s1674_s0 + $0xb8] sm:$0xff]   ;;  %v1118_v25 = vld [vmem:[%s1674_s0 + $0xc0] sm:$0xff]   ;;  %v1103_v26 = vld [vmem:[%s1674_s0 + $0x48] sm:$0xff]  }
   0xa   :  { %v1119_v27 = vld [vmem:[%s1674_s0 + $0xc8] sm:$0xff]   ;;  %v1104_v28 = vld [vmem:[%s1674_s0 + $0x50] sm:$0xff]   ;;  %v1105_v30 = vld [vmem:[%s1674_s0 + $0x58] sm:$0xff]  }
   0xb   :  { %995 = vmatpush3.bf16.msra.mxu0 %v1088_v2  ;;  %1080 = vmatpush3.bf16.msra.mxu1 %v1088_v2  ;;  %v1120_v29 = vld [vmem:[%s1674_s0 + $0xd0] sm:$0xff]   ;;  %v1121_v31 = vld [vmem:[%s1674_s0 + $0xd8] sm:$0xff]   ;;  %v1106_v32 = vld [vmem:[%s1674_s0 + $0x60] sm:$0xff]  }
   0xc   :  { %996 = vmatprep.subr.bf16.mxu0 %v1089_v3  ;;  %1073 = vmatprep.subr.bf16.mxu1 %v1089_v3  ;;  %v1122_v33 = vld [vmem:[%s1674_s0 + $0xe0] sm:$0xff]   ;;  %v1107_v34 = vld [vmem:[%s1674_s0 + $0x68] sm:$0xff]   ;;  %v1108_v36 = vld [vmem:[%s1674_s0 + $0x70] sm:$0xff]  }
   0xd   :  { %v1123_v35 = vld [vmem:[%s1674_s0 + $0xe8] sm:$0xff]   ;;  %v1124_v37 = vld [vmem:[%s1674_s0 + $0xf0] sm:$0xff]   ;;  %v1109_v38 = vld [vmem:[%s1674_s0 + $0x78] sm:$0xff]  }
   0xe   :  { %v1125_v39 = vld [vmem:[%s1674_s0 + $0xf8] sm:$0xff]  }
   0xf   :  { %997 = vmatpush3.bf16.msra.mxu0 %v1089_v3  ;;  %1081 = vmatpush3.bf16.msra.mxu1 %v1089_v3 }
  0x10   :  { %998 = vmatprep.subr.bf16.mxu0 %v1090_v5  ;;  %1074 = vmatprep.subr.bf16.mxu1 %v1090_v5 }
  0x13   :  { %999 = vmatpush3.bf16.msra.mxu0 %v1090_v5  ;;  %1082 = vmatpush3.bf16.msra.mxu1 %v1090_v5 }
  0x14   :  { %1000 = vmatprep.subr.bf16.mxu0 %v1091_v6  ;;  %1075 = vmatprep.subr.bf16.mxu1 %v1091_v6 }
  0x17   :  { %1001 = vmatpush3.bf16.msra.mxu0 %v1091_v6  ;;  %1083 = vmatpush3.bf16.msra.mxu1 %v1091_v6 }
  0x18   :  { %1002 = vmatprep.subr.bf16.mxu0 %v1092_v7  ;;  %1076 = vmatprep.subr.bf16.mxu1 %v1092_v7 }
  0x1b   :  { %1003 = vmatpush3.bf16.msra.mxu0 %v1092_v7  ;;  %1084 = vmatpush3.bf16.msra.mxu1 %v1092_v7 }
  0x1c   :  { %1004 = vmatprep.subr.bf16.mxu0 %v1093_v8  ;;  %1077 = vmatprep.subr.bf16.mxu1 %v1093_v8 }
  0x1f   :  { %1005 = vmatpush3.bf16.msra.mxu0 %v1093_v8  ;;  %1085 = vmatpush3.bf16.msra.mxu1 %v1093_v8 }
  0x22   :  { %1007 = vmatmul.mubr.bf16.vlgmr.msra.gmra.mrb[0].mxu0 %v1095_v10  ;;  %1039 = vmatmul.mubr.bf16.vlgmr.msra.gmra.mrb[0].mxu1 %v1111_v12 }
  0x23   :  { %1010 = vmatprep.mubr.bf16.mxu0 %v1096_v11  ;;  %1042 = vmatprep.mubr.bf16.mxu1 %v1112_v13 }
  0x2a   :  { %1011 = vmatmul.mubr.bf16.gmra.mrb[4].mxu0 %v1097_v14  ;;  %1043 = vmatmul.mubr.bf16.gmra.mrb[4].mxu1 %v1113_v16 }
  0x2b   :  { %1014 = vmatprep.mubr.bf16.mxu0 %v1098_v15  ;;  %1046 = vmatprep.mubr.bf16.mxu1 %v1114_v17 }
  0x32   :  { %1015 = vmatmul.mubr.bf16.gmra.mrb[8].mxu0 %v1099_v18  ;;  %1047 = vmatmul.mubr.bf16.gmra.mrb[8].mxu1 %v1115_v19 }
  0x33   :  { %1018 = vmatprep.mubr.bf16.mxu0 %v1100_v20  ;;  %1050 = vmatprep.mubr.bf16.mxu1 %v1116_v21 }
  0x3a   :  { %1019 = vmatmul.mubr.bf16.gmra.mrb[12].mxu0 %v1101_v22  ;;  %1051 = vmatmul.mubr.bf16.gmra.mrb[12].mxu1 %v1117_v23 }
  0x3b   :  { %1022 = vmatprep.mubr.bf16.mxu0 %v1102_v24  ;;  %1054 = vmatprep.mubr.bf16.mxu1 %v1118_v25 }
  0x42   :  { %1023 = vmatmul.mubr.bf16.gmra.mrb[16].mxu0 %v1103_v26  ;;  %1055 = vmatmul.mubr.bf16.gmra.mrb[16].mxu1 %v1119_v27 }
  0x43   :  { %1026 = vmatprep.mubr.bf16.mxu0 %v1104_v28  ;;  %1058 = vmatprep.mubr.bf16.mxu1 %v1120_v29 }
  0x4a   :  { %1027 = vmatmul.mubr.bf16.gmra.mrb[20].mxu0 %v1105_v30  ;;  %1059 = vmatmul.mubr.bf16.gmra.mrb[20].mxu1 %v1121_v31 }
  0x4b   :  { %1030 = vmatprep.mubr.bf16.mxu0 %v1106_v32  ;;  %1062 = vmatprep.mubr.bf16.mxu1 %v1122_v33 }
  0x52   :  { %1031 = vmatmul.mubr.bf16.gmra.mrb[24].mxu0 %v1107_v34  ;;  %1063 = vmatmul.mubr.bf16.gmra.mrb[24].mxu1 %v1123_v35 }
  0x53   :  { %1034 = vmatprep.mubr.bf16.mxu0 %v1108_v36  ;;  %1066 = vmatprep.mubr.bf16.mxu1 %v1124_v37 }
  0x5a   :  { %1035 = vmatmul.mubr.bf16.gmra.mrb[28].mxu0 %v1109_v38  ;;  %1067 = vmatmul.mubr.bf16.gmra.mrb[28].mxu1 %v1125_v39 }
  0xf5   :  { %v1008_v40 = vpop.f32.mrb[0].mxu0  ;;  %v1281_v41 = vpop.f32.mrb[0].mxu1 }
  0xf6   :  { %632 = vst [vmem:[%s1675_s4 + $0x10] sm:$0xff] %v1008_v40  ;;  %v375_v42 = vpop.f32.mrb[1].mxu0  ;;  %664 = vst [vmem:[%s1675_s4 + $0x110] sm:$0xff] %v1281_v41  ;;  %v1290_v43 = vpop.f32.mrb[1].mxu1  ;;  %v766_v51 = vmul.f32 %v1008_v40, %v1008_v40 }
  0xf7   :  { %630 = vst [vmem:[%s1675_s4] sm:$0xff] %v375_v42  ;;  %v1009_v44 = vpop.f32.mrb[2].mxu0  ;;  %662 = vst [vmem:[%s1675_s4 + $0x100] sm:$0xff] %v1290_v43  ;;  %v1299_v45 = vpop.f32.mrb[2].mxu1  ;;  %v764_v48 = vmul.f32 %v375_v42, %v375_v42 }
  0xf8   :  { %633 = vst [vmem:[%s1675_s4 + $0x18] sm:$0xff] %v1009_v44  ;;  %v378_v46 = vpop.f32.mrb[3].mxu0  ;;  %665 = vst [vmem:[%s1675_s4 + $0x118] sm:$0xff] %v1299_v45  ;;  %v1308_v47 = vpop.f32.mrb[3].mxu1  ;;  %v767_v54 = vmul.f32 %v1009_v44, %v1009_v44 }
  0xf9   :  { %631 = vst [vmem:[%s1675_s4 + $0x8] sm:$0xff] %v378_v46  ;;  %v694_v49 = vadd.f32 %v378_v46, %v375_v42  ;;  %v765_v50 = vmul.f32 %v378_v46, %v378_v46  ;;  %663 = vst [vmem:[%s1675_s4 + $0x108] sm:$0xff] %v1308_v47 }
  0xfb   :  { %v695_v52 = vadd.f32 %v1008_v40, %v694_v49  ;;  %v828_v53 = vadd.f32 %v765_v50, %v764_v48 }
  0xfd   :  { %v829_v55 = vadd.f32 %v828_v53, %v766_v51  ;;  %v1012_v56 = vpop.f32.mrb[4].mxu0  ;;  %v696_v57 = vadd.f32 %v1009_v44, %v695_v52  ;;  %v1317_v58 = vpop.f32.mrb[4].mxu1 }
  0xfe   :  { %636 = vst [vmem:[%s1675_s4 + $0x30] sm:$0xff] %v1012_v56  ;;  %v391_v59 = vpop.f32.mrb[5].mxu0  ;;  %668 = vst [vmem:[%s1675_s4 + $0x130] sm:$0xff] %v1317_v58  ;;  %v1326_v60 = vpop.f32.mrb[5].mxu1  ;;  %v770_v7 = vmul.f32 %v1012_v56, %v1012_v56 }
  0xff   :  { %634 = vst [vmem:[%s1675_s4 + $0x20] sm:$0xff] %v391_v59  ;;  %v697_v61 = vadd.f32 %v696_v57, %v391_v59  ;;  %v768_v62 = vmul.f32 %v391_v59, %v391_v59  ;;  %v830_v63 = vadd.f32 %v829_v55, %v767_v54  ;;  %v1013_v0 = vpop.f32.mrb[6].mxu0  ;;  %666 = vst [vmem:[%s1675_s4 + $0x120] sm:$0xff] %v1326_v60  ;;  %v1335_v1 = vpop.f32.mrb[6].mxu1 }
 0x100   :  { %637 = vst [vmem:[%s1675_s4 + $0x38] sm:$0xff] %v1013_v0  ;;  %v394_v2 = vpop.f32.mrb[7].mxu0  ;;  %669 = vst [vmem:[%s1675_s4 + $0x138] sm:$0xff] %v1335_v1  ;;  %v1344_v3 = vpop.f32.mrb[7].mxu1  ;;  %v771_v10 = vmul.f32 %v1013_v0, %v1013_v0 }
 0x101   :  { %v831_v4 = vadd.f32 %v830_v63, %v768_v62  ;;  %635 = vst [vmem:[%s1675_s4 + $0x28] sm:$0xff] %v394_v2  ;;  %v698_v5 = vadd.f32 %v697_v61, %v394_v2  ;;  %v769_v6 = vmul.f32 %v394_v2, %v394_v2  ;;  %667 = vst [vmem:[%s1675_s4 + $0x128] sm:$0xff] %v1344_v3 }
 0x103   :  { %v699_v8 = vadd.f32 %v1012_v56, %v698_v5  ;;  %v832_v9 = vadd.f32 %v831_v4, %v769_v6 }
 0x105   :  { %v833_v11 = vadd.f32 %v832_v9, %v770_v7  ;;  %v1016_v12 = vpop.f32.mrb[8].mxu0  ;;  %v700_v13 = vadd.f32 %v1013_v0, %v699_v8  ;;  %v1353_v14 = vpop.f32.mrb[8].mxu1 }
 0x106   :  { %640 = vst [vmem:[%s1675_s4 + $0x50] sm:$0xff] %v1016_v12  ;;  %v407_v15 = vpop.f32.mrb[9].mxu0  ;;  %672 = vst [vmem:[%s1675_s4 + $0x150] sm:$0xff] %v1353_v14  ;;  %v1362_v16 = vpop.f32.mrb[9].mxu1  ;;  %v774_v27 = vmul.f32 %v1016_v12, %v1016_v12 }
 0x107   :  { %638 = vst [vmem:[%s1675_s4 + $0x40] sm:$0xff] %v407_v15  ;;  %v701_v17 = vadd.f32 %v700_v13, %v407_v15  ;;  %v772_v18 = vmul.f32 %v407_v15, %v407_v15  ;;  %v834_v19 = vadd.f32 %v833_v11, %v771_v10  ;;  %v1017_v20 = vpop.f32.mrb[10].mxu0  ;;  %670 = vst [vmem:[%s1675_s4 + $0x140] sm:$0xff] %v1362_v16  ;;  %v1371_v21 = vpop.f32.mrb[10].mxu1 }
 0x108   :  { %641 = vst [vmem:[%s1675_s4 + $0x58] sm:$0xff] %v1017_v20  ;;  %v410_v22 = vpop.f32.mrb[11].mxu0  ;;  %673 = vst [vmem:[%s1675_s4 + $0x158] sm:$0xff] %v1371_v21  ;;  %v1380_v23 = vpop.f32.mrb[11].mxu1  ;;  %v775_v30 = vmul.f32 %v1017_v20, %v1017_v20 }
 0x109   :  { %v835_v24 = vadd.f32 %v834_v19, %v772_v18  ;;  %639 = vst [vmem:[%s1675_s4 + $0x48] sm:$0xff] %v410_v22  ;;  %v702_v25 = vadd.f32 %v701_v17, %v410_v22  ;;  %v773_v26 = vmul.f32 %v410_v22, %v410_v22  ;;  %671 = vst [vmem:[%s1675_s4 + $0x148] sm:$0xff] %v1380_v23 }
 0x10b   :  { %v703_v28 = vadd.f32 %v1016_v12, %v702_v25  ;;  %v836_v29 = vadd.f32 %v835_v24, %v773_v26 }
 0x10d   :  { %v837_v31 = vadd.f32 %v836_v29, %v774_v27  ;;  %v1020_v32 = vpop.f32.mrb[12].mxu0  ;;  %v704_v33 = vadd.f32 %v1017_v20, %v703_v28  ;;  %v1389_v34 = vpop.f32.mrb[12].mxu1 }
 0x10e   :  { %644 = vst [vmem:[%s1675_s4 + $0x70] sm:$0xff] %v1020_v32  ;;  %v423_v35 = vpop.f32.mrb[13].mxu0  ;;  %676 = vst [vmem:[%s1675_s4 + $0x170] sm:$0xff] %v1389_v34  ;;  %v1398_v36 = vpop.f32.mrb[13].mxu1  ;;  %v778_v51 = vmul.f32 %v1020_v32, %v1020_v32 }
 0x10f   :  { %642 = vst [vmem:[%s1675_s4 + $0x60] sm:$0xff] %v423_v35  ;;  %v705_v37 = vadd.f32 %v704_v33, %v423_v35  ;;  %v776_v38 = vmul.f32 %v423_v35, %v423_v35  ;;  %v838_v39 = vadd.f32 %v837_v31, %v775_v30  ;;  %v1021_v40 = vpop.f32.mrb[14].mxu0  ;;  %674 = vst [vmem:[%s1675_s4 + $0x160] sm:$0xff] %v1398_v36  ;;  %v1407_v42 = vpop.f32.mrb[14].mxu1 }
 0x110   :  { %645 = vst [vmem:[%s1675_s4 + $0x78] sm:$0xff] %v1021_v40  ;;  %v426_v44 = vpop.f32.mrb[15].mxu0  ;;  %677 = vst [vmem:[%s1675_s4 + $0x178] sm:$0xff] %v1407_v42  ;;  %v1416_v46 = vpop.f32.mrb[15].mxu1  ;;  %v779_v54 = vmul.f32 %v1021_v40, %v1021_v40 }
 0x111   :  { %v839_v48 = vadd.f32 %v838_v39, %v776_v38  ;;  %643 = vst [vmem:[%s1675_s4 + $0x68] sm:$0xff] %v426_v44  ;;  %v706_v49 = vadd.f32 %v705_v37, %v426_v44  ;;  %v777_v50 = vmul.f32 %v426_v44, %v426_v44  ;;  %675 = vst [vmem:[%s1675_s4 + $0x168] sm:$0xff] %v1416_v46 }
 0x113   :  { %v707_v52 = vadd.f32 %v1020_v32, %v706_v49  ;;  %v840_v53 = vadd.f32 %v839_v48, %v777_v50 }
 0x115   :  { %v841_v55 = vadd.f32 %v840_v53, %v778_v51  ;;  %v1024_v56 = vpop.f32.mrb[16].mxu0  ;;  %v708_v57 = vadd.f32 %v1021_v40, %v707_v52  ;;  %v1425_v59 = vpop.f32.mrb[16].mxu1 }
 0x116   :  { %648 = vst [vmem:[%s1675_s4 + $0x90] sm:$0xff] %v1024_v56  ;;  %v439_v61 = vpop.f32.mrb[17].mxu0  ;;  %680 = vst [vmem:[%s1675_s4 + $0x190] sm:$0xff] %v1425_v59  ;;  %v1434_v62 = vpop.f32.mrb[17].mxu1  ;;  %v782_v11 = vmul.f32 %v1024_v56, %v1024_v56 }
 0x117   :  { %646 = vst [vmem:[%s1675_s4 + $0x80] sm:$0xff] %v439_v61  ;;  %v709_v63 = vadd.f32 %v708_v57, %v439_v61  ;;  %v780_v0 = vmul.f32 %v439_v61, %v439_v61  ;;  %v842_v2 = vadd.f32 %v841_v55, %v779_v54  ;;  %v1025_v4 = vpop.f32.mrb[18].mxu0  ;;  %678 = vst [vmem:[%s1675_s4 + $0x180] sm:$0xff] %v1434_v62  ;;  %v1443_v5 = vpop.f32.mrb[18].mxu1 }
 0x118   :  { %649 = vst [vmem:[%s1675_s4 + $0x98] sm:$0xff] %v1025_v4  ;;  %v442_v6 = vpop.f32.mrb[19].mxu0  ;;  %681 = vst [vmem:[%s1675_s4 + $0x198] sm:$0xff] %v1443_v5  ;;  %v1452_v7 = vpop.f32.mrb[19].mxu1  ;;  %v783_v15 = vmul.f32 %v1025_v4, %v1025_v4 }
 0x119   :  { %v843_v8 = vadd.f32 %v842_v2, %v780_v0  ;;  %647 = vst [vmem:[%s1675_s4 + $0x88] sm:$0xff] %v442_v6  ;;  %v710_v9 = vadd.f32 %v709_v63, %v442_v6  ;;  %v781_v10 = vmul.f32 %v442_v6, %v442_v6  ;;  %679 = vst [vmem:[%s1675_s4 + $0x188] sm:$0xff] %v1452_v7 }
 0x11b   :  { %v711_v12 = vadd.f32 %v1024_v56, %v710_v9  ;;  %v844_v13 = vadd.f32 %v843_v8, %v781_v10 }
 0x11d   :  { %v845_v17 = vadd.f32 %v844_v13, %v782_v11  ;;  %v1028_v18 = vpop.f32.mrb[20].mxu0  ;;  %v712_v19 = vadd.f32 %v1025_v4, %v711_v12  ;;  %v1461_v20 = vpop.f32.mrb[20].mxu1 }
 0x11e   :  { %652 = vst [vmem:[%s1675_s4 + $0xb0] sm:$0xff] %v1028_v18  ;;  %v455_v22 = vpop.f32.mrb[21].mxu0  ;;  %684 = vst [vmem:[%s1675_s4 + $0x1b0] sm:$0xff] %v1461_v20  ;;  %v1470_v24 = vpop.f32.mrb[21].mxu1  ;;  %v786_v37 = vmul.f32 %v1028_v18, %v1028_v18 }
 0x11f   :  { %650 = vst [vmem:[%s1675_s4 + $0xa0] sm:$0xff] %v455_v22  ;;  %v713_v25 = vadd.f32 %v712_v19, %v455_v22  ;;  %v784_v26 = vmul.f32 %v455_v22, %v455_v22  ;;  %v846_v27 = vadd.f32 %v845_v17, %v783_v15  ;;  %v1029_v28 = vpop.f32.mrb[22].mxu0  ;;  %682 = vst [vmem:[%s1675_s4 + $0x1a0] sm:$0xff] %v1470_v24  ;;  %v1479_v29 = vpop.f32.mrb[22].mxu1 }
 0x120   :  { %653 = vst [vmem:[%s1675_s4 + $0xb8] sm:$0xff] %v1029_v28  ;;  %v458_v30 = vpop.f32.mrb[23].mxu0  ;;  %685 = vst [vmem:[%s1675_s4 + $0x1b8] sm:$0xff] %v1479_v29  ;;  %v1488_v31 = vpop.f32.mrb[23].mxu1  ;;  %v787_v40 = vmul.f32 %v1029_v28, %v1029_v28 }
 0x121   :  { %v847_v32 = vadd.f32 %v846_v27, %v784_v26  ;;  %651 = vst [vmem:[%s1675_s4 + $0xa8] sm:$0xff] %v458_v30  ;;  %v714_v33 = vadd.f32 %v713_v25, %v458_v30  ;;  %v785_v35 = vmul.f32 %v458_v30, %v458_v30  ;;  %683 = vst [vmem:[%s1675_s4 + $0x1a8] sm:$0xff] %v1488_v31 }
 0x123   :  { %v715_v38 = vadd.f32 %v1028_v18, %v714_v33  ;;  %v848_v39 = vadd.f32 %v847_v32, %v785_v35 }
 0x125   :  { %v849_v44 = vadd.f32 %v848_v39, %v786_v37  ;;  %v1032_v48 = vpop.f32.mrb[24].mxu0  ;;  %v716_v49 = vadd.f32 %v1029_v28, %v715_v38  ;;  %v1497_v50 = vpop.f32.mrb[24].mxu1 }
 0x126   :  { %656 = vst [vmem:[%s1675_s4 + $0xd0] sm:$0xff] %v1032_v48  ;;  %v471_v51 = vpop.f32.mrb[25].mxu0  ;;  %688 = vst [vmem:[%s1675_s4 + $0x1d0] sm:$0xff] %v1497_v50  ;;  %v1506_v52 = vpop.f32.mrb[25].mxu1  ;;  %v790_v6 = vmul.f32 %v1032_v48, %v1032_v48 }
 0x127   :  { %654 = vst [vmem:[%s1675_s4 + $0xc0] sm:$0xff] %v471_v51  ;;  %v717_v53 = vadd.f32 %v716_v49, %v471_v51  ;;  %v788_v54 = vmul.f32 %v471_v51, %v471_v51  ;;  %v850_v55 = vadd.f32 %v849_v44, %v787_v40  ;;  %v1033_v56 = vpop.f32.mrb[26].mxu0  ;;  %686 = vst [vmem:[%s1675_s4 + $0x1c0] sm:$0xff] %v1506_v52  ;;  %v1515_v57 = vpop.f32.mrb[26].mxu1 }
 0x128   :  { %657 = vst [vmem:[%s1675_s4 + $0xd8] sm:$0xff] %v1033_v56  ;;  %v474_v61 = vpop.f32.mrb[27].mxu0  ;;  %689 = vst [vmem:[%s1675_s4 + $0x1d8] sm:$0xff] %v1515_v57  ;;  %v1524_v63 = vpop.f32.mrb[27].mxu1  ;;  %v791_v10 = vmul.f32 %v1033_v56, %v1033_v56  ;;  %v796_v49 = vmul.f32 %v1290_v43, %v1290_v43 }
 0x129   :  { %v851_v0 = vadd.f32 %v850_v55, %v788_v54  ;;  %655 = vst [vmem:[%s1675_s4 + $0xc8] sm:$0xff] %v474_v61  ;;  %v718_v2 = vadd.f32 %v717_v53, %v474_v61  ;;  %v789_v4 = vmul.f32 %v474_v61, %v474_v61  ;;  %687 = vst [vmem:[%s1675_s4 + $0x1c8] sm:$0xff] %v1524_v63 }
 0x12a   :  { %v798_v61 = vmul.f32 %v1281_v41, %v1281_v41 }
 0x12b   :  { %v719_v8 = vadd.f32 %v1032_v48, %v718_v2  ;;  %v852_v9 = vadd.f32 %v851_v0, %v789_v4  ;;  %v799_v4 = vmul.f32 %v1299_v45, %v1299_v45 }
 0x12d   :  { %v853_v11 = vadd.f32 %v852_v9, %v790_v6  ;;  %v1036_v12 = vpop.f32.mrb[28].mxu0  ;;  %v720_v13 = vadd.f32 %v1033_v56, %v719_v8  ;;  %v1533_v15 = vpop.f32.mrb[28].mxu1  ;;  %v797_v56 = vmul.f32 %v1308_v47, %v1308_v47 }
 0x12e   :  { %660 = vst [vmem:[%s1675_s4 + $0xf0] sm:$0xff] %v1036_v12  ;;  %v487_v17 = vpop.f32.mrb[29].mxu0  ;;  %692 = vst [vmem:[%s1675_s4 + $0x1f0] sm:$0xff] %v1533_v15  ;;  %v1542_v18 = vpop.f32.mrb[29].mxu1  ;;  %v794_v37 = vmul.f32 %v1036_v12, %v1036_v12 }
 0x12f   :  { %658 = vst [vmem:[%s1675_s4 + $0xe0] sm:$0xff] %v487_v17  ;;  %v721_v19 = vadd.f32 %v720_v13, %v487_v17  ;;  %v792_v22 = vmul.f32 %v487_v17, %v487_v17  ;;  %v854_v25 = vadd.f32 %v853_v11, %v791_v10  ;;  %v1037_v26 = vpop.f32.mrb[30].mxu0  ;;  %690 = vst [vmem:[%s1675_s4 + $0x1e0] sm:$0xff] %v1542_v18  ;;  %v1551_v27 = vpop.f32.mrb[30].mxu1 }
 0x130   :  { %661 = vst [vmem:[%s1675_s4 + $0xf8] sm:$0xff] %v1037_v26  ;;  %v490_v28 = vpop.f32.mrb[31].mxu0  ;;  %693 = vst [vmem:[%s1675_s4 + $0x1f8] sm:$0xff] %v1551_v27  ;;  %v1560_v30 = vpop.f32.mrb[31].mxu1  ;;  %v795_v40 = vmul.f32 %v1037_v26, %v1037_v26 }
 0x131   :  { %v855_v32 = vadd.f32 %v854_v25, %v792_v22  ;;  %659 = vst [vmem:[%s1675_s4 + $0xe8] sm:$0xff] %v490_v28  ;;  %v722_v33 = vadd.f32 %v721_v19, %v490_v28  ;;  %v793_v35 = vmul.f32 %v490_v28, %v490_v28  ;;  %691 = vst [vmem:[%s1675_s4 + $0x1e8] sm:$0xff] %v1560_v30 }
 0x133   :  { %v723_v38 = vadd.f32 %v1036_v12, %v722_v33  ;;  %v856_v39 = vadd.f32 %v855_v32, %v793_v35  ;;  %v801_v12 = vmul.f32 %v1344_v3, %v1344_v3  ;;  %v805_v32 = vmul.f32 %v1380_v23, %v1380_v23 }
 0x135   :  { %v857_v44 = vadd.f32 %v856_v39, %v794_v37  ;;  %v724_v48 = vadd.f32 %v1037_v26, %v723_v38 }
 0x137   :  { %v725_v51 = vadd.f32 %v724_v48, %v1290_v43  ;;  %v858_v53 = vadd.f32 %v857_v44, %v795_v40  ;;  %v800_v43 = vmul.f32 %v1326_v60, %v1326_v60  ;;  %v809_v48 = vmul.f32 %v1416_v46, %v1416_v46 }
 0x139   :  { %v859_v54 = vadd.f32 %v858_v53, %v796_v49  ;;  %v726_v55 = vadd.f32 %v725_v51, %v1308_v47 }
 0x13b   :  { %v727_v0 = vadd.f32 %v1281_v41, %v726_v55  ;;  %v860_v2 = vadd.f32 %v859_v54, %v797_v56  ;;  %v802_v41 = vmul.f32 %v1317_v58, %v1317_v58 }
 0x13d   :  { %v861_v6 = vadd.f32 %v860_v2, %v798_v61  ;;  %v728_v8 = vadd.f32 %v1299_v45, %v727_v0  ;;  %v803_v45 = vmul.f32 %v1335_v1, %v1335_v1  ;;  %v813_v0 = vmul.f32 %v1452_v7, %v1452_v7 }
 0x13f   :  { %v729_v9 = vadd.f32 %v728_v8, %v1326_v60  ;;  %v862_v10 = vadd.f32 %v861_v6, %v799_v4  ;;  %v804_v60 = vmul.f32 %v1362_v16, %v1362_v16 }
 0x141   :  { %v863_v11 = vadd.f32 %v862_v10, %v800_v43  ;;  %v730_v47 = vadd.f32 %v729_v9, %v1344_v3 }
 0x143   :  { %v731_v13 = vadd.f32 %v1317_v58, %v730_v47  ;;  %v864_v17 = vadd.f32 %v863_v11, %v801_v12  ;;  %v806_v58 = vmul.f32 %v1353_v14, %v1353_v14  ;;  %v817_v11 = vmul.f32 %v1488_v31, %v1488_v31 }
 0x145   :  { %v865_v19 = vadd.f32 %v864_v17, %v802_v41  ;;  %v732_v22 = vadd.f32 %v1335_v1, %v731_v13  ;;  %v807_v1 = vmul.f32 %v1371_v21, %v1371_v21 }
 0x147   :  { %v733_v25 = vadd.f32 %v732_v22, %v1362_v16  ;;  %v866_v26 = vadd.f32 %v865_v19, %v803_v45  ;;  %v808_v16 = vmul.f32 %v1398_v36, %v1398_v36  ;;  %v821_v22 = vmul.f32 %v1524_v63, %v1524_v63 }
 0x149   :  { %v867_v28 = vadd.f32 %v866_v26, %v804_v60  ;;  %v734_v3 = vadd.f32 %v733_v25, %v1380_v23 }
 0x14b   :  { %v735_v33 = vadd.f32 %v1353_v14, %v734_v3  ;;  %v868_v35 = vadd.f32 %v867_v28, %v805_v32  ;;  %v810_v14 = vmul.f32 %v1389_v34, %v1389_v34 }
 0x14d   :  { %v869_v37 = vadd.f32 %v868_v35, %v806_v58  ;;  %v736_v38 = vadd.f32 %v1371_v21, %v735_v33  ;;  %v811_v21 = vmul.f32 %v1407_v42, %v1407_v42  ;;  %v825_v33 = vmul.f32 %v1560_v30, %v1560_v30 }
 0x14f   :  { %v737_v39 = vadd.f32 %v736_v38, %v1398_v36  ;;  %v870_v40 = vadd.f32 %v869_v37, %v807_v1  ;;  %v812_v36 = vmul.f32 %v1434_v62, %v1434_v62 }
 0x151   :  { %v871_v44 = vadd.f32 %v870_v40, %v808_v16  ;;  %v738_v23 = vadd.f32 %v737_v39, %v1416_v46 }
 0x153   :  { %v739_v49 = vadd.f32 %v1389_v34, %v738_v23  ;;  %v872_v51 = vadd.f32 %v871_v44, %v809_v48  ;;  %v814_v34 = vmul.f32 %v1425_v59, %v1425_v59 }
 0x155   :  { %v873_v53 = vadd.f32 %v872_v51, %v810_v14  ;;  %v740_v54 = vadd.f32 %v1407_v42, %v739_v49  ;;  %v815_v42 = vmul.f32 %v1443_v5, %v1443_v5 }
 0x157   :  { %v741_v55 = vadd.f32 %v740_v54, %v1434_v62  ;;  %v874_v56 = vadd.f32 %v873_v53, %v811_v21  ;;  %v816_v62 = vmul.f32 %v1470_v24, %v1470_v24 }
 0x159   :  { %v875_v61 = vadd.f32 %v874_v56, %v812_v36  ;;  %v742_v46 = vadd.f32 %v741_v55, %v1452_v7 }
 0x15b   :  { %v743_v2 = vadd.f32 %v1425_v59, %v742_v46  ;;  %v876_v4 = vadd.f32 %v875_v61, %v813_v0  ;;  %v818_v59 = vmul.f32 %v1461_v20, %v1461_v20 }
 0x15d   :  { %v877_v6 = vadd.f32 %v876_v4, %v814_v34  ;;  %v744_v8 = vadd.f32 %v1443_v5, %v743_v2  ;;  %v819_v5 = vmul.f32 %v1479_v29, %v1479_v29 }
 0x15f   :  { %v745_v43 = vadd.f32 %v744_v8, %v1470_v24  ;;  %v878_v9 = vadd.f32 %v877_v6, %v815_v42  ;;  %v820_v24 = vmul.f32 %v1506_v52, %v1506_v52 }
 0x161   :  { %v879_v10 = vadd.f32 %v878_v9, %v816_v62  ;;  %v746_v7 = vadd.f32 %v745_v43, %v1488_v31 }
 0x163   :  { %v747_v47 = vadd.f32 %v1461_v20, %v746_v7  ;;  %v880_v12 = vadd.f32 %v879_v10, %v817_v11  ;;  %v822_v20 = vmul.f32 %v1497_v50, %v1497_v50 }
 0x165   :  { %v881_v41 = vadd.f32 %v880_v12, %v818_v59  ;;  %v748_v13 = vadd.f32 %v1479_v29, %v747_v47  ;;  %v823_v29 = vmul.f32 %v1515_v57, %v1515_v57 }
 0x167   :  { %v749_v17 = vadd.f32 %v748_v13, %v1506_v52  ;;  %v882_v45 = vadd.f32 %v881_v41, %v819_v5  ;;  %v824_v52 = vmul.f32 %v1542_v18, %v1542_v18 }
 0x169   :  { %v883_v19 = vadd.f32 %v882_v45, %v820_v24  ;;  %v750_v31 = vadd.f32 %v749_v17, %v1524_v63 }
 0x16b   :  { %v751_v60 = vadd.f32 %v1497_v50, %v750_v31  ;;  %v884_v25 = vadd.f32 %v883_v19, %v821_v22  ;;  %v826_v50 = vmul.f32 %v1533_v15, %v1533_v15 }
 0x16d   :  { %v885_v26 = vadd.f32 %v884_v25, %v822_v20  ;;  %v752_v28 = vadd.f32 %v1515_v57, %v751_v60  ;;  %v827_v57 = vmul.f32 %v1551_v27, %v1551_v27 }
 0x16f   :  { %v753_v3 = vadd.f32 %v752_v28, %v1542_v18  ;;  %v886_v32 = vadd.f32 %v885_v26, %v823_v29 }
 0x171   :  { %v887_v58 = vadd.f32 %v886_v32, %v824_v52  ;;  %v754_v63 = vadd.f32 %v753_v3, %v1560_v30 }
 0x173   :  { %v755_v35 = vadd.f32 %v1533_v15, %v754_v63  ;;  %v888_v1 = vadd.f32 %v887_v58, %v825_v33 }
 0x175   :  { %v756_v37 = vadd.f32 %v1551_v27, %v755_v35  ;;  %v889_v38 = vadd.f32 %v888_v1, %v826_v50 }
 0x177   :  { %v757_v18 = vrot.slane %v756_v37, 4  ;;  %v890_v16 = vadd.f32 %v889_v38, %v827_v57 }
 0x179   :  { %v758_v39 = vadd.f32 %v757_v18, %v756_v37  ;;  %v891_v40 = vrot.slane %v890_v16, 4 }
 0x17b   :  { %v759_v44 = vrot.slane %v758_v39, 2  ;;  %v892_v23 = vadd.f32 %v891_v40, %v890_v16 }
 0x17d   :  { %v760_v48 = vadd.f32 %v759_v44, %v758_v39  ;;  %v893_v30 = vrot.slane %v892_v23, 2 }
 0x17f   :  { %v761_v14 = vrot.slane %v760_v48, 1  ;;  %v894_v49 = vadd.f32 %v893_v30, %v892_v23 }
 0x181   :  { %v762_v51 = vadd.f32 %v761_v14, %v760_v48  ;;  %v895_v21 = vrot.slane %v894_v49, 1 }
 0x183   :  { %763 = vst [vmem:[%s1676_s5] sm:$0x1] %v762_v51  ;;  %v896_v15 = vadd.f32 %v895_v21, %v894_v49 }
 0x185   :  { %897 = vst [vmem:[%s1677_s6] sm:$0x1] %v896_v15 }

// kernel: bottleneck_forward.7
= control target key start
LH: loop header
LB: loop body
LE: loop exit
PB: predicated region body
PF: predicated region fallthrough
CT: control target
= control target key end

     0   :  { %s641_s1 = inlined_call_operand.vmem [shape: bf16[128,128], index: 1, kind: input, shape index: {}]   ;;  %s642_s0 = inlined_call_operand.vmem [shape: f32[128,128], index: 0, kind: input, shape index: {}]   ;;  %s643_s2 = inlined_call_operand.vmem [shape: f32[1,128], index: 2, kind: input, shape index: {}]   ;;  %s644_s3 = inlined_call_operand.vmem [shape: f32[1,128], index: 3, kind: input, shape index: {}]   ;;  %s645_s4 = inlined_call_operand.vmem [shape: f32[128,128], index: 4, kind: output, shape index: {0}]   ;;  %s646_s5 = inlined_call_operand.vmem [shape: f32[1,1,128], index: 5, kind: output, shape index: {1}]   ;;  %s647_s6 = inlined_call_operand.vmem [shape: f32[1,1,128], index: 6, kind: output, shape index: {2}]  }
   0x1   :  { %v430_v0 = vld [vmem:[%s641_s1] sm:$0xff]   ;;  %v431_v1 = vld [vmem:[%s641_s1 + $0x8] sm:$0xff]   ;;  %v432_v2 = vld [vmem:[%s641_s1 + $0x10] sm:$0xff]  }
   0x2   :  { %382 = vmatprep.subr.bf16.mxu0 %v430_v0  ;;  %414 = vmatprep.subr.bf16.mxu1 %v430_v0  ;;  %v433_v3 = vld [vmem:[%s641_s1 + $0x18] sm:$0xff]   ;;  %v21_v4 = vld [vmem:[%s642_s0] sm:$0xff]  ;;  %v22_v5 = vld [vmem:[%s642_s0 + $0x8] sm:$0xff] }
   0x3   :  { %383 = vmatpush3.bf16.msra.mxu0 %v430_v0  ;;  %422 = vmatpush3.bf16.msra.mxu1 %v430_v0  ;;  %v494_v6 = vld [vmem:[%s643_s2] ss:$0 sm:$0xff]  ;;  %v30_v16 = vld [vmem:[%s642_s0 + $0x48] sm:$0xff]  ;;  %v23_v18 = vld [vmem:[%s642_s0 + $0x10] sm:$0xff] }
   0x4   :  { %384 = vmatprep.subr.bf16.mxu0 %v431_v1  ;;  %415 = vmatprep.subr.bf16.mxu1 %v431_v1  ;;  %v44_v7 = vmul.f32 %v494_v6, %v21_v4  ;;  %v45_v8 = vmul.f32 %v494_v6, %v22_v5  ;;  %v501_v9 = vld [vmem:[%s644_s3] ss:$0 sm:$0xff]  ;;  %v435_v17 = vld [vmem:[%s641_s1 + $0x28] sm:$0xff]   ;;  %v24_v19 = vld [vmem:[%s642_s0 + $0x18] sm:$0xff]  ;;  %v53_v26 = vmul.f32 %v494_v6, %v30_v16 }
   0x5   :  { %v434_v12 = vld [vmem:[%s641_s1 + $0x20] sm:$0xff]   ;;  %v31_v23 = vld [vmem:[%s642_s0 + $0x50] sm:$0xff]  ;;  %v32_v24 = vld [vmem:[%s642_s0 + $0x58] sm:$0xff]  ;;  %v46_v29 = vmul.f32 %v494_v6, %v23_v18  ;;  %v47_v30 = vmul.f32 %v494_v6, %v24_v19 }
   0x6   :  { %v67_v10 = vadd.f32 %v501_v9, %v44_v7  ;;  %v68_v11 = vadd.f32 %v501_v9, %v45_v8  ;;  %v29_v13 = vld [vmem:[%s642_s0 + $0x40] sm:$0xff]  ;;  %v26_v25 = vld [vmem:[%s642_s0 + $0x28] sm:$0xff]  ;;  %v76_v33 = vadd.f32 %v501_v9, %v53_v26  ;;  %v54_v34 = vmul.f32 %v494_v6, %v31_v23  ;;  %v436_v40 = vld [vmem:[%s641_s1 + $0x30] sm:$0xff]  }
   0x7   :  { %385 = vmatpush3.bf16.msra.mxu0 %v431_v1  ;;  %423 = vmatpush3.bf16.msra.mxu1 %v431_v1  ;;  %v25_v21 = vld [vmem:[%s642_s0 + $0x20] sm:$0xff]  ;;  %v52_v22 = vmul.f32 %v494_v6, %v29_v13  ;;  %v34_v28 = vld [vmem:[%s642_s0 + $0x68] sm:$0xff]  ;;  %v55_v35 = vmul.f32 %v494_v6, %v32_v24  ;;  %v49_v36 = vmul.f32 %v494_v6, %v26_v25  ;;  %v27_v45 = vld [vmem:[%s642_s0 + $0x30] sm:$0xff] }
   0x8   :  { %386 = vmatprep.subr.bf16.mxu0 %v432_v2  ;;  %416 = vmatprep.subr.bf16.mxu1 %v432_v2  ;;  %v83_v14 = vmax.f32 %v67_v10, 0.0  ;;  %v84_v15 = vmax.f32 %v68_v11, 0.0  ;;  %v33_v27 = vld [vmem:[%s642_s0 + $0x60] sm:$0xff]  ;;  %v48_v32 = vmul.f32 %v494_v6, %v25_v21  ;;  %v57_v39 = vmul.f32 %v494_v6, %v34_v28  ;;  %v28_v46 = vld [vmem:[%s642_s0 + $0x38] sm:$0xff]  ;;  %v35_v53 = vld [vmem:[%s642_s0 + $0x70] sm:$0xff] }
   0x9   :  { %v75_v31 = vadd.f32 %v501_v9, %v52_v22  ;;  %v56_v38 = vmul.f32 %v494_v6, %v33_v27  ;;  %v92_v41 = vmax.f32 %v76_v33, 0.0  ;;  %v69_v42 = vadd.f32 %v501_v9, %v46_v29  ;;  %v36_v54 = vld [vmem:[%s642_s0 + $0x78] sm:$0xff] }
   0xa   :  { %v99_v20 = vpack.c.bf16 %v84_v15, %v83_v14  ;;  %v70_v43 = vadd.f32 %v501_v9, %v47_v30  ;;  %v71_v44 = vadd.f32 %v501_v9, %v48_v32  ;;  %v77_v48 = vadd.f32 %v501_v9, %v54_v34  ;;  %v437_v55 = vld [vmem:[%s641_s1 + $0x38] sm:$0xff]  }
   0xb   :  { %387 = vmatpush3.bf16.msra.mxu0 %v432_v2  ;;  %424 = vmatpush3.bf16.msra.mxu1 %v432_v2  ;;  %v91_v37 = vmax.f32 %v75_v31, 0.0  ;;  %v78_v49 = vadd.f32 %v501_v9, %v55_v35  ;;  %v72_v50 = vadd.f32 %v501_v9, %v49_v36  ;;  %v79_v51 = vadd.f32 %v501_v9, %v56_v38 }
   0xc   :  { %388 = vmatprep.subr.bf16.mxu0 %v433_v3  ;;  %417 = vmatprep.subr.bf16.mxu1 %v433_v3  ;;  %v80_v52 = vadd.f32 %v501_v9, %v57_v39  ;;  %v85_v56 = vmax.f32 %v69_v42, 0.0  ;;  %v86_v57 = vmax.f32 %v70_v43, 0.0  ;;  %v50_v58 = vmul.f32 %v494_v6, %v27_v45 }
   0xd   :  { %398 = vmatprep.mubr.bf16.mxu0 %v99_v20  ;;  %v103_v47 = vpack.c.bf16 %v92_v41, %v91_v37  ;;  %v51_v59 = vmul.f32 %v494_v6, %v28_v46  ;;  %v93_v60 = vmax.f32 %v77_v48, 0.0  ;;  %v94_v61 = vmax.f32 %v78_v49, 0.0 }
   0xe   :  { %v58_v62 = vmul.f32 %v494_v6, %v35_v53  ;;  %v59_v63 = vmul.f32 %v494_v6, %v36_v54  ;;  %v87_v0 = vmax.f32 %v71_v44, 0.0  ;;  %v88_v1 = vmax.f32 %v72_v50, 0.0 }
   0xf   :  { %389 = vmatpush3.bf16.msra.mxu0 %v433_v3  ;;  %425 = vmatpush3.bf16.msra.mxu1 %v433_v3  ;;  %v95_v2 = vmax.f32 %v79_v51, 0.0  ;;  %v96_v3 = vmax.f32 %v80_v52, 0.0  ;;  %v100_v4 = vpack.c.bf16 %v86_v57, %v85_v56  ;;  %v73_v5 = vadd.f32 %v501_v9, %v50_v58 }
  0x10   :  { %390 = vmatprep.subr.bf16.mxu0 %v434_v12  ;;  %418 = vmatprep.subr.bf16.mxu1 %v434_v12  ;;  %v74_v7 = vadd.f32 %v501_v9, %v51_v59  ;;  %v104_v8 = vpack.c.bf16 %v94_v61, %v93_v60  ;;  %v81_v10 = vadd.f32 %v501_v9, %v58_v62 }
  0x11   :  { %406 = vmatprep.mubr.bf16.mxu1 %v103_v47  ;;  %v82_v11 = vadd.f32 %v501_v9, %v59_v63  ;;  %v101_v6 = vpack.c.bf16 %v88_v1, %v87_v0  ;;  %v89_v13 = vmax.f32 %v73_v5, 0.0 }
  0x12   :  { %v90_v14 = vmax.f32 %v74_v7, 0.0  ;;  %v97_v15 = vmax.f32 %v81_v10, 0.0 }
  0x13   :  { %391 = vmatpush3.bf16.msra.mxu0 %v434_v12  ;;  %426 = vmatpush3.bf16.msra.mxu1 %v434_v12  ;;  %v105_v12 = vpack.c.bf16 %v96_v3, %v95_v2  ;;  %v98_v16 = vmax.f32 %v82_v11, 0.0 }
  0x14   :  { %392 = vmatprep.subr.bf16.mxu0 %v435_v17  ;;  %419 = vmatprep.subr.bf16.mxu1 %v435_v17 }
  0x15   :  { %v106_v18 = vpack.c.bf16 %v98_v16, %v97_v15 }
  0x17   :  { %393 = vmatpush3.bf16.msra.mxu0 %v435_v17  ;;  %427 = vmatpush3.bf16.msra.mxu1 %v435_v17  ;;  %v102_v17 = vpack.c.bf16 %v90_v14, %v89_v13 }
  0x18   :  { %394 = vmatprep.subr.bf16.mxu0 %v436_v40  ;;  %420 = vmatprep.subr.bf16.mxu1 %v436_v40 }
  0x1b   :  { %395 = vmatpush3.bf16.msra.mxu0 %v436_v40  ;;  %428 = vmatpush3.bf16.msra.mxu1 %v436_v40 }
  0x1c   :  { %396 = vmatprep.subr.bf16.mxu0 %v437_v55  ;;  %421 = vmatprep.subr.bf16.mxu1 %v437_v55 }
  0x1f   :  { %397 = vmatpush3.bf16.msra.mxu0 %v437_v55  ;;  %429 = vmatpush3.bf16.msra.mxu1 %v437_v55 }
  0x22   :  { %399 = vmatmul.mubr.bf16.vlgmr.msra.gmra.mrb[0].mxu0 %v100_v4  ;;  %407 = vmatmul.mubr.bf16.vlgmr.msra.gmra.mrb[0].mxu1 %v104_v8 }
  0x23   :  { %402 = vmatprep.mubr.bf16.mxu0 %v101_v6  ;;  %410 = vmatprep.mubr.bf16.mxu1 %v105_v12 }
  0x2a   :  { %403 = vmatmul.mubr.bf16.gmra.mrb[4].mxu0 %v102_v17  ;;  %411 = vmatmul.mubr.bf16.gmra.mrb[4].mxu1 %v106_v18 }
  0xf5   :  { %v400_v19 = vpop.f32.mrb[0].mxu0  ;;  %v408_v20 = vpop.f32.mrb[0].mxu1 }
  0xf6   :  { %270 = vst [vmem:[%s645_s4 + $0x10] sm:$0xff] %v400_v19  ;;  %v205_v9 = vpop.f32.mrb[1].mxu0  ;;  %278 = vst [vmem:[%s645_s4 + $0x50] sm:$0xff] %v408_v20  ;;  %v237_v21 = vpop.f32.mrb[1].mxu1  ;;  %v308_v29 = vmul.f32 %v400_v19, %v400_v19  ;;  %v316_v61 = vmul.f32 %v408_v20, %v408_v20 }
  0xf7   :  { %268 = vst [vmem:[%s645_s4] sm:$0xff] %v205_v9  ;;  %v401_v22 = vpop.f32.mrb[2].mxu0  ;;  %276 = vst [vmem:[%s645_s4 + $0x40] sm:$0xff] %v237_v21  ;;  %v409_v23 = vpop.f32.mrb[2].mxu1  ;;  %v306_v26 = vmul.f32 %v205_v9, %v205_v9  ;;  %v314_v55 = vmul.f32 %v237_v21, %v237_v21 }
  0xf8   :  { %271 = vst [vmem:[%s645_s4 + $0x18] sm:$0xff] %v401_v22  ;;  %v208_v24 = vpop.f32.mrb[3].mxu0  ;;  %279 = vst [vmem:[%s645_s4 + $0x58] sm:$0xff] %v409_v23  ;;  %v240_v25 = vpop.f32.mrb[3].mxu1  ;;  %v309_v32 = vmul.f32 %v401_v22, %v401_v22  ;;  %v317_v0 = vmul.f32 %v409_v23, %v409_v23 }
  0xf9   :  { %269 = vst [vmem:[%s645_s4 + $0x8] sm:$0xff] %v208_v24  ;;  %v284_v27 = vadd.f32 %v208_v24, %v205_v9  ;;  %v307_v28 = vmul.f32 %v208_v24, %v208_v24  ;;  %277 = vst [vmem:[%s645_s4 + $0x48] sm:$0xff] %v240_v25  ;;  %v315_v60 = vmul.f32 %v240_v25, %v240_v25 }
  0xfb   :  { %v285_v30 = vadd.f32 %v400_v19, %v284_v27  ;;  %v322_v31 = vadd.f32 %v307_v28, %v306_v26 }
  0xfd   :  { %v323_v33 = vadd.f32 %v322_v31, %v308_v29  ;;  %v404_v34 = vpop.f32.mrb[4].mxu0  ;;  %v286_v35 = vadd.f32 %v401_v22, %v285_v30  ;;  %v412_v36 = vpop.f32.mrb[4].mxu1 }
  0xfe   :  { %274 = vst [vmem:[%s645_s4 + $0x30] sm:$0xff] %v404_v34  ;;  %v221_v37 = vpop.f32.mrb[5].mxu0  ;;  %282 = vst [vmem:[%s645_s4 + $0x70] sm:$0xff] %v412_v36  ;;  %v253_v38 = vpop.f32.mrb[5].mxu1  ;;  %v312_v49 = vmul.f32 %v404_v34, %v404_v34  ;;  %v320_v11 = vmul.f32 %v412_v36, %v412_v36 }
  0xff   :  { %272 = vst [vmem:[%s645_s4 + $0x20] sm:$0xff] %v221_v37  ;;  %v287_v39 = vadd.f32 %v286_v35, %v221_v37  ;;  %v310_v40 = vmul.f32 %v221_v37, %v221_v37  ;;  %v324_v41 = vadd.f32 %v323_v33, %v309_v32  ;;  %v405_v42 = vpop.f32.mrb[6].mxu0  ;;  %280 = vst [vmem:[%s645_s4 + $0x60] sm:$0xff] %v253_v38  ;;  %v413_v43 = vpop.f32.mrb[6].mxu1 }
 0x100   :  { %275 = vst [vmem:[%s645_s4 + $0x38] sm:$0xff] %v405_v42  ;;  %v224_v44 = vpop.f32.mrb[7].mxu0  ;;  %283 = vst [vmem:[%s645_s4 + $0x78] sm:$0xff] %v413_v43  ;;  %v256_v45 = vpop.f32.mrb[7].mxu1  ;;  %v313_v52 = vmul.f32 %v405_v42, %v405_v42  ;;  %v318_v3 = vmul.f32 %v253_v38, %v253_v38  ;;  %v321_v13 = vmul.f32 %v413_v43, %v413_v43 }
 0x101   :  { %v325_v46 = vadd.f32 %v324_v41, %v310_v40  ;;  %273 = vst [vmem:[%s645_s4 + $0x28] sm:$0xff] %v224_v44  ;;  %v288_v47 = vadd.f32 %v287_v39, %v224_v44  ;;  %v311_v48 = vmul.f32 %v224_v44, %v224_v44  ;;  %281 = vst [vmem:[%s645_s4 + $0x68] sm:$0xff] %v256_v45 }
 0x102   :  { %v319_v10 = vmul.f32 %v256_v45, %v256_v45 }
 0x103   :  { %v289_v50 = vadd.f32 %v404_v34, %v288_v47  ;;  %v326_v51 = vadd.f32 %v325_v46, %v311_v48 }
 0x105   :  { %v327_v53 = vadd.f32 %v326_v51, %v312_v49  ;;  %v290_v54 = vadd.f32 %v405_v42, %v289_v50 }
 0x107   :  { %v291_v56 = vadd.f32 %v290_v54, %v237_v21  ;;  %v328_v57 = vadd.f32 %v327_v53, %v313_v52 }
 0x109   :  { %v329_v58 = vadd.f32 %v328_v57, %v314_v55  ;;  %v292_v59 = vadd.f32 %v291_v56, %v240_v25 }
 0x10b   :  { %v293_v62 = vadd.f32 %v408_v20, %v292_v59  ;;  %v330_v63 = vadd.f32 %v329_v58, %v315_v60 }
 0x10d   :  { %v331_v1 = vadd.f32 %v330_v63, %v316_v61  ;;  %v294_v2 = vadd.f32 %v409_v23, %v293_v62 }
 0x10f   :  { %v295_v4 = vadd.f32 %v294_v2, %v253_v38  ;;  %v332_v5 = vadd.f32 %v331_v1, %v317_v0 }
 0x111   :  { %v333_v7 = vadd.f32 %v332_v5, %v318_v3  ;;  %v296_v8 = vadd.f32 %v295_v4, %v256_v45 }
 0x113   :  { %v297_v6 = vadd.f32 %v412_v36, %v296_v8  ;;  %v334_v12 = vadd.f32 %v333_v7, %v319_v10 }
 0x115   :  { %v298_v14 = vadd.f32 %v413_v43, %v297_v6  ;;  %v335_v15 = vadd.f32 %v334_v12, %v320_v11 }
 0x117   :  { %v299_v16 = vrot.slane %v298_v14, 4  ;;  %v336_v17 = vadd.f32 %v335_v15, %v321_v13 }
 0x119   :  { %v300_v18 = vadd.f32 %v299_v16, %v298_v14  ;;  %v337_v19 = vrot.slane %v336_v17, 4 }
 0x11b   :  { %v301_v20 = vrot.slane %v300_v18, 2  ;;  %v338_v9 = vadd.f32 %v337_v19, %v336_v17 }
 0x11d   :  { %v302_v21 = vadd.f32 %v301_v20, %v300_v18  ;;  %v339_v22 = vrot.slane %v338_v9, 2 }
 0x11f   :  { %v303_v23 = vrot.slane %v302_v21, 1  ;;  %v340_v24 = vadd.f32 %v339_v22, %v338_v9 }
 0x121   :  { %v304_v25 = vadd.f32 %v303_v23, %v302_v21  ;;  %v341_v26 = vrot.slane %v340_v24, 1 }
 0x123   :  { %305 = vst [vmem:[%s646_s5] sm:$0x1] %v304_v25  ;;  %v342_v27 = vadd.f32 %v341_v26, %v340_v24 }
 0x125   :  { %343 = vst [vmem:[%s647_s6] sm:$0x1] %v342_v27 }

// kernel: bottleneck_forward.8
= control target key start
LH: loop header
LB: loop body
LE: loop exit
PB: predicated region body
PF: predicated region fallthrough
CT: control target
= control target key end

     0   :  { %s567_s1 = inlined_call_operand.vmem [shape: bf16[128,128], index: 1, kind: input, shape index: {}]   ;;  %s568_s2 = inlined_call_operand.vmem [shape: f32[1,128], index: 2, kind: input, shape index: {}, may-alias: {2,3}]   ;;  %s569_s3 = inlined_call_operand.vmem [shape: f32[1,128], index: 3, kind: input, shape index: {}, may-alias: {2,3}]   ;;  %s570_s0 = inlined_call_operand.vmem [shape: bf16[128,128], index: 0, kind: input, shape index: {}]   ;;  %s571_s4 = inlined_call_operand.vmem [shape: f32[128,128], index: 4, kind: output, shape index: {0}]   ;;  %s572_s5 = inlined_call_operand.vmem [shape: f32[1,1,128], index: 5, kind: output, shape index: {1}]   ;;  %s573_s6 = inlined_call_operand.vmem [shape: f32[1,1,128], index: 6, kind: output, shape index: {2}]  }
   0x1   :  { %v414_v0 = vld [vmem:[%s567_s1] sm:$0xff]   ;;  %v415_v1 = vld [vmem:[%s567_s1 + $0x8] sm:$0xff]   ;;  %v416_v2 = vld [vmem:[%s567_s1 + $0x10] sm:$0xff]  }
   0x2   :  { %366 = vmatprep.subr.bf16.mxu0 %v414_v0  ;;  %398 = vmatprep.subr.bf16.mxu1 %v414_v0  ;;  %v417_v3 = vld [vmem:[%s567_s1 + $0x18] sm:$0xff]   ;;  %v422_v4 = vld [vmem:[%s570_s0] sm:$0xff]   ;;  %v419_v7 = vld [vmem:[%s567_s1 + $0x28] sm:$0xff]  }
   0x3   :  { %367 = vmatpush3.bf16.msra.mxu0 %v414_v0  ;;  %406 = vmatpush3.bf16.msra.mxu1 %v414_v0  ;;  %v418_v5 = vld [vmem:[%s567_s1 + $0x20] sm:$0xff]   ;;  %v420_v8 = vld [vmem:[%s567_s1 + $0x30] sm:$0xff]   ;;  %v421_v9 = vld [vmem:[%s567_s1 + $0x38] sm:$0xff]  }
   0x4   :  { %368 = vmatprep.subr.bf16.mxu0 %v415_v1  ;;  %399 = vmatprep.subr.bf16.mxu1 %v415_v1  ;;  %v426_v6 = vld [vmem:[%s570_s0 + $0x20] sm:$0xff]   ;;  %v423_v10 = vld [vmem:[%s570_s0 + $0x8] sm:$0xff]   ;;  %v424_v12 = vld [vmem:[%s570_s0 + $0x10] sm:$0xff]  }
   0x5   :  { %382 = vmatprep.mubr.bf16.mxu0 %v422_v4  ;;  %390 = vmatprep.mubr.bf16.mxu1 %v426_v6  ;;  %v427_v11 = vld [vmem:[%s570_s0 + $0x28] sm:$0xff]   ;;  %v428_v13 = vld [vmem:[%s570_s0 + $0x30] sm:$0xff]   ;;  %v425_v14 = vld [vmem:[%s570_s0 + $0x18] sm:$0xff]  }
   0x6   :  { %v429_v15 = vld [vmem:[%s570_s0 + $0x38] sm:$0xff]  }
   0x7   :  { %369 = vmatpush3.bf16.msra.mxu0 %v415_v1  ;;  %407 = vmatpush3.bf16.msra.mxu1 %v415_v1 }
   0x8   :  { %370 = vmatprep.subr.bf16.mxu0 %v416_v2  ;;  %400 = vmatprep.subr.bf16.mxu1 %v416_v2 }
   0xb   :  { %371 = vmatpush3.bf16.msra.mxu0 %v416_v2  ;;  %408 = vmatpush3.bf16.msra.mxu1 %v416_v2 }
   0xc   :  { %372 = vmatprep.subr.bf16.mxu0 %v417_v3  ;;  %401 = vmatprep.subr.bf16.mxu1 %v417_v3 }
   0xf   :  { %373 = vmatpush3.bf16.msra.mxu0 %v417_v3  ;;  %409 = vmatpush3.bf16.msra.mxu1 %v417_v3 }
  0x10   :  { %374 = vmatprep.subr.bf16.mxu0 %v418_v5  ;;  %402 = vmatprep.subr.bf16.mxu1 %v418_v5 }
  0x13   :  { %375 = vmatpush3.bf16.msra.mxu0 %v418_v5  ;;  %410 = vmatpush3.bf16.msra.mxu1 %v418_v5 }
  0x14   :  { %376 = vmatprep.subr.bf16.mxu0 %v419_v7  ;;  %403 = vmatprep.subr.bf16.mxu1 %v419_v7 }
  0x17   :  { %377 = vmatpush3.bf16.msra.mxu0 %v419_v7  ;;  %411 = vmatpush3.bf16.msra.mxu1 %v419_v7 }
  0x18   :  { %378 = vmatprep.subr.bf16.mxu0 %v420_v8  ;;  %404 = vmatprep.subr.bf16.mxu1 %v420_v8 }
  0x1b   :  { %379 = vmatpush3.bf16.msra.mxu0 %v420_v8  ;;  %412 = vmatpush3.bf16.msra.mxu1 %v420_v8 }
  0x1c   :  { %380 = vmatprep.subr.bf16.mxu0 %v421_v9  ;;  %405 = vmatprep.subr.bf16.mxu1 %v421_v9 }
  0x1f   :  { %381 = vmatpush3.bf16.msra.mxu0 %v421_v9  ;;  %413 = vmatpush3.bf16.msra.mxu1 %v421_v9 }
  0x22   :  { %383 = vmatmul.mubr.bf16.vlgmr.msra.gmra.mrb[0].mxu0 %v423_v10  ;;  %391 = vmatmul.mubr.bf16.vlgmr.msra.gmra.mrb[0].mxu1 %v427_v11 }
  0x23   :  { %386 = vmatprep.mubr.bf16.mxu0 %v424_v12  ;;  %394 = vmatprep.mubr.bf16.mxu1 %v428_v13 }
  0x2a   :  { %387 = vmatmul.mubr.bf16.gmra.mrb[4].mxu0 %v425_v14  ;;  %395 = vmatmul.mubr.bf16.gmra.mrb[4].mxu1 %v429_v15 }
  0xf5   :  { %v384_v16 = vpop.f32.mrb[0].mxu0  ;;  %v392_v17 = vpop.f32.mrb[0].mxu1 }
  0xf6   :  { %248 = vst [vmem:[%s571_s4 + $0x10] sm:$0xff] %v384_v16  ;;  %v183_v18 = vpop.f32.mrb[1].mxu0  ;;  %256 = vst [vmem:[%s571_s4 + $0x50] sm:$0xff] %v392_v17  ;;  %v215_v19 = vpop.f32.mrb[1].mxu1  ;;  %v286_v27 = vmul.f32 %v384_v16, %v384_v16  ;;  %v294_v59 = vmul.f32 %v392_v17, %v392_v17 }
  0xf7   :  { %246 = vst [vmem:[%s571_s4] sm:$0xff] %v183_v18  ;;  %v385_v20 = vpop.f32.mrb[2].mxu0  ;;  %254 = vst [vmem:[%s571_s4 + $0x40] sm:$0xff] %v215_v19  ;;  %v393_v21 = vpop.f32.mrb[2].mxu1  ;;  %v284_v24 = vmul.f32 %v183_v18, %v183_v18  ;;  %v292_v53 = vmul.f32 %v215_v19, %v215_v19 }
  0xf8   :  { %249 = vst [vmem:[%s571_s4 + $0x18] sm:$0xff] %v385_v20  ;;  %v186_v22 = vpop.f32.mrb[3].mxu0  ;;  %257 = vst [vmem:[%s571_s4 + $0x58] sm:$0xff] %v393_v21  ;;  %v218_v23 = vpop.f32.mrb[3].mxu1  ;;  %v287_v30 = vmul.f32 %v385_v20, %v385_v20  ;;  %v295_v62 = vmul.f32 %v393_v21, %v393_v21 }
  0xf9   :  { %247 = vst [vmem:[%s571_s4 + $0x8] sm:$0xff] %v186_v22  ;;  %v262_v25 = vadd.f32 %v186_v22, %v183_v18  ;;  %v285_v26 = vmul.f32 %v186_v22, %v186_v22  ;;  %255 = vst [vmem:[%s571_s4 + $0x48] sm:$0xff] %v218_v23  ;;  %v293_v58 = vmul.f32 %v218_v23, %v218_v23 }
  0xfb   :  { %v263_v28 = vadd.f32 %v384_v16, %v262_v25  ;;  %v300_v29 = vadd.f32 %v285_v26, %v284_v24 }
  0xfd   :  { %v301_v31 = vadd.f32 %v300_v29, %v286_v27  ;;  %v388_v32 = vpop.f32.mrb[4].mxu0  ;;  %v264_v33 = vadd.f32 %v385_v20, %v263_v28  ;;  %v396_v34 = vpop.f32.mrb[4].mxu1 }
  0xfe   :  { %252 = vst [vmem:[%s571_s4 + $0x30] sm:$0xff] %v388_v32  ;;  %v199_v35 = vpop.f32.mrb[5].mxu0  ;;  %260 = vst [vmem:[%s571_s4 + $0x70] sm:$0xff] %v396_v34  ;;  %v231_v36 = vpop.f32.mrb[5].mxu1  ;;  %v290_v47 = vmul.f32 %v388_v32, %v388_v32  ;;  %v298_v7 = vmul.f32 %v396_v34, %v396_v34 }
  0xff   :  { %250 = vst [vmem:[%s571_s4 + $0x20] sm:$0xff] %v199_v35  ;;  %v265_v37 = vadd.f32 %v264_v33, %v199_v35  ;;  %v288_v38 = vmul.f32 %v199_v35, %v199_v35  ;;  %v302_v39 = vadd.f32 %v301_v31, %v287_v30  ;;  %v389_v40 = vpop.f32.mrb[6].mxu0  ;;  %258 = vst [vmem:[%s571_s4 + $0x60] sm:$0xff] %v231_v36  ;;  %v397_v41 = vpop.f32.mrb[6].mxu1 }
 0x100   :  { %253 = vst [vmem:[%s571_s4 + $0x38] sm:$0xff] %v389_v40  ;;  %v202_v42 = vpop.f32.mrb[7].mxu0  ;;  %261 = vst [vmem:[%s571_s4 + $0x78] sm:$0xff] %v397_v41  ;;  %v234_v43 = vpop.f32.mrb[7].mxu1  ;;  %v291_v50 = vmul.f32 %v389_v40, %v389_v40  ;;  %v296_v1 = vmul.f32 %v231_v36, %v231_v36  ;;  %v299_v10 = vmul.f32 %v397_v41, %v397_v41 }
 0x101   :  { %v303_v44 = vadd.f32 %v302_v39, %v288_v38  ;;  %251 = vst [vmem:[%s571_s4 + $0x28] sm:$0xff] %v202_v42  ;;  %v266_v45 = vadd.f32 %v265_v37, %v202_v42  ;;  %v289_v46 = vmul.f32 %v202_v42, %v202_v42  ;;  %259 = vst [vmem:[%s571_s4 + $0x68] sm:$0xff] %v234_v43 }
 0x102   :  { %v297_v6 = vmul.f32 %v234_v43, %v234_v43 }
 0x103   :  { %v267_v48 = vadd.f32 %v388_v32, %v266_v45  ;;  %v304_v49 = vadd.f32 %v303_v44, %v289_v46 }
 0x105   :  { %v305_v51 = vadd.f32 %v304_v49, %v290_v47  ;;  %v268_v52 = vadd.f32 %v389_v40, %v267_v48 }
 0x107   :  { %v269_v54 = vadd.f32 %v268_v52, %v215_v19  ;;  %v306_v55 = vadd.f32 %v305_v51, %v291_v50 }
 0x109   :  { %v307_v56 = vadd.f32 %v306_v55, %v292_v53  ;;  %v270_v57 = vadd.f32 %v269_v54, %v218_v23 }
 0x10b   :  { %v271_v60 = vadd.f32 %v392_v17, %v270_v57  ;;  %v308_v61 = vadd.f32 %v307_v56, %v293_v58 }
 0x10d   :  { %v309_v63 = vadd.f32 %v308_v61, %v294_v59  ;;  %v272_v0 = vadd.f32 %v393_v21, %v271_v60 }
 0x10f   :  { %v273_v2 = vadd.f32 %v272_v0, %v231_v36  ;;  %v310_v3 = vadd.f32 %v309_v63, %v295_v62 }
 0x111   :  { %v311_v4 = vadd.f32 %v310_v3, %v296_v1  ;;  %v274_v5 = vadd.f32 %v273_v2, %v234_v43 }
 0x113   :  { %v275_v8 = vadd.f32 %v396_v34, %v274_v5  ;;  %v312_v9 = vadd.f32 %v311_v4, %v297_v6 }
 0x115   :  { %v276_v11 = vadd.f32 %v397_v41, %v275_v8  ;;  %v313_v12 = vadd.f32 %v312_v9, %v298_v7 }
 0x117   :  { %v277_v13 = vrot.slane %v276_v11, 4  ;;  %v314_v14 = vadd.f32 %v313_v12, %v299_v10 }
 0x119   :  { %v278_v15 = vadd.f32 %v277_v13, %v276_v11  ;;  %v315_v16 = vrot.slane %v314_v14, 4 }
 0x11b   :  { %v279_v17 = vrot.slane %v278_v15, 2  ;;  %v316_v18 = vadd.f32 %v315_v16, %v314_v14 }
 0x11d   :  { %v280_v19 = vadd.f32 %v279_v17, %v278_v15  ;;  %v317_v20 = vrot.slane %v316_v18, 2 }
 0x11f   :  { %v281_v21 = vrot.slane %v280_v19, 1  ;;  %v318_v22 = vadd.f32 %v317_v20, %v316_v18 }
 0x121   :  { %v282_v23 = vadd.f32 %v281_v21, %v280_v19  ;;  %v319_v24 = vrot.slane %v318_v22, 1 }
 0x123   :  { %283 = vst [vmem:[%s572_s5] sm:$0x1] %v282_v23  ;;  %v320_v25 = vadd.f32 %v319_v24, %v318_v22 }
 0x125   :  { %321 = vst [vmem:[%s573_s6] sm:$0x1] %v320_v25 }

// kernel: bottleneck_forward.9
= control target key start
LH: loop header
LB: loop body
LE: loop exit
PB: predicated region body
PF: predicated region fallthrough
CT: control target
= control target key end

     0   :  { %s466_s0 = inlined_call_operand.vmem [shape: f32[128,128], index: 0, kind: input, shape index: {}, may-alias: {0,6}]   ;;  %s467_s1 = inlined_call_operand.vmem [shape: f32[128,128], index: 1, kind: input, shape index: {}]   ;;  %s468_s2 = inlined_call_operand.vmem [shape: f32[1,128], index: 2, kind: input, shape index: {}]   ;;  %s469_s3 = inlined_call_operand.vmem [shape: f32[1,128], index: 3, kind: input, shape index: {}]   ;;  %s470_s4 = inlined_call_operand.vmem [shape: f32[1,128], index: 4, kind: input, shape index: {}]   ;;  %s471_s5 = inlined_call_operand.vmem [shape: f32[1,128], index: 5, kind: input, shape index: {}]   ;;  %s472_s6 = inlined_call_operand.vmem [shape: f32[128,128], index: 6, kind: output, shape index: {}, may-alias: {0,6}]  }
   0x1   :  { %v23_v0 = vld [vmem:[%s466_s0] sm:$0xff]  ;;  %v24_v8 = vld [vmem:[%s466_s0 + $0x8] sm:$0xff]  ;;  %v25_v10 = vld [vmem:[%s466_s0 + $0x10] sm:$0xff] }
   0x2   :  { %v244_v1 = vld [vmem:[%s468_s2] ss:$0 sm:$0xff]  ;;  %v86_v9 = vld [vmem:[%s467_s1 + $0x8] sm:$0xff]  ;;  %v87_v15 = vld [vmem:[%s467_s1 + $0x10] sm:$0xff] }
   0x3   :  { %v249_v2 = vld [vmem:[%s469_s3] ss:$0 sm:$0xff]  ;;  %v46_v3 = vmul.f32 %v244_v1, %v23_v0  ;;  %v47_v12 = vmul.f32 %v244_v1, %v24_v8  ;;  %v48_v14 = vmul.f32 %v244_v1, %v25_v10  ;;  %v26_v16 = vld [vmem:[%s466_s0 + $0x18] sm:$0xff]  ;;  %v28_v24 = vld [vmem:[%s466_s0 + $0x28] sm:$0xff] }
   0x4   :  { %v85_v4 = vld [vmem:[%s467_s1] sm:$0xff]  ;;  %v88_v17 = vld [vmem:[%s467_s1 + $0x18] sm:$0xff]  ;;  %v49_v20 = vmul.f32 %v244_v1, %v26_v16  ;;  %v90_v29 = vld [vmem:[%s467_s1 + $0x28] sm:$0xff]  ;;  %v51_v38 = vmul.f32 %v244_v1, %v28_v24 }
   0x5   :  { %v258_v5 = vld [vmem:[%s470_s4] ss:$0 sm:$0xff]  ;;  %v69_v11 = vadd.f32 %v249_v2, %v46_v3  ;;  %v70_v25 = vadd.f32 %v249_v2, %v47_v12  ;;  %v71_v27 = vadd.f32 %v249_v2, %v48_v14  ;;  %v29_v34 = vld [vmem:[%s466_s0 + $0x30] sm:$0xff]  ;;  %v30_v44 = vld [vmem:[%s466_s0 + $0x38] sm:$0xff] }
   0x6   :  { %v263_v6 = vld [vmem:[%s471_s5] ss:$0 sm:$0xff]  ;;  %v108_v7 = vmul.f32 %v258_v5, %v85_v4  ;;  %v109_v13 = vmul.f32 %v258_v5, %v86_v9  ;;  %v110_v19 = vmul.f32 %v258_v5, %v87_v15  ;;  %v111_v21 = vmul.f32 %v258_v5, %v88_v17  ;;  %v91_v39 = vld [vmem:[%s467_s1 + $0x30] sm:$0xff]  ;;  %v92_v45 = vld [vmem:[%s467_s1 + $0x38] sm:$0xff] }
   0x7   :  { %v27_v22 = vld [vmem:[%s466_s0 + $0x20] sm:$0xff]  ;;  %v72_v32 = vadd.f32 %v249_v2, %v49_v20  ;;  %v113_v43 = vmul.f32 %v258_v5, %v90_v29  ;;  %v74_v48 = vadd.f32 %v249_v2, %v51_v38  ;;  %v52_v49 = vmul.f32 %v244_v1, %v29_v34  ;;  %v94_v3 = vld [vmem:[%s467_s1 + $0x48] sm:$0xff]  ;;  %v96_v17 = vld [vmem:[%s467_s1 + $0x58] sm:$0xff] }
   0x8   :  { %v131_v18 = vadd.f32 %v263_v6, %v108_v7  ;;  %v89_v23 = vld [vmem:[%s467_s1 + $0x20] sm:$0xff]  ;;  %v132_v26 = vadd.f32 %v263_v6, %v109_v13  ;;  %v50_v28 = vmul.f32 %v244_v1, %v27_v22  ;;  %v133_v31 = vadd.f32 %v263_v6, %v110_v19 }
   0x9   :  { %v134_v33 = vadd.f32 %v263_v6, %v111_v21  ;;  %v112_v37 = vmul.f32 %v258_v5, %v89_v23  ;;  %v31_v50 = vld [vmem:[%s466_s0 + $0x40] sm:$0xff]  ;;  %v136_v54 = vadd.f32 %v263_v6, %v113_v43  ;;  %v114_v55 = vmul.f32 %v258_v5, %v91_v39  ;;  %v99_v43 = vld [vmem:[%s467_s1 + $0x70] sm:$0xff] }
   0xa   :  { %v147_v30 = vadd.f32 %v131_v18, %v69_v11  ;;  %v148_v35 = vadd.f32 %v132_v26, %v70_v25  ;;  %v73_v36 = vadd.f32 %v249_v2, %v50_v28  ;;  %v149_v41 = vadd.f32 %v133_v31, %v71_v27  ;;  %v93_v51 = vld [vmem:[%s467_s1 + $0x40] sm:$0xff]  ;;  %v95_v11 = vld [vmem:[%s467_s1 + $0x50] sm:$0xff] }
   0xb   :  { %v150_v42 = vadd.f32 %v134_v33, %v72_v32  ;;  %v135_v47 = vadd.f32 %v263_v6, %v112_v37  ;;  %v75_v58 = vadd.f32 %v249_v2, %v52_v49  ;;  %v53_v59 = vmul.f32 %v244_v1, %v30_v44  ;;  %v97_v27 = vld [vmem:[%s467_s1 + $0x60] sm:$0xff]  ;;  %v98_v33 = vld [vmem:[%s467_s1 + $0x68] sm:$0xff]  ;;  %v100_v49 = vld [vmem:[%s467_s1 + $0x78] sm:$0xff] }
   0xc   :  { %v163_v40 = vmax.f32 %v147_v30, 0.0  ;;  %v164_v46 = vmax.f32 %v148_v35, 0.0  ;;  %v165_v52 = vmax.f32 %v149_v41, 0.0  ;;  %v115_v60 = vmul.f32 %v258_v5, %v92_v45 }
   0xd   :  { %v166_v53 = vmax.f32 %v150_v42, 0.0  ;;  %v151_v57 = vadd.f32 %v135_v47, %v73_v36  ;;  %v152_v61 = vadd.f32 %v136_v54, %v74_v48  ;;  %v137_v62 = vadd.f32 %v263_v6, %v114_v55 }
   0xe   :  { %179 = vst [vmem:[%s472_s6] sm:$0xff] %v163_v40  ;;  %v54_v63 = vmul.f32 %v244_v1, %v31_v50  ;;  %v116_v0 = vmul.f32 %v258_v5, %v93_v51  ;;  %v76_v8 = vadd.f32 %v249_v2, %v53_v59  ;;  %v138_v9 = vadd.f32 %v263_v6, %v115_v60 }
   0xf   :  { %v167_v7 = vmax.f32 %v151_v57, 0.0  ;;  %v168_v13 = vmax.f32 %v152_v61, 0.0  ;;  %v153_v14 = vadd.f32 %v137_v62, %v75_v58  ;;  %v117_v20 = vmul.f32 %v258_v5, %v94_v3 }
  0x10   :  { %v77_v15 = vadd.f32 %v249_v2, %v54_v63  ;;  %v139_v16 = vadd.f32 %v263_v6, %v116_v0  ;;  %v154_v18 = vadd.f32 %v138_v9, %v76_v8  ;;  %v118_v25 = vmul.f32 %v258_v5, %v95_v11 }
  0x11   :  { %v169_v23 = vmax.f32 %v153_v14, 0.0  ;;  %v140_v30 = vadd.f32 %v263_v6, %v117_v20  ;;  %v119_v32 = vmul.f32 %v258_v5, %v96_v17  ;;  %v120_v41 = vmul.f32 %v258_v5, %v97_v27 }
  0x12   :  { %v155_v24 = vadd.f32 %v139_v16, %v77_v15  ;;  %v170_v29 = vmax.f32 %v154_v18, 0.0  ;;  %v141_v36 = vadd.f32 %v263_v6, %v118_v25  ;;  %v122_v57 = vmul.f32 %v258_v5, %v99_v43 }
  0x13   :  { %v142_v40 = vadd.f32 %v263_v6, %v119_v32  ;;  %v123_v61 = vmul.f32 %v258_v5, %v100_v49 }
  0x14   :  { %v171_v35 = vmax.f32 %v155_v24, 0.0  ;;  %v145_v63 = vadd.f32 %v263_v6, %v122_v57 }
  0x15   :  { %v32_v56 = vld [vmem:[%s466_s0 + $0x48] sm:$0xff] }
  0x16   :  { %180 = vst [vmem:[%s472_s6 + $0x8] sm:$0xff] %v164_v46  ;;  %181 = vst [vmem:[%s472_s6 + $0x10] sm:$0xff] %v165_v52  ;;  %v55_v10 = vmul.f32 %v244_v1, %v32_v56  ;;  %v121_v46 = vmul.f32 %v258_v5, %v98_v33  ;;  %v143_v52 = vadd.f32 %v263_v6, %v120_v41 }
  0x17   :  { %182 = vst [vmem:[%s472_s6 + $0x18] sm:$0xff] %v166_v53 }
  0x18   :  { %v78_v19 = vadd.f32 %v249_v2, %v55_v10  ;;  %v144_v55 = vadd.f32 %v263_v6, %v121_v46 }
  0x1a   :  { %v156_v39 = vadd.f32 %v140_v30, %v78_v19 }
  0x1c   :  { %v172_v50 = vmax.f32 %v156_v39, 0.0 }
  0x1e   :  { %v33_v4 = vld [vmem:[%s466_s0 + $0x50] sm:$0xff]  ;;  %v34_v12 = vld [vmem:[%s466_s0 + $0x58] sm:$0xff] }
  0x1f   :  { %183 = vst [vmem:[%s472_s6 + $0x20] sm:$0xff] %v167_v7  ;;  %v56_v21 = vmul.f32 %v244_v1, %v33_v4  ;;  %v57_v26 = vmul.f32 %v244_v1, %v34_v12  ;;  %v146_v4 = vadd.f32 %v263_v6, %v123_v61 }
  0x21   :  { %v79_v31 = vadd.f32 %v249_v2, %v56_v21  ;;  %v80_v37 = vadd.f32 %v249_v2, %v57_v26 }
  0x23   :  { %v157_v44 = vadd.f32 %v141_v36, %v79_v31  ;;  %v158_v51 = vadd.f32 %v142_v40, %v80_v37 }
  0x25   :  { %v173_v54 = vmax.f32 %v157_v44, 0.0  ;;  %v174_v58 = vmax.f32 %v158_v51, 0.0 }
  0x26   :  { %v35_v22 = vld [vmem:[%s466_s0 + $0x60] sm:$0xff] }
  0x27   :  { %184 = vst [vmem:[%s472_s6 + $0x28] sm:$0xff] %v168_v13  ;;  %v58_v38 = vmul.f32 %v244_v1, %v35_v22 }
  0x29   :  { %v81_v45 = vadd.f32 %v249_v2, %v58_v38 }
  0x2b   :  { %v159_v59 = vadd.f32 %v143_v52, %v81_v45 }
  0x2d   :  { %v175_v0 = vmax.f32 %v159_v59, 0.0 }
  0x2e   :  { %v36_v28 = vld [vmem:[%s466_s0 + $0x68] sm:$0xff]  ;;  %v37_v34 = vld [vmem:[%s466_s0 + $0x70] sm:$0xff] }
  0x2f   :  { %185 = vst [vmem:[%s472_s6 + $0x30] sm:$0xff] %v169_v23  ;;  %186 = vst [vmem:[%s472_s6 + $0x38] sm:$0xff] %v170_v29  ;;  %v59_v42 = vmul.f32 %v244_v1, %v36_v28  ;;  %v60_v47 = vmul.f32 %v244_v1, %v37_v34 }
  0x30   :  { %187 = vst [vmem:[%s472_s6 + $0x40] sm:$0xff] %v171_v35 }
  0x31   :  { %v82_v53 = vadd.f32 %v249_v2, %v59_v42  ;;  %v83_v56 = vadd.f32 %v249_v2, %v60_v47 }
  0x33   :  { %v160_v62 = vadd.f32 %v144_v55, %v82_v53 }
  0x35   :  { %v176_v7 = vmax.f32 %v160_v62, 0.0 }
  0x37   :  { %v38_v48 = vld [vmem:[%s466_s0 + $0x78] sm:$0xff] }
  0x38   :  { %188 = vst [vmem:[%s472_s6 + $0x48] sm:$0xff] %v172_v50  ;;  %v61_v60 = vmul.f32 %v244_v1, %v38_v48  ;;  %189 = vst [vmem:[%s472_s6 + $0x50] sm:$0xff] %v173_v54  ;;  %v161_v1 = vadd.f32 %v145_v63, %v83_v56 }
  0x39   :  { %190 = vst [vmem:[%s472_s6 + $0x58] sm:$0xff] %v174_v58  ;;  %191 = vst [vmem:[%s472_s6 + $0x60] sm:$0xff] %v175_v0 }
  0x3a   :  { %v84_v3 = vadd.f32 %v249_v2, %v61_v60  ;;  %192 = vst [vmem:[%s472_s6 + $0x68] sm:$0xff] %v176_v7  ;;  %v177_v8 = vmax.f32 %v161_v1, 0.0 }
  0x3c   :  { %v162_v5 = vadd.f32 %v146_v4, %v84_v3  ;;  %193 = vst [vmem:[%s472_s6 + $0x70] sm:$0xff] %v177_v8 }
  0x3e   :  { %v178_v9 = vmax.f32 %v162_v5, 0.0 }
  0x40   :  { %194 = vst [vmem:[%s472_s6 + $0x78] sm:$0xff] %v178_v9 }

// kernel: bottleneck_forward.6
= control target key start
LH: loop header
LB: loop body
LE: loop exit
PB: predicated region body
PF: predicated region fallthrough
CT: control target
= control target key end

     0   :  { %s2870_s15 = smov 0   ;;  %s3396_s0 = inlined_call_operand.vmem [shape: bf16[8,9,9,128], index: 0, kind: input, shape index: {}]   ;;  %s3397_s1 = inlined_call_operand.vmem [shape: bf16[9,128,128], index: 1, kind: input, shape index: {}]   ;;  %s3398_s2 = inlined_call_operand.vmem [shape: f32[2,64,128], index: 2, kind: output, shape index: {0}]   ;;  %s3399_s3 = inlined_call_operand.vmem [shape: f32[2,1,128], index: 3, kind: output, shape index: {1}]   ;;  %s3400_s4 = inlined_call_operand.vmem [shape: f32[2,1,128], index: 4, kind: output, shape index: {2}]  }
   0x1 LB: > { %s2876_s16 = sadd.s32 4294967295, %s2843_s15   ;;  %p2051_p0 = scmp.ge.s32.totalorder %s2843_s15, 1  ;;  %s2843_s15 = sphi %s2870_s15, %s15_s15  }
   0x2   : > { %p169_p1 = scmp.lt.s32.totalorder %s2843_s15, 3 }
   0x4   : > { %p170_p2 = pnand %p2051_p0, %p169_p1 }
   0x5   : > { %v2741_v0 = vld [vmem:[%s3397_s1 + $0x40] sm:$0xff] (!%p170_p2)   ;;  %s2052_s19 = sshll.u32 (!%p170_p2), %s2876_s16, 2  ;;  %v2743_v2 = vld [vmem:[%s3397_s1 + $0x48] sm:$0xff] (!%p170_p2)   ;;  %v2745_v4 = vld [vmem:[%s3397_s1 + $0x50] sm:$0xff] (!%p170_p2)   ;;  %vm556_vm0 = vsmask.f32 (!%p170_p2), 3328 }
   0x6   : > { %173 = sbr.rel (%p170_p2) target bundleno = 413 (0x19d), region = 28  ;;  %v2742_v1 = vld [vmem:[%s3397_s1 + $0x100] sm:$0xff] (!%p170_p2)   ;;  %p203_p3 = scmp.lt.s32.totalorder (!%p170_p2), %s2052_s19, 7  ;;  %2436 = vmatprep.subr.bf16.mxu1 (!%p170_p2), %v2741_v0  ;;  %v2744_v3 = vld [vmem:[%s3397_s1 + $0x108] sm:$0xff] (!%p170_p2)   ;;  %v2746_v5 = vld [vmem:[%s3397_s1 + $0x110] sm:$0xff] (!%p170_p2)  }
   0x7   : > { %2532 = vmatprep.subr.bf16.mxu0 (!%p170_p2), %v2742_v1  ;;  %2437 = vmatpush3.bf16.msra.mxu1 (!%p170_p2), %v2741_v0  ;;  %v2747_v6 = vld [vmem:[%s3397_s1 + $0x58] sm:$0xff] (!%p170_p2)   ;;  %v2749_v8 = vld [vmem:[%s3397_s1 + $0x60] sm:$0xff] (!%p170_p2)   ;;  %v2751_v10 = vld [vmem:[%s3397_s1 + $0x68] sm:$0xff] (!%p170_p2)   ;;  %vm557_vm1 = vsmask.f32 (!%p170_p2), 7440  ;;  %p209_p4 = scmp.lt.s32.totalorder (!%p170_p2), %s2876_s16, 1 }
   0x8   : > { %2533 = vmatpush3.bf16.msra.mxu0 (!%p170_p2), %v2742_v1  ;;  %2438 = vmatprep.subr.bf16.mxu1 (!%p170_p2), %v2743_v2  ;;  %v2748_v7 = vld [vmem:[%s3397_s1 + $0x118] sm:$0xff] (!%p170_p2)   ;;  %v2750_v9 = vld [vmem:[%s3397_s1 + $0x120] sm:$0xff] (!%p170_p2)   ;;  %v2752_v14 = vld [vmem:[%s3397_s1 + $0x128] sm:$0xff] (!%p170_p2)  }
   0x9   : > { %2534 = vmatprep.subr.bf16.mxu0 (!%p170_p2), %v2744_v3  ;;  %v2753_v18 = vld [vmem:[%s3397_s1 + $0x70] sm:$0xff] (!%p170_p2)   ;;  %v2755_v20 = vld [vmem:[%s3397_s1 + $0x78] sm:$0xff] (!%p170_p2)   ;;  %v2759_v23 = vld [vmem:[%s3397_s1] sm:$0xff] (!%p170_p2)  }
   0xa   : > { %v2754_v19 = vld [vmem:[%s3397_s1 + $0x130] sm:$0xff] (!%p170_p2)   ;;  %v2756_v21 = vld [vmem:[%s3397_s1 + $0x138] sm:$0xff] (!%p170_p2)   ;;  %v2761_v24 = vld [vmem:[%s3397_s1 + $0x140] sm:$0xff] (!%p170_p2)  }
   0xb   : > { %2439 = vmatpush3.bf16.msra.mxu1 (!%p170_p2), %v2743_v2  ;;  %v2764_v29 = vld [vmem:[%s3397_s1 + $0x8] sm:$0xff] (!%p170_p2)   ;;  %v2766_v36 = vld [vmem:[%s3397_s1 + $0x10] sm:$0xff] (!%p170_p2)   ;;  %v2768_v43 = vld [vmem:[%s3397_s1 + $0x18] sm:$0xff] (!%p170_p2)  }
   0xc   : > { %2535 = vmatpush3.bf16.msra.mxu0 (!%p170_p2), %v2744_v3  ;;  %2440 = vmatprep.subr.bf16.mxu1 (!%p170_p2), %v2745_v4  ;;  %v2765_v31 = vld [vmem:[%s3397_s1 + $0x148] sm:$0xff] (!%p170_p2)   ;;  %v2767_v38 = vld [vmem:[%s3397_s1 + $0x150] sm:$0xff] (!%p170_p2)   ;;  %v2769_v44 = vld [vmem:[%s3397_s1 + $0x158] sm:$0xff] (!%p170_p2)  }
   0xd   : > { %s3404_s19 = smov (!%p203_p3, %s2052_s19), 7  ;;  %2536 = vmatprep.subr.bf16.mxu0 %v2746_v5  ;;  %v2770_v46 = vld [vmem:[%s3397_s1 + $0x20] sm:$0xff]   ;;  %v2772_v60 = vld [vmem:[%s3397_s1 + $0x28] sm:$0xff]   ;;  %vm3038_vm2 = vmor %vm556_vm0, %vm557_vm1  ;;  %s3406_s16 = smov (!%p209_p4, %s2876_s16), 1 }
   0xe   : > { %s2732_s8 = smul.u32 72, %s3404_s19  ;;  %v2771_v49 = vld [vmem:[%s3397_s1 + $0x160] sm:$0xff]   ;;  %v2773_v0 = vld [vmem:[%s3397_s1 + $0x168] sm:$0xff]   ;;  %s2327_s26 = sshll.u32 %s3406_s16, 6 }
   0xf   : > { %2441 = vmatpush3.bf16.msra.mxu1 %v2745_v4  ;;  %s213_s29 = scalar_lea.vmem %s3398_s2, %s2327_s26  ;;  %s216_s6 = scalar_lea.vmem %s3399_s3, %s3406_s16 }
  0x10   : > { %2537 = vmatpush3.bf16.msra.mxu0 %v2746_v5  ;;  %2442 = vmatprep.subr.bf16.mxu1 %v2747_v6  ;;  %s2914_s17 = scalar_lea.vmem %s3396_s0, %s2732_s8  ;;  %s219_s9 = scalar_lea.vmem %s3400_s4, %s3406_s16 }
  0x11   : > { %2538 = vmatprep.subr.bf16.mxu0 %v2748_v7  ;;  %v2056_v11 = vld [vmem:[%s2914_s17 + $0x48] sm:$0xf]  ;;  %v2921_v12 = vld [vmem:[%s2914_s17 + $0x50] sm:$0xf]  ;;  %v2924_v13 = vld [vmem:[%s2914_s17 + $0x58] sm:$0xf] }
  0x12   : > { %v2081_v15 = vcombine.low %v2056_v11, %v2921_v12  ;;  %v2285_v16 = vcombine.low %v2921_v12, %v2924_v13  ;;  %v2760_v17 = vld [vmem:[%s2914_s17 + $0xd8] ss:$8 sps:$4 sm:$0xff]   ;;  %v2763_v26 = vld [vmem:[%s2914_s17 + $0xe8] ss:$8 sps:$4 sm:$0xff]   ;;  %v2134_v48 = vld [vmem:[%s2914_s17 + $0x94] sm:$0x1] }
  0x13   : > { %2443 = vmatpush3.bf16.msra.mxu1 %v2747_v6  ;;  %2548 = vmatprep.mubr.bf16.mxu0 %v2760_v17  ;;  %v2946_v22 = vld [vmem:[%s2914_s17 + $0x60] sm:$0xf]  ;;  %v2958_v27 = vld [vmem:[%s2914_s17 + $0x68] sm:$0xf]  ;;  %v2961_v28 = vld [vmem:[%s2914_s17 + $0x70] sm:$0xf] }
  0x14   : > { %2539 = vmatpush3.bf16.msra.mxu0 %v2748_v7  ;;  %2444 = vmatprep.subr.bf16.mxu1 %v2749_v8  ;;  %v2082_v25 = vcombine.low %v2924_v13, %v2946_v22  ;;  %v2286_v30 = vcombine.low %v2946_v22, %v2958_v27  ;;  %v2083_v32 = vcombine.low %v2958_v27, %v2961_v28  ;;  %v2777_v33 = vld [vmem:[%s2914_s17 + $0xf8] ss:$8 sps:$4 sm:$0xff]   ;;  %v2780_v41 = vld [vmem:[%s2914_s17 + $0x108] ss:$8 sps:$4 sm:$0xff]   ;;  %v2136_v51 = vld [vmem:[%s2914_s17 + $0x9c] sm:$0x1] }
  0x15   : > { %2540 = vmatprep.subr.bf16.mxu0 %v2750_v9  ;;  %2452 = vmatprep.mubr.bf16.mxu1 %v2081_v15  ;;  %v2975_v34 = vld [vmem:[%s2914_s17 + $0x78] sm:$0xf]  ;;  %v2978_v35 = vld [vmem:[%s2914_s17 + $0x80] sm:$0xf]  ;;  %v2995_v42 = vld [vmem:[%s2914_s17 + $0x8] sm:$0xf] }
  0x16   : > { %v2287_v37 = vcombine.low %v2961_v28, %v2975_v34  ;;  %v2084_v39 = vcombine.low %v2975_v34, %v2978_v35  ;;  %v2991_v40 = vld [vmem:[%s2914_s17] sm:$0xf]  ;;  %v3009_v47 = vld [vmem:[%s2914_s17 + $0x90] sm:$0xf]  ;;  %v3016_v50 = vld [vmem:[%s2914_s17 + $0x98] sm:$0xf] }
  0x17   : > { %2445 = vmatpush3.bf16.msra.mxu1 %v2749_v8  ;;  %v2093_v45 = vcombine.low %v2991_v40, %v2995_v42  ;;  %v1176_v52 = vshrl.u32 %v3009_v47, 16  ;;  %v1179_v53 = vshll.u32 %v3009_v47, 16  ;;  %v1185_v54 = vshll.u32 %v2134_v48, 16  ;;  %v3032_v4 = vld [vmem:[%s2914_s17 + $0xa0] sm:$0xf]  ;;  %v2818_v12 = vld [vmem:[%s3397_s1 + $0xf0] sm:$0xff]  }
  0x18   : > { %2541 = vmatpush3.bf16.msra.mxu0 %v2750_v9  ;;  %2446 = vmatprep.subr.bf16.mxu1 %v2751_v10  ;;  %v1190_v55 = vshrl.u32 %v3016_v50, 16  ;;  %v1193_v56 = vshll.u32 %v3016_v50, 16  ;;  %v1199_v57 = vshll.u32 %v2136_v51, 16  ;;  %v560_v61 = vshrl.u32 %v2991_v40, 16  ;;  %v2138_v5 = vld [vmem:[%s2914_s17 + $0xa4] sm:$0x1] }
  0x19   : > { %2542 = vmatprep.subr.bf16.mxu0 %v2752_v14  ;;  %v1178_v58 = vrot.slane %v1176_v52, 4  ;;  %v1181_v59 = vrot.slane %v1179_v53, 5  ;;  %v563_v1 = vshll.u32 %v2991_v40, 16  ;;  %v1187_v3 = vrot.slane %v1185_v54, 5  ;;  %v2140_v11 = vld [vmem:[%s2914_s17 + $0xac] sm:$0x1] }
  0x1a   : > { %v1192_v62 = vrot.slane %v1190_v55, 4  ;;  %v1195_v63 = vrot.slane %v1193_v56, 5  ;;  %v574_v6 = vshrl.u32 %v2995_v42, 16  ;;  %v1201_v9 = vrot.slane %v1199_v57, 5  ;;  %v2782_v51 = vld [vmem:[%s3397_s1 + $0x178] sm:$0xff]   ;;  %v2820_v13 = vld [vmem:[%s3397_s1 + $0x1f0] sm:$0xff]  }
  0x1b   : > { %2447 = vmatpush3.bf16.msra.mxu1 %v2751_v10  ;;  %v1182_v2 = vor.u32 %v1181_v59, %v1178_v58  ;;  %v3043_v10 = vld [vmem:[%s2914_s17 + $0xa8] sm:$0xf]  ;;  %v1204_v17 = vshrl.u32 %v3032_v4, 16  ;;  %v565_v40 = vrot.slane %v563_v1, 5  ;;  %v3070_v56 = vld [vmem:[%s2914_s17 + $0x10] sm:$0xf] }
  0x1c   : > { %2543 = vmatpush3.bf16.msra.mxu0 %v2752_v14  ;;  %2448 = vmatprep.subr.bf16.mxu1 %v2753_v18  ;;  %v1196_v8 = vor.u32 %v1195_v63, %v1192_v62  ;;  %v577_v14 = vshll.u32 %v2995_v42, 16  ;;  %v576_v48 = vrot.slane %v574_v6, 4  ;;  %v3073_v57 = vld [vmem:[%s2914_s17 + $0x18] sm:$0xf]  ;;  %v2784_v59 = vld [vmem:[%s3397_s1 + $0x80] sm:$0xff]   ;;  %v591_v63 = vshll.u32 %v3070_v56, 16 }
  0x1d   : > { %2544 = vmatprep.subr.bf16.mxu0 %v2754_v19  ;;  %v1183_v15 = vrot.slane %v1182_v2, 4  ;;  %v2785_v62 = vld [vmem:[%s3397_s1 + $0x180] sm:$0xff]   ;;  %v602_v6 = vshrl.u32 %v3073_v57, 16  ;;  %v2832_v27 = vld [vmem:[%s3397_s1 + $0x218] sm:$0xff]  }
  0x1e   : > { %v3088_v2 = vld [vmem:[%s2914_s17 + $0x20] sm:$0xf] }
  0x1f   : > { %2449 = vmatpush3.bf16.msra.mxu1 %v2753_v18  ;;  %v1207_v18 = vshll.u32 %v3032_v4, 16 }
  0x20   : > { %2545 = vmatpush3.bf16.msra.mxu0 %v2754_v19  ;;  %2450 = vmatprep.subr.bf16.mxu1 %v2755_v20  ;;  %v1197_v19 = vrot.slane %v1196_v8, 4  ;;  %v605_v8 = vshll.u32 %v3073_v57, 16 }
  0x21   : > { %2546 = vmatprep.subr.bf16.mxu0 %v2756_v21 }
  0x23   : > { %2451 = vmatpush3.bf16.msra.mxu1 %v2755_v20  ;;  %v1213_v20 = vshll.u32 %v2138_v5, 16  ;;  %v2094_v5 = vcombine.low %v3070_v56, %v3073_v57 }
  0x24   : > { %2547 = vmatpush3.bf16.msra.mxu0 %v2756_v21  ;;  %2460 = vmatprep.subr.bf16.mxu1 %v2759_v23  ;;  %v1218_v21 = vshrl.u32 %v3043_v10, 16 }
  0x25   : > { %2556 = vmatprep.subr.bf16.mxu0 %v2761_v24  ;;  %v1215_v52 = vrot.slane %v1213_v20, 5 }
  0x26   : > { %2453 = vmatmul.mubr.bf16.vlgmr.msra.gmra.mrb[0].mxu1 %v2082_v25  ;;  %v1206_v25 = vrot.slane %v1204_v17, 4  ;;  %v3106_v17 = vld [vmem:[%s2914_s17 + $0xb0] sm:$0xf] }
  0x27   : > { %2461 = vmatpush3.bf16.msra.mxu1 %v2759_v23  ;;  %2549 = vmatmul.mubr.bf16.vlgmr.msra.gmra.mrb[0].mxu0 %v2763_v26  ;;  %v1221_v23 = vshll.u32 %v3043_v10, 16  ;;  %v1209_v26 = vrot.slane %v1207_v18, 5  ;;  %v2142_v18 = vld [vmem:[%s2914_s17 + $0xb4] sm:$0x1] }
  0x28   : > { %2557 = vmatpush3.bf16.msra.mxu0 %v2761_v24  ;;  %2462 = vmatprep.subr.bf16.mxu1 %v2764_v29  ;;  %v1188_v24 = vsel %vm3038_vm2, %v1183_v15, %v1187_v3  ;;  %v3091_v3 = vld [vmem:[%s2914_s17 + $0x28] sm:$0xf] }
  0x29   : > { %2558 = vmatprep.subr.bf16.mxu0 %v2765_v31  ;;  %2456 = vmatprep.mubr.bf16.mxu1 %v2083_v32  ;;  %v562_v32 = vrot.slane %v560_v61, 4  ;;  %v2788_v15 = vld [vmem:[%s3397_s1 + $0x188] sm:$0xff]  }
  0x2a   : > { %2552 = vmatprep.mubr.bf16.mxu0 %v2777_v33  ;;  %v1202_v33 = vsel %vm3038_vm2, %v1197_v19, %v1201_v9  ;;  %v2787_v9 = vld [vmem:[%s3397_s1 + $0x88] sm:$0xff]  }
  0x2b   : > { %2463 = vmatpush3.bf16.msra.mxu1 %v2764_v29  ;;  %v1227_v29 = vshll.u32 %v2140_v11, 16  ;;  %v566_v58 = vor.u32 %v565_v40, %v562_v32  ;;  %v3127_v40 = vld [vmem:[%s2914_s17 + $0x30] sm:$0xf] }
  0x2c   : > { %2559 = vmatpush3.bf16.msra.mxu0 %v2765_v31  ;;  %2464 = vmatprep.subr.bf16.mxu1 %v2766_v36  ;;  %v2776_v31 = vld [vmem:[%s3397_s1 + $0x30] sm:$0xff]  }
  0x2d   : > { %2560 = vmatprep.subr.bf16.mxu0 %v2767_v38  ;;  %v1229_v53 = vrot.slane %v1227_v29, 5  ;;  %v3100_v11 = vrot.slane %v566_v58, 4  ;;  %v1241_v29 = vshll.u32 %v2142_v18, 16  ;;  %v3145_v58 = vrot.slane %v605_v8, 5 }
  0x2e   : > { %2457 = vmatmul.mubr.bf16.gmra.mrb[4].mxu1 %v2084_v39  ;;  %v2778_v39 = vld [vmem:[%s3397_s1 + $0x170] sm:$0xff]  }
  0x2f   : > { %2465 = vmatpush3.bf16.msra.mxu1 %v2766_v36  ;;  %2553 = vmatmul.mubr.bf16.gmra.mrb[4].mxu0 %v2780_v41  ;;  %v1220_v36 = vrot.slane %v1218_v21, 4  ;;  %v2229_v41 = vcombine.low %v1188_v24, %v1202_v33  ;;  %v2095_v21 = vcombine.low %v3088_v2, %v3091_v3  ;;  %v2144_v24 = vld [vmem:[%s2914_s17 + $0xbc] sm:$0x1] }
  0x30   : > { %2561 = vmatpush3.bf16.msra.mxu0 %v2767_v38  ;;  %2466 = vmatprep.subr.bf16.mxu1 %v2768_v43  ;;  %v1223_v38 = vrot.slane %v1221_v23, 5  ;;  %v3116_v23 = vld [vmem:[%s2914_s17 + $0xb8] sm:$0xf]  ;;  %v1255_v33 = vshll.u32 %v2144_v24, 16 }
  0x31   : > { %2562 = vmatprep.subr.bf16.mxu0 %v2769_v44  ;;  %2476 = vmatprep.mubr.bf16.mxu1 %v2093_v45  ;;  %v2781_v45 = vld [vmem:[%s3397_s1 + $0x38] sm:$0xff]   ;;  %v1249_v32 = vshll.u32 %v3116_v23, 16 }
  0x32   : > { %2572 = vmatprep.mubr.bf16.mxu0 %v2229_v41  ;;  %v2167_v41 = vcombine.low %v3106_v17, %v3116_v23 }
  0x33   : > { %2467 = vmatpush3.bf16.msra.mxu1 %v2768_v43  ;;  %v1210_v43 = vor.u32 %v1209_v26, %v1206_v25  ;;  %v1232_v25 = vshrl.u32 %v3106_v17, 16  ;;  %v1235_v26 = vshll.u32 %v3106_v17, 16  ;;  %v2834_v17 = vld [vmem:[%s3397_s1 + $0x228] sm:$0xff]  }
  0x34   : > { %2563 = vmatpush3.bf16.msra.mxu0 %v2769_v44  ;;  %2468 = vmatprep.subr.bf16.mxu1 %v2770_v46  ;;  %v2166_v44 = vcombine.low %v3032_v4, %v3043_v10 }
  0x35   : > { %2564 = vmatprep.subr.bf16.mxu0 %v2771_v49  ;;  %v1211_v54 = vrot.slane %v1210_v43, 4  ;;  %v2790_v43 = vld [vmem:[%s3397_s1 + $0x190] sm:$0xff]  }
  0x37   : > { %2469 = vmatpush3.bf16.msra.mxu1 %v2770_v46  ;;  %v1224_v46 = vor.u32 %v1223_v38, %v1220_v36  ;;  %v2789_v36 = vld [vmem:[%s3397_s1 + $0x90] sm:$0xff]   ;;  %v1234_v38 = vrot.slane %v1232_v25, 4  ;;  %v2791_v25 = vld [vmem:[%s3397_s1 + $0x98] sm:$0xff]  }
  0x38   : > { %2565 = vmatpush3.bf16.msra.mxu0 %v2771_v49  ;;  %2470 = vmatprep.subr.bf16.mxu1 %v2772_v60  ;;  %v579_v49 = vrot.slane %v577_v14, 5 }
  0x39   : > { %2566 = vmatprep.subr.bf16.mxu0 %v2773_v0  ;;  %v1225_v55 = vrot.slane %v1224_v46, 4  ;;  %v1251_v46 = vrot.slane %v1249_v32, 5  ;;  %v2792_v32 = vld [vmem:[%s3397_s1 + $0x198] sm:$0xff]  }
  0x3a   : > { %v580_v61 = vor.u32 %v579_v49, %v576_v48  ;;  %v3135_v48 = vld [vmem:[%s2914_s17 + $0x38] sm:$0xf]  ;;  %v3137_v49 = vrot.slane %v591_v63, 5 }
  0x3b   : > { %2471 = vmatpush3.bf16.msra.mxu1 %v2772_v60  ;;  %v588_v60 = vshrl.u32 %v3070_v56, 16  ;;  %v1230_v1 = vsel %vm3038_vm2, %v1225_v55, %v1229_v53  ;;  %v1243_v53 = vrot.slane %v1241_v29, 5  ;;  %v2146_v55 = vld [vmem:[%s2914_s17 + $0xc4] sm:$0x1]  ;;  %v2096_v63 = vcombine.low %v3127_v40, %v3135_v48 }
  0x3c   : > { %2567 = vmatpush3.bf16.msra.mxu0 %v2773_v0  ;;  %2472 = vmatprep.subr.bf16.mxu1 %v2776_v31  ;;  %v1216_v0 = vsel %vm3038_vm2, %v1211_v54, %v1215_v52  ;;  %v3109_v19 = vrot.slane %v580_v61, 4  ;;  %v3142_v54 = vld [vmem:[%s2914_s17 + $0xc0] sm:$0xf]  ;;  %v1257_v61 = vrot.slane %v1255_v33, 5 }
  0x3d   : > { %2568 = vmatprep.subr.bf16.mxu0 %v2778_v39  ;;  %v2230_v14 = vcombine.low %v1216_v0, %v1230_v1  ;;  %v3111_v20 = vrot.slane %v588_v60, 4  ;;  %v3151_v0 = vld [vmem:[%s2914_s17 + $0xc8] sm:$0xf] }
  0x3e   : > { %v1274_v18 = vshrl.u32 %v3151_v0, 16 }
  0x3f   : > { %2473 = vmatpush3.bf16.msra.mxu1 %v2776_v31  ;;  %v1246_v31 = vshrl.u32 %v3116_v23, 16 }
  0x40   : > { %2569 = vmatpush3.bf16.msra.mxu0 %v2778_v39  ;;  %2474 = vmatprep.subr.bf16.mxu1 %v2781_v45  ;;  %v1237_v39 = vrot.slane %v1235_v26, 5  ;;  %v619_v26 = vshll.u32 %v3088_v2, 16 }
  0x41   : > { %2570 = vmatprep.subr.bf16.mxu0 %v2782_v51 }
  0x42   : > { %v1238_v52 = vor.u32 %v1237_v39, %v1234_v38  ;;  %v1276_v38 = vrot.slane %v1274_v18, 4 }
  0x43   : > { %2475 = vmatpush3.bf16.msra.mxu1 %v2781_v45  ;;  %v1248_v45 = vrot.slane %v1246_v31, 4 }
  0x44   : > { %2571 = vmatpush3.bf16.msra.mxu0 %v2782_v51  ;;  %2484 = vmatprep.subr.bf16.mxu1 %v2784_v59  ;;  %v3139_v51 = vrot.slane %v602_v6, 4  ;;  %v1239_v1 = vrot.slane %v1238_v52, 4  ;;  %v1263_v6 = vshll.u32 %v3142_v54, 16  ;;  %v222_v52 = vld [vmem:[%s2914_s17 + $0x4] sm:$0x1] }
  0x45   : > { %2580 = vmatprep.subr.bf16.mxu0 %v2785_v62  ;;  %v1252_v60 = vor.u32 %v1251_v46, %v1248_v45 }
  0x46   : > { %2477 = vmatmul.mubr.bf16.vlgmr.msra.gmra.mrb[0].mxu1 %v2094_v5  ;;  %v1260_v5 = vshrl.u32 %v3142_v54, 16  ;;  %v1244_v29 = vsel %vm3038_vm2, %v1239_v1, %v1243_v53  ;;  %v1265_v31 = vrot.slane %v1263_v6, 5  ;;  %v2168_v53 = vcombine.low %v3142_v54, %v3151_v0  ;;  %v2835_v54 = vld [vmem:[%s3397_s1 + $0x230] sm:$0xff]  }
  0x47   : > { %2485 = vmatpush3.bf16.msra.mxu1 %v2784_v59  ;;  %2573 = vmatmul.mubr.bf16.vlgmr.msra.gmra.mrb[0].mxu0 %v2230_v14  ;;  %v616_v59 = vshrl.u32 %v3088_v2, 16  ;;  %v1269_v14 = vshll.u32 %v2146_v55, 16  ;;  %v1253_v8 = vrot.slane %v1252_v60, 4  ;;  %v224_v55 = vld [vmem:[%s2914_s17 + $0xc] sm:$0x1]  ;;  %v2793_v60 = vld [vmem:[%s3397_s1 + $0xa0] sm:$0xff]  }
  0x48   : > { %2581 = vmatpush3.bf16.msra.mxu0 %v2785_v62  ;;  %2486 = vmatprep.subr.bf16.mxu1 %v2787_v9  ;;  %v2148_v62 = vld [vmem:[%s2914_s17 + $0xcc] sm:$0x1] }
  0x49   : > { %2582 = vmatprep.subr.bf16.mxu0 %v2788_v15  ;;  %2480 = vmatprep.mubr.bf16.mxu1 %v2095_v21  ;;  %v1277_v21 = vshll.u32 %v3151_v0, 16  ;;  %v1283_v24 = vshll.u32 %v2148_v62, 16  ;;  %v1271_v33 = vrot.slane %v1269_v14, 5  ;;  %v633_v14 = vshll.u32 %v3091_v3, 16 }
  0x4b   : > { %2487 = vmatpush3.bf16.msra.mxu1 %v2787_v9  ;;  %v1262_v9 = vrot.slane %v1260_v5, 4  ;;  %v1279_v39 = vrot.slane %v1277_v21, 5  ;;  %v1285_v1 = vrot.slane %v1283_v24, 5  ;;  %v569_v5 = vshll.u32 %v222_v52, 16  ;;  %v2795_v24 = vld [vmem:[%s3397_s1 + $0xa8] sm:$0xff]  }
  0x4c   : > { %2583 = vmatpush3.bf16.msra.mxu0 %v2788_v15  ;;  %2488 = vmatprep.subr.bf16.mxu1 %v2789_v36  ;;  %v1258_v15 = vsel %vm3038_vm2, %v1253_v8, %v1257_v61  ;;  %v583_v61 = vshll.u32 %v224_v55, 16  ;;  %v618_v52 = vrot.slane %v616_v59, 4  ;;  %v2801_v59 = vld [vmem:[%s3397_s1 + $0xb8] sm:$0xff]  }
  0x4d   : > { %2584 = vmatprep.subr.bf16.mxu0 %v2790_v43  ;;  %v2231_v45 = vcombine.low %v1244_v29, %v1258_v15  ;;  %v1266_v46 = vor.u32 %v1265_v31, %v1262_v9  ;;  %v1280_v62 = vor.u32 %v1279_v39, %v1276_v38  ;;  %v571_v18 = vrot.slane %v569_v5, 5  ;;  %v226_v9 = vld [vmem:[%s2914_s17 + $0x14] sm:$0x1]  ;;  %v228_v31 = vld [vmem:[%s2914_s17 + $0x1c] sm:$0x1]  ;;  %v2796_v39 = vld [vmem:[%s3397_s1 + $0x1a8] sm:$0xff]  }
  0x4e   : > { %2481 = vmatmul.mubr.bf16.gmra.mrb[4].mxu1 %v2096_v63  ;;  %v630_v63 = vshrl.u32 %v3091_v3, 16  ;;  %v585_v21 = vrot.slane %v583_v61, 5  ;;  %v2257_v29 = vcombine.low %v2995_v42, %v3070_v56  ;;  %v594_v15 = vor.u32 %v3137_v49, %v3111_v20 }
  0x4f   : > { %2489 = vmatpush3.bf16.msra.mxu1 %v2789_v36  ;;  %v1267_v6 = vrot.slane %v1266_v46, 4  ;;  %v2794_v36 = vld [vmem:[%s3397_s1 + $0x1a0] sm:$0xff]   ;;  %2576 = vmatprep.mubr.bf16.mxu0 %v2231_v45  ;;  %v1281_v8 = vrot.slane %v1280_v62, 4  ;;  %v608_v38 = vor.u32 %v3145_v58, %v3139_v51  ;;  %v644_v45 = vshrl.u32 %v3127_v40, 16 }
  0x50   : > { %2585 = vmatpush3.bf16.msra.mxu0 %v2790_v43  ;;  %2490 = vmatprep.subr.bf16.mxu1 %v2791_v25  ;;  %v572_v42 = vsel %vm3038_vm2, %v3100_v11, %v571_v18  ;;  %v3206_v56 = vsel %vm3038_vm2, %v3109_v19, %v585_v21  ;;  %v647_v20 = vshll.u32 %v3127_v40, 16  ;;  %v658_v49 = vshrl.u32 %v3135_v48, 16  ;;  %v2798_v11 = vld [vmem:[%s3397_s1 + $0xb0] sm:$0xff]  }
  0x51   : > { %2586 = vmatprep.subr.bf16.mxu0 %v2792_v32  ;;  %v1272_v43 = vsel %vm3038_vm2, %v1267_v6, %v1271_v33  ;;  %v1286_v33 = vsel %vm3038_vm2, %v1281_v8, %v1285_v1  ;;  %v2121_v58 = vcombine.low %v572_v42, %v3206_v56  ;;  %v611_v46 = vshll.u32 %v228_v31, 16  ;;  %v2799_v19 = vld [vmem:[%s3397_s1 + $0x1b0] sm:$0xff]  }
  0x52   : > { %v2232_v51 = vcombine.low %v1272_v43, %v1286_v33  ;;  %v609_v55 = vrot.slane %v608_v38, 4  ;;  %v621_v62 = vrot.slane %v619_v26, 5  ;;  %v635_v6 = vrot.slane %v633_v14, 5  ;;  %v2802_v26 = vld [vmem:[%s3397_s1 + $0x1b8] sm:$0xff]  }
  0x53   : > { %2491 = vmatpush3.bf16.msra.mxu1 %v2791_v25  ;;  %v597_v25 = vshll.u32 %v226_v9, 16  ;;  %2500 = vmatprep.mubr.bf16.mxu1 %v2121_v58  ;;  %v613_v5 = vrot.slane %v611_v46, 5  ;;  %v661_v8 = vshll.u32 %v3135_v48, 16  ;;  %v646_v21 = vrot.slane %v644_v45, 4  ;;  %v236_v9 = vld [vmem:[%s2914_s17 + $0x3c] sm:$0x1] }
  0x54   : > { %2587 = vmatpush3.bf16.msra.mxu0 %v2792_v32  ;;  %2492 = vmatprep.subr.bf16.mxu1 %v2793_v60  ;;  %v595_v32 = vrot.slane %v594_v15, 4  ;;  %v622_v61 = vor.u32 %v621_v62, %v618_v52  ;;  %v2803_v58 = vld [vmem:[%s3397_s1 + $0xc0] sm:$0xff]  }
  0x55   : > { %2588 = vmatprep.subr.bf16.mxu0 %v2794_v36  ;;  %2577 = vmatmul.mubr.bf16.gmra.mrb[4].mxu0 %v2232_v51  ;;  %v599_v1 = vrot.slane %v597_v25, 5  ;;  %v3238_v31 = vsel %vm3038_vm2, %v609_v55, %v613_v5  ;;  %v660_v51 = vrot.slane %v658_v49, 4  ;;  %v663_v46 = vrot.slane %v661_v8, 5  ;;  %v2805_v52 = vld [vmem:[%s3397_s1 + $0x1c0] sm:$0xff]   ;;  %v2807_v5 = vld [vmem:[%s3397_s1 + $0xc8] sm:$0xff]  }
  0x56   : > { %2596 = vmatprep.mubr.bf16.mxu0 %v2257_v29  ;;  %v234_v29 = vld [vmem:[%s2914_s17 + $0x34] sm:$0x1]  ;;  %v623_v15 = vrot.slane %v622_v61, 4  ;;  %v2258_v55 = vcombine.low %v3073_v57, %v3088_v2  ;;  %v2259_v57 = vcombine.low %v3091_v3, %v3127_v40 }
  0x57   : > { %2493 = vmatpush3.bf16.msra.mxu1 %v2793_v60  ;;  %v632_v60 = vrot.slane %v630_v63, 4  ;;  %v232_v63 = vld [vmem:[%s2914_s17 + $0x2c] sm:$0x1]  ;;  %v3232_v14 = vsel %vm3038_vm2, %v595_v32, %v599_v1  ;;  %v653_v45 = vshll.u32 %v234_v29, 16  ;;  %v667_v32 = vshll.u32 %v236_v9, 16  ;;  %v2809_v2 = vld [vmem:[%s3397_s1 + $0xd0] sm:$0xff]  }
  0x58   : > { %2589 = vmatpush3.bf16.msra.mxu0 %v2794_v36  ;;  %2494 = vmatprep.subr.bf16.mxu1 %v2795_v24  ;;  %v230_v36 = vld [vmem:[%s2914_s17 + $0x24] sm:$0x1]  ;;  %v639_v43 = vshll.u32 %v232_v63, 16  ;;  %v2810_v3 = vld [vmem:[%s3397_s1 + $0x1d0] sm:$0xff]   ;;  %v2822_v29 = vld [vmem:[%s3397_s1 + $0x1f8] sm:$0xff]  }
  0x59   : > { %2590 = vmatprep.subr.bf16.mxu0 %v2796_v39  ;;  %v636_v18 = vor.u32 %v635_v6, %v632_v60  ;;  %v655_v1 = vrot.slane %v653_v45, 5  ;;  %v669_v60 = vrot.slane %v667_v32, 5  ;;  %v2808_v6 = vld [vmem:[%s3397_s1 + $0x1c8] sm:$0xff]   ;;  %v2825_v9 = vld [vmem:[%s3397_s1 + $0x200] sm:$0xff]  }
  0x5a   : > { %v641_v42 = vrot.slane %v639_v43, 5  ;;  %v2814_v43 = vld [vmem:[%s3397_s1 + $0x1e0] sm:$0xff]  }
  0x5b   : > { %2495 = vmatpush3.bf16.msra.mxu1 %v2795_v24  ;;  %v625_v24 = vshll.u32 %v230_v36, 16  ;;  %v637_v38 = vrot.slane %v636_v18, 4  ;;  %v3280_v36 = vld [vmem:[%s2914_s17 + $0x40] sm:$0xf]  ;;  %v2811_v18 = vld [vmem:[%s3397_s1 + $0xd8] sm:$0xff]  }
  0x5c   : > { %2591 = vmatpush3.bf16.msra.mxu0 %v2796_v39  ;;  %2496 = vmatprep.subr.bf16.mxu1 %v2798_v11  ;;  %v649_v39 = vrot.slane %v647_v20, 5  ;;  %v2122_v20 = vcombine.low %v3232_v14, %v3238_v31  ;;  %v2260_v63 = vcombine.low %v3135_v48, %v3280_v36  ;;  %v2813_v48 = vld [vmem:[%s3397_s1 + $0xe0] sm:$0xff]   ;;  %v1738_v34 = vshrl.u32 %v3280_v36, 16 }
  0x5d   : > { %2592 = vmatprep.subr.bf16.mxu0 %v2799_v19  ;;  %v627_v33 = vrot.slane %v625_v24, 5  ;;  %v2165_v24 = vcombine.low %v3009_v47, %v3016_v50  ;;  %v2815_v47 = vld [vmem:[%s3397_s1 + $0xe8] sm:$0xff]  }
  0x5e   : > { %v650_v25 = vor.u32 %v649_v39, %v646_v21  ;;  %v2812_v21 = vld [vmem:[%s3397_s1 + $0x1d8] sm:$0xff]   ;;  %v2816_v50 = vld [vmem:[%s3397_s1 + $0x1e8] sm:$0xff]   ;;  %v2831_v39 = vld [vmem:[%s3397_s1 + $0x210] sm:$0xff]   ;;  %v1740_v4 = vrot.slane %v1738_v34, 4 }
  0x5f   : > { %2497 = vmatpush3.bf16.msra.mxu1 %v2798_v11  ;;  %v3250_v49 = vsel %vm3038_vm2, %v623_v15, %v627_v33  ;;  %v3254_v11 = vsel %vm3038_vm2, %v637_v38, %v641_v42  ;;  %v2826_v15 = vld [vmem:[%s3397_s1 + $0x208] sm:$0xff]  }
  0x60   : > { %2593 = vmatpush3.bf16.msra.mxu0 %v2799_v19  ;;  %2498 = vmatprep.subr.bf16.mxu1 %v2801_v59  ;;  %v664_v19 = vor.u32 %v663_v46, %v660_v51  ;;  %v651_v62 = vrot.slane %v650_v25, 4  ;;  %v2123_v8 = vcombine.low %v3250_v49, %v3254_v11  ;;  %v2064_v38 = vld [vmem:[%s2914_s17 + $0x88] sm:$0xf]  ;;  %v2314_v42 = vcombine.low %v3238_v31, %v3250_v49 }
  0x61   : > { %2594 = vmatprep.subr.bf16.mxu0 %v2802_v26  ;;  %v2288_v22 = vcombine.low %v2978_v35, %v2064_v38  ;;  %v1741_v35 = vshll.u32 %v3280_v36, 16 }
  0x62   : > { %v665_v61 = vrot.slane %v664_v19, 4 }
  0x63   : > { %2499 = vmatpush3.bf16.msra.mxu1 %v2801_v59  ;;  %v3273_v59 = vsel %vm3038_vm2, %v651_v62, %v655_v1  ;;  %v1743_v10 = vrot.slane %v1741_v35, 5 }
  0x64   : > { %2595 = vmatpush3.bf16.msra.mxu0 %v2802_v26  ;;  %2508 = vmatprep.subr.bf16.mxu1 %v2803_v58  ;;  %v3277_v26 = vsel %vm3038_vm2, %v665_v61, %v669_v60  ;;  %v2315_v28 = vcombine.low %v3254_v11, %v3273_v59 }
  0x65   : > { %2604 = vmatprep.subr.bf16.mxu0 %v2805_v52  ;;  %v2124_v40 = vcombine.low %v3273_v59, %v3277_v26  ;;  %v1744_v23 = vor.u32 %v1743_v10, %v1740_v4 }
  0x66   : > { %2501 = vmatmul.mubr.bf16.vlgmr.msra.gmra.mrb[0].mxu1 %v2122_v20 }
  0x67   : > { %2509 = vmatpush3.bf16.msra.mxu1 %v2803_v58  ;;  %2597 = vmatmul.mubr.bf16.vlgmr.msra.gmra.mrb[0].mxu0 %v2258_v55  ;;  %v1745_v0 = vrot.slane %v1744_v23, 4 }
  0x68   : > { %2605 = vmatpush3.bf16.msra.mxu0 %v2805_v52  ;;  %2510 = vmatprep.subr.bf16.mxu1 %v2807_v5 }
  0x69   : > { %2606 = vmatprep.subr.bf16.mxu0 %v2808_v6  ;;  %2504 = vmatprep.mubr.bf16.mxu1 %v2123_v8 }
  0x6a   : > { %2600 = vmatprep.mubr.bf16.mxu0 %v2259_v57 }
  0x6b   : > { %2511 = vmatpush3.bf16.msra.mxu1 %v2807_v5 }
  0x6c   : > { %2607 = vmatpush3.bf16.msra.mxu0 %v2808_v6  ;;  %2512 = vmatprep.subr.bf16.mxu1 %v2809_v2 }
  0x6d   : > { %2608 = vmatprep.subr.bf16.mxu0 %v2810_v3 }
  0x6e   : > { %2505 = vmatmul.mubr.bf16.gmra.mrb[4].mxu1 %v2124_v40 }
  0x6f   : > { %2513 = vmatpush3.bf16.msra.mxu1 %v2809_v2  ;;  %2601 = vmatmul.mubr.bf16.gmra.mrb[4].mxu0 %v2260_v63 }
  0x70   : > { %2609 = vmatpush3.bf16.msra.mxu0 %v2810_v3  ;;  %2514 = vmatprep.subr.bf16.mxu1 %v2811_v18 }
  0x71   : > { %2610 = vmatprep.subr.bf16.mxu0 %v2812_v21  ;;  %2524 = vmatprep.mubr.bf16.mxu1 %v2165_v24 }
  0x72   : > { %2620 = vmatprep.mubr.bf16.mxu0 %v2285_v16  ;;  %v2821_v16 = vld [vmem:[%s3397_s1 + $0xf8] sm:$0xff]  }
  0x73   : > { %2515 = vmatpush3.bf16.msra.mxu1 %v2811_v18 }
  0x74   : > { %2611 = vmatpush3.bf16.msra.mxu0 %v2812_v21  ;;  %2516 = vmatprep.subr.bf16.mxu1 %v2813_v48 }
  0x75   : > { %2612 = vmatprep.subr.bf16.mxu0 %v2814_v43 }
  0x77   : > { %2517 = vmatpush3.bf16.msra.mxu1 %v2813_v48 }
  0x78   : > { %2613 = vmatpush3.bf16.msra.mxu0 %v2814_v43  ;;  %2518 = vmatprep.subr.bf16.mxu1 %v2815_v47 }
  0x79   : > { %2614 = vmatprep.subr.bf16.mxu0 %v2816_v50 }
  0x7b   : > { %2519 = vmatpush3.bf16.msra.mxu1 %v2815_v47 }
  0x7c   : > { %2615 = vmatpush3.bf16.msra.mxu0 %v2816_v50  ;;  %2520 = vmatprep.subr.bf16.mxu1 %v2818_v12 }
  0x7d   : > { %2616 = vmatprep.subr.bf16.mxu0 %v2820_v13 }
  0x7f   : > { %2521 = vmatpush3.bf16.msra.mxu1 %v2818_v12 }
  0x80   : > { %2617 = vmatpush3.bf16.msra.mxu0 %v2820_v13  ;;  %2522 = vmatprep.subr.bf16.mxu1 %v2821_v16 }
  0x81   : > { %2618 = vmatprep.subr.bf16.mxu0 %v2822_v29 }
  0x83   : > { %2523 = vmatpush3.bf16.msra.mxu1 %v2821_v16 }
  0x84   : > { %2619 = vmatpush3.bf16.msra.mxu0 %v2822_v29  ;;  %2652 = vmatprep.subr.bf16.mxu1 %v2825_v9 }
  0x85   : > { %2628 = vmatprep.subr.bf16.mxu0 %v2825_v9 }
  0x86   : > { %2525 = vmatmul.mubr.bf16.vlgmr.msra.gmra.mrb[0].mxu1 %v2166_v44  ;;  %v238_v44 = vld [vmem:[%s2914_s17 + $0x44] sm:$0x1] }
  0x87   : > { %2621 = vmatmul.mubr.bf16.vlgmr.msra.gmra.mrb[0].mxu0 %v2286_v30  ;;  %2660 = vmatpush3.bf16.msra.mxu1 %v2825_v9  ;;  %v2313_v30 = vcombine.low %v3206_v56, %v3232_v14  ;;  %v2836_v56 = vld [vmem:[%s3397_s1 + $0x238] sm:$0xff]  }
  0x88   : > { %2629 = vmatpush3.bf16.msra.mxu0 %v2825_v9  ;;  %2653 = vmatprep.subr.bf16.mxu1 %v2826_v15 }
  0x89   : > { %2630 = vmatprep.subr.bf16.mxu0 %v2826_v15  ;;  %2528 = vmatprep.mubr.bf16.mxu1 %v2167_v41  ;;  %v1747_v41 = vshll.u32 %v238_v44, 16 }
  0x8a   : > { %2624 = vmatprep.mubr.bf16.mxu0 %v2287_v37  ;;  %v2833_v37 = vld [vmem:[%s3397_s1 + $0x220] sm:$0xff]  }
  0x8b   : > { %2661 = vmatpush3.bf16.msra.mxu1 %v2826_v15 }
  0x8c   : > { %2631 = vmatpush3.bf16.msra.mxu0 %v2826_v15  ;;  %2654 = vmatprep.subr.bf16.mxu1 %v2831_v39 }
  0x8d   : > { %2632 = vmatprep.subr.bf16.mxu0 %v2831_v39 }
  0x8e   : > { %2529 = vmatmul.mubr.bf16.gmra.mrb[4].mxu1 %v2168_v53  ;;  %v1749_v53 = vrot.slane %v1747_v41, 5 }
  0x8f   : > { %2625 = vmatmul.mubr.bf16.gmra.mrb[4].mxu0 %v2288_v22  ;;  %2662 = vmatpush3.bf16.msra.mxu1 %v2831_v39 }
  0x90   : > { %2633 = vmatpush3.bf16.msra.mxu0 %v2831_v39  ;;  %2655 = vmatprep.subr.bf16.mxu1 %v2832_v27  ;;  %v1750_v14 = vsel %vm3038_vm2, %v1745_v0, %v1749_v53 }
  0x91   : > { %2634 = vmatprep.subr.bf16.mxu0 %v2832_v27  ;;  %2644 = vmatprep.mubr.bf16.mxu0 %v2313_v30  ;;  %v2316_v33 = vcombine.low %v3277_v26, %v1750_v14 }
  0x92   : > { %2648 = vmatprep.mubr.bf16.mxu1 %v2315_v28 }
  0x93   : > { %2663 = vmatpush3.bf16.msra.mxu1 %v2832_v27 }
  0x94   : > { %2635 = vmatpush3.bf16.msra.mxu0 %v2832_v27  ;;  %2656 = vmatprep.subr.bf16.mxu1 %v2833_v37 }
  0x95   : > { %2636 = vmatprep.subr.bf16.mxu0 %v2833_v37 }
  0x97   : > { %2664 = vmatpush3.bf16.msra.mxu1 %v2833_v37 }
  0x98   : > { %2637 = vmatpush3.bf16.msra.mxu0 %v2833_v37  ;;  %2657 = vmatprep.subr.bf16.mxu1 %v2834_v17 }
  0x99   : > { %2638 = vmatprep.subr.bf16.mxu0 %v2834_v17 }
  0x9b   : > { %2665 = vmatpush3.bf16.msra.mxu1 %v2834_v17 }
  0x9c   : > { %2639 = vmatpush3.bf16.msra.mxu0 %v2834_v17  ;;  %2658 = vmatprep.subr.bf16.mxu1 %v2835_v54 }
  0x9d   : > { %2640 = vmatprep.subr.bf16.mxu0 %v2835_v54 }
  0x9f   : > { %2666 = vmatpush3.bf16.msra.mxu1 %v2835_v54 }
  0xa0   : > { %2641 = vmatpush3.bf16.msra.mxu0 %v2835_v54  ;;  %2659 = vmatprep.subr.bf16.mxu1 %v2836_v56 }
  0xa1   : > { %2642 = vmatprep.subr.bf16.mxu0 %v2836_v56 }
  0xa3   : > { %2667 = vmatpush3.bf16.msra.mxu1 %v2836_v56 }
  0xa4   : > { %2643 = vmatpush3.bf16.msra.mxu0 %v2836_v56 }
  0xa6   : > { %2649 = vmatmul.mubr.bf16.vlgmr.msra.gmra.mrb[8].mxu1 %v2316_v33 }
  0xa7   : > { %2645 = vmatmul.mubr.bf16.vlgmr.msra.gmra.mrb[0].mxu0 %v2314_v42 }
 0x159   : > { %v2526_v45 = vpop.f32.mrb[0].mxu1 }
 0x15a   : > { %v965_v51 = vpop.f32.mrb[1].mxu1 }
 0x15b   : > { %v2527_v58 = vpop.f32.mrb[2].mxu1 }
 0x15c   : > { %v968_v7 = vpop.f32.mrb[3].mxu1 }
 0x161   : > { %v2530_v25 = vpop.f32.mrb[4].mxu1 }
 0x162   : > { %v2626_v46 = vpop.f32.mrb[4].mxu0  ;;  %v981_v32 = vpop.f32.mrb[5].mxu1 }
 0x163   : > { %v2672_v52 = vadd.f32 %v2626_v46, %v2530_v25  ;;  %v1714_v20 = vpop.f32.mrb[5].mxu0  ;;  %v2531_v11 = vpop.f32.mrb[6].mxu1 }
 0x164   : > { %v2674_v19 = vadd.f32 %v1714_v20, %v981_v32  ;;  %v2627_v55 = vpop.f32.mrb[6].mxu0  ;;  %v984_v62 = vpop.f32.mrb[7].mxu1 }
 0x165   : > { %v2676_v31 = vadd.f32 %v2627_v55, %v2531_v11  ;;  %v1717_v49 = vpop.f32.mrb[7].mxu0 }
 0x166   : > { %v2678_v1 = vadd.f32 %v1717_v49, %v984_v62 }
 0x179   : > { %v2650_v60 = vpop.f32.mrb[8].mxu1 }
 0x17a   : > { %v2646_v5 = vpop.f32.mrb[0].mxu0  ;;  %v2673_v61 = vadd.f32 %v2672_v52, %v2650_v60  ;;  %v1875_v6 = vpop.f32.mrb[9].mxu1 }
 0x17b   : > { %v2668_v8 = vadd.f32 %v2646_v5, %v2526_v45  ;;  %v1859_v57 = vpop.f32.mrb[1].mxu0  ;;  %v2675_v2 = vadd.f32 %v2674_v19, %v1875_v6  ;;  %v2651_v59 = vpop.f32.mrb[10].mxu1 }
 0x17c   : > { %1904 = vst [vmem:[%s213_s29 + $0x30] sm:$0xff] %v2673_v61  ;;  %v2669_v26 = vadd.f32 %v1859_v57, %v965_v51  ;;  %v2647_v36 = vpop.f32.mrb[2].mxu0  ;;  %v2677_v3 = vadd.f32 %v2676_v31, %v2651_v59  ;;  %v1878_v40 = vpop.f32.mrb[11].mxu1  ;;  %v1926_v28 = vmul.f32 %v2673_v61, %v2673_v61 }
 0x17d   : > { %1900 = vst [vmem:[%s213_s29 + $0x10] sm:$0xff] %v2668_v8  ;;  %1902 = vst [vmem:[%s213_s29 + $0x20] sm:$0xff] %v2675_v2  ;;  %v2670_v63 = vadd.f32 %v2647_v36, %v2527_v58  ;;  %v1862_v18 = vpop.f32.mrb[3].mxu0  ;;  %v2679_v21 = vadd.f32 %v2678_v1, %v1878_v40  ;;  %v1922_v50 = vmul.f32 %v2668_v8, %v2668_v8 }
 0x17e   : > { %1898 = vst [vmem:[%s213_s29] sm:$0xff] %v2669_v26  ;;  %1905 = vst [vmem:[%s213_s29 + $0x38] sm:$0xff] %v2677_v3  ;;  %v2671_v24 = vadd.f32 %v1862_v18, %v968_v7  ;;  %v1920_v48 = vmul.f32 %v2669_v26, %v2669_v26  ;;  %v1924_v15 = vmul.f32 %v2675_v2, %v2675_v2 }
 0x17f   : > { %1901 = vst [vmem:[%s213_s29 + $0x18] sm:$0xff] %v2670_v63  ;;  %1903 = vst [vmem:[%s213_s29 + $0x28] sm:$0xff] %v2679_v21  ;;  %v1923_v16 = vmul.f32 %v2670_v63, %v2670_v63  ;;  %v1925_v27 = vmul.f32 %v2679_v21, %v2679_v21  ;;  %v1927_v37 = vmul.f32 %v2677_v3, %v2677_v3 }
 0x180   : > { %1899 = vst [vmem:[%s213_s29 + $0x8] sm:$0xff] %v2671_v24  ;;  %v1906_v43 = vadd.f32 %v2671_v24, %v2669_v26  ;;  %v1921_v47 = vmul.f32 %v2671_v24, %v2671_v24 }
 0x182   : > { %v1907_v12 = vadd.f32 %v2668_v8, %v1906_v43  ;;  %v1928_v13 = vadd.f32 %v1921_v47, %v1920_v48 }
 0x184   : > { %v1929_v29 = vadd.f32 %v1928_v13, %v1922_v50  ;;  %v1908_v9 = vadd.f32 %v2670_v63, %v1907_v12 }
 0x186   : > { %v1909_v38 = vadd.f32 %v2675_v2, %v1908_v9  ;;  %v1930_v39 = vadd.f32 %v1929_v29, %v1923_v16 }
 0x188   : > { %v1910_v22 = vadd.f32 %v2679_v21, %v1909_v38  ;;  %v1931_v30 = vadd.f32 %v1930_v39, %v1924_v15 }
 0x18a   : > { %v1911_v34 = vadd.f32 %v2673_v61, %v1910_v22  ;;  %v1932_v35 = vadd.f32 %v1931_v30, %v1925_v27 }
 0x18c   : > { %v1912_v4 = vadd.f32 %v2677_v3, %v1911_v34  ;;  %v1933_v10 = vadd.f32 %v1932_v35, %v1926_v28 }
 0x18e   : > { %v1913_v44 = vrot.slane %v1912_v4, 4  ;;  %v1934_v17 = vadd.f32 %v1933_v10, %v1927_v37 }
 0x190   : > { %v1914_v23 = vadd.f32 %v1913_v44, %v1912_v4  ;;  %v1935_v41 = vrot.slane %v1934_v17, 4 }
 0x192   : > { %v1915_v54 = vrot.slane %v1914_v23, 2  ;;  %v1936_v0 = vadd.f32 %v1935_v41, %v1934_v17 }
 0x194   : > { %v1916_v53 = vadd.f32 %v1915_v54, %v1914_v23  ;;  %v1937_v56 = vrot.slane %v1936_v0, 2 }
 0x196   : > { %v1917_v14 = vrot.slane %v1916_v53, 1  ;;  %v1938_v33 = vadd.f32 %v1937_v56, %v1936_v0 }
 0x198   : > { %v1918_v42 = vadd.f32 %v1917_v14, %v1916_v53  ;;  %v1939_v45 = vrot.slane %v1938_v33, 1 }
 0x19a   : > { %1919 = vst [vmem:[%s216_s6] sm:$0x1] %v1918_v42  ;;  %v1940_v51 = vadd.f32 %v1939_v45, %v1938_v33 }
 0x19c   : > { %1941 = vst [vmem:[%s219_s9] sm:$0x1] %v1940_v51 }
 0x19d PF: > { %s15_s15 = sadd.s32 1, %s2843_s15  }
 0x19e   : > { %p12_p5 = scmp.ge.s32.totalorder %s15_s15, 4  }
 0x1a0   :  { %14 = sbr.rel (!%p12_p5) target bundleno = 1 (0x1), region = 93 }

</bundles_post_ra>
